<compile_context>
chip_gen: v5e
topology: v5e:2x2
jax: 0.10.0
libtpu: 0.0.40
codegen_flags: <defaults>
</compile_context>

<pallas_src>
import math

import jax
import jax.numpy as jnp
import numpy as np
from jax.experimental import pallas as pl
from jax.experimental.pallas import tpu as pltpu

KSIZE = 5          # Conv1d kernel size
NFILT = 200        # Conv1d out channels
H2 = NFILT // 2    # pooled channel dim (100)
HP = 128           # lane-padded pooled channel dim


def _round_up(x, m):
    return ((x + m - 1) // m) * m


def nalepa_kernel(pe_ref, po_ref, wce_ref, wco_ref, bce_ref, bco_ref,
                  w1_ref, b1_ref, w2_ref, b2_ref, w3_ref, b3_ref, out_ref):
    """One batch block of the full forward pass.

    pe_ref/po_ref : (bn, W2*5)      bf16 im2col patches, even/odd time
    wce/wco       : (W2*5, W2*128)  bf16 block-diagonal conv weights
                                    (even/odd output channels, zero-padded 100->128)
    bce/bco       : (1, W2*128)     f32 conv biases broadcast over time blocks
    w1_ref        : (W2*128, 512)   bf16 fc1 weight reordered to pooled layout
    b1/w2/b2/w3/b3: fc biases (f32) / transposed fc weights (bf16, classes padded)
    out_ref       : (bn, ncls_pad)  f32
    """
    pe = pe_ref[...]
    po = po_ref[...]
    wce = wce_ref[...]
    wco = wco_ref[...]

    # Conv1d as 4 block-diagonal matmuls -> (bn, W2*128), f32 accumulation.
    ee = jnp.dot(pe, wce, preferred_element_type=jnp.float32)  # even time, even chan
    oe = jnp.dot(po, wce, preferred_element_type=jnp.float32)  # odd  time, even chan
    eo = jnp.dot(pe, wco, preferred_element_type=jnp.float32)  # even time, odd  chan
    oo = jnp.dot(po, wco, preferred_element_type=jnp.float32)  # odd  time, odd  chan

    # MaxPool2d(2) over (channel, time) with bias folded after the time max;
    # ReLU commutes with max so it is applied once at the end.
    ce = jnp.maximum(ee, oe) + bce_ref[...]
    co = jnp.maximum(eo, oo) + bco_ref[...]
    pooled = jnp.maximum(jnp.maximum(ce, co), 0.0)             # (bn, W2*128), f32

    # fc1 as a single K = W2*128 matmul (flatten fused via weight reordering).
    h1 = jnp.maximum(
        jnp.dot(pooled.astype(w1_ref.dtype), w1_ref[...],
                preferred_element_type=jnp.float32) + b1_ref[...], 0.0)
    h2 = jnp.maximum(
        jnp.dot(h1.astype(w2_ref.dtype), w2_ref[...],
                preferred_element_type=jnp.float32) + b2_ref[...], 0.0)
    out_ref[...] = (jnp.dot(h2.astype(w3_ref.dtype), w3_ref[...],
                            preferred_element_type=jnp.float32) + b3_ref[...])


def nalepa_forward(x, params, *, block_n=256):
    (conv_w, conv_b, fc1_w, fc1_b, fc2_w, fc2_b, fc3_w, fc3_b) = params
    N, C = x.shape[0], x.shape[1]
    L_out = C - (KSIZE - 1)
    W2 = L_out // 2
    n_classes = fc3_w.shape[0]
    hid1 = fc1_w.shape[0]              # 512
    hid2 = fc2_w.shape[0]              # 128
    KIN = W2 * KSIZE                   # flattened patch width
    KFC = W2 * HP                      # fc1 contraction dim (lane-padded)
    ncp = _round_up(n_classes, 128)    # lane-padded class dim

    # --- batch blocking / padding ---------------------------------------
    bn = min(_round_up(block_n, 8), _round_up(N, 8))
    n_pad = _round_up(N, bn)

    xs = x.reshape(N, C).astype(jnp.float32)
    if n_pad != N:
        xs = jnp.pad(xs, ((0, n_pad - N), (0, 0)))

    # --- glue: lane-dense im2col patches, split by time parity ----------
    # pe[n, w*5 + k] = xs[n, 2w + k];  po[n, w*5 + k] = xs[n, 2w + 1 + k]
    idx_e = (2 * jnp.arange(W2)[:, None] + jnp.arange(KSIZE)[None, :]).reshape(-1)
    pe_flat = xs[:, idx_e].astype(jnp.bfloat16)                 # (n_pad, W2*5)
    po_flat = xs[:, idx_e + 1].astype(jnp.bfloat16)

    # --- glue: block-diagonal conv weights, channel dim padded 100->128 -
    wce = jnp.pad(jnp.transpose(conv_w[0::2, 0, :]), ((0, 0), (0, HP - H2)))  # (5,128)
    wco = jnp.pad(jnp.transpose(conv_w[1::2, 0, :]), ((0, 0), (0, HP - H2)))
    eye = jnp.eye(W2, dtype=jnp.float32)
    wce_bd = jnp.einsum('ab,kh->akbh', eye, wce).reshape(KIN, KFC).astype(jnp.bfloat16)
    wco_bd = jnp.einsum('ab,kh->akbh', eye, wco).reshape(KIN, KFC).astype(jnp.bfloat16)
    bce_big = jnp.tile(jnp.pad(conv_b[0::2], (0, HP - H2)), W2)[None, :].astype(jnp.float32)
    bco_big = jnp.tile(jnp.pad(conv_b[1::2], (0, HP - H2)), W2)[None, :].astype(jnp.float32)

    # --- glue: fc1 weight reordered to pooled layout (row = w*128 + h) ---
    # PyTorch flatten index f = h*W2 + w  (pooled shape (N, 100, W2)).
    w1_3 = jnp.transpose(fc1_w.reshape(hid1, H2, W2), (2, 1, 0))     # (W2, 100, 512)
    w1_3 = jnp.pad(w1_3, ((0, 0), (0, HP - H2), (0, 0)))             # (W2, 128, 512)
    w1_big = w1_3.reshape(KFC, hid1).astype(jnp.bfloat16)
    b1 = fc1_b[None, :].astype(jnp.float32)
    w2t = jnp.transpose(fc2_w).astype(jnp.bfloat16)                  # (512, 128)
    b2 = fc2_b[None, :].astype(jnp.float32)
    w3t = jnp.pad(jnp.transpose(fc3_w), ((0, 0), (0, ncp - n_classes))).astype(jnp.bfloat16)
    b3 = jnp.pad(fc3_b, (0, ncp - n_classes))[None, :].astype(jnp.float32)

    args = (pe_flat, po_flat, wce_bd, wco_bd, bce_big, bco_big,
            w1_big, b1, w2t, b2, w3t, b3)

    const = lambda i: (0, 0)           # weights: VMEM-resident across grid steps
    batched = lambda i: (i, 0)
    in_specs = [
        pl.BlockSpec((bn, KIN), batched),       # pe
        pl.BlockSpec((bn, KIN), batched),       # po
        pl.BlockSpec((KIN, KFC), const),        # wce_bd
        pl.BlockSpec((KIN, KFC), const),        # wco_bd
        pl.BlockSpec((1, KFC), const),          # bce
        pl.BlockSpec((1, KFC), const),          # bco
        pl.BlockSpec((KFC, hid1), const),       # w1
        pl.BlockSpec((1, hid1), const),         # b1
        pl.BlockSpec((hid1, hid2), const),      # w2
        pl.BlockSpec((1, hid2), const),         # b2
        pl.BlockSpec((hid2, ncp), const),       # w3 (class-padded)
        pl.BlockSpec((1, ncp), const),          # b3
    ]

    out = pl.pallas_call(
        nalepa_kernel,
        out_shape=jax.ShapeDtypeStruct((n_pad, ncp), jnp.float32),
        grid=(n_pad // bn,),
        in_specs=in_specs,
        out_specs=pl.BlockSpec((bn, ncp), batched),
        compiler_params=pltpu.CompilerParams(
            dimension_semantics=("parallel",)),
    )(*args)

    return out[:N, :n_classes]


def reference_forward(x, params):
    """Pure-JAX (f32) mirror of the PyTorch forward (for verification)."""
    (conv_w, conv_b, fc1_w, fc1_b, fc2_w, fc2_b, fc3_w, fc3_b) = params
    N, C = x.shape[0], x.shape[1]
    L_out = C - (KSIZE - 1)
    xs = x.reshape(N, C)
    patches = jnp.stack([xs[:, i:i + L_out] for i in range(KSIZE)], axis=-1)
    conv = jnp.einsum('nti,koi->nkt', patches, conv_w) + conv_b[None, :, None]
    conv = jnp.maximum(conv, 0.0)
    W2 = L_out // 2
    pooled = conv[:, :2 * H2, :2 * W2].reshape(N, H2, 2, W2, 2).max(axis=(2, 4))
    feat = pooled.reshape(N, H2 * W2)
    h1 = jnp.maximum(feat @ fc1_w.T + fc1_b, 0.0)
    h2 = jnp.maximum(h1 @ fc2_w.T + fc2_b, 0.0)
    return h2 @ fc3_w.T + fc3_b


def init_params(key, input_channels, n_classes):
    """Deterministic kaiming-normal weights, small biases (synthetic)."""
    feature_size = H2 * ((input_channels - (KSIZE - 1)) // 2)
    ks = jax.random.split(key, 8)

    def kaiming(k, shape, fan_in):
        return jax.random.normal(k, shape, jnp.float32) * math.sqrt(2.0 / fan_in)

    conv_w = kaiming(ks[0], (NFILT, 1, KSIZE), KSIZE)
    conv_b = 0.1 * jax.random.normal(ks[1], (NFILT,), jnp.float32)
    fc1_w = kaiming(ks[2], (512, feature_size), feature_size)
    fc1_b = 0.1 * jax.random.normal(ks[3], (512,), jnp.float32)
    fc2_w = kaiming(ks[4], (128, 512), 512)
    fc2_b = 0.1 * jax.random.normal(ks[5], (128,), jnp.float32)
    fc3_w = kaiming(ks[6], (n_classes, 128), 128)
    fc3_b = 0.1 * jax.random.normal(ks[7], (n_classes,), jnp.float32)
    return (conv_w, conv_b, fc1_w, fc1_b, fc2_w, fc2_b, fc3_w, fc3_b)


if __name__ == "__main__":
    # Small shapes: 48 "pixels", 20 spectral channels, 10 classes.
    # block_n=16 -> 3 batch blocks, exercising the parallel grid.
    N, C, n_classes = 48, 20, 10      # feature_size = 100 * (20-4)//2 = 800

    key = jax.random.PRNGKey(0)
    pkey, xkey = jax.random.split(key)
    params = init_params(pkey, C, n_classes)

    x = jax.random.normal(xkey, (N, C, 1, 1), jnp.float32)

    out = jax.block_until_ready(nalepa_forward(x, params, block_n=16))
    ref = jax.block_until_ready(reference_forward(x, params))

    assert out.shape == (N, n_classes), out.shape
    # bf16 MXU operands vs f32 reference -> slightly looser tolerance.
    np.testing.assert_allclose(np.asarray(out), np.asarray(ref),
                               rtol=5e-2, atol=1e-1)
    print("KERNEL_OK")
</pallas_src>

<mosaic_0001>
module attributes {stable_mosaic.version = 11 : i64} {
  func.func @nalepa_kernel(%arg0: i32, %arg1: memref<16x40xbf16, #tpu.memory_space<vmem>>, %arg2: memref<16x40xbf16, #tpu.memory_space<vmem>>, %arg3: memref<40x1024xbf16, #tpu.memory_space<vmem>>, %arg4: memref<40x1024xbf16, #tpu.memory_space<vmem>>, %arg5: memref<1x1024xf32, #tpu.memory_space<vmem>>, %arg6: memref<1x1024xf32, #tpu.memory_space<vmem>>, %arg7: memref<1024x512xbf16, #tpu.memory_space<vmem>>, %arg8: memref<1x512xf32, #tpu.memory_space<vmem>>, %arg9: memref<512x128xbf16, #tpu.memory_space<vmem>>, %arg10: memref<1x128xf32, #tpu.memory_space<vmem>>, %arg11: memref<128x128xbf16, #tpu.memory_space<vmem>>, %arg12: memref<1x128xf32, #tpu.memory_space<vmem>>, %arg13: memref<16x128xf32, #tpu.memory_space<vmem>>) attributes {dimension_semantics = [#tpu.dimension_semantics<parallel>], iteration_bounds = array<i64: 3>, scalar_prefetch = 0 : i64, scratch_operands = 0 : i64, tpu.core_type = #tpu.core_type<tc>, window_params = [{transform_indices = @transform_0, window_bounds = array<i64: 16, 40>}, {transform_indices = @transform_1, window_bounds = array<i64: 16, 40>}, {pipeline_mode = #tpu.pipeline_mode<synchronous>, transform_indices = @transform_2, window_bounds = array<i64: 40, 1024>}, {pipeline_mode = #tpu.pipeline_mode<synchronous>, transform_indices = @transform_3, window_bounds = array<i64: 40, 1024>}, {pipeline_mode = #tpu.pipeline_mode<synchronous>, transform_indices = @transform_4, window_bounds = array<i64: 1, 1024>}, {pipeline_mode = #tpu.pipeline_mode<synchronous>, transform_indices = @transform_5, window_bounds = array<i64: 1, 1024>}, {pipeline_mode = #tpu.pipeline_mode<synchronous>, transform_indices = @transform_6, window_bounds = array<i64: 1024, 512>}, {pipeline_mode = #tpu.pipeline_mode<synchronous>, transform_indices = @transform_7, window_bounds = array<i64: 1, 512>}, {pipeline_mode = #tpu.pipeline_mode<synchronous>, transform_indices = @transform_8, window_bounds = array<i64: 512, 128>}, {pipeline_mode = #tpu.pipeline_mode<synchronous>, transform_indices = @transform_9, window_bounds = array<i64: 1, 128>}, {pipeline_mode = #tpu.pipeline_mode<synchronous>, transform_indices = @transform_10, window_bounds = array<i64: 128, 128>}, {pipeline_mode = #tpu.pipeline_mode<synchronous>, transform_indices = @transform_11, window_bounds = array<i64: 1, 128>}, {transform_indices = @transform_12, window_bounds = array<i64: 16, 128>}]} {
    %c0 = arith.constant 0 : index
    %c0_0 = arith.constant 0 : index
    %0 = vector.load %arg1[%c0, %c0_0] : memref<16x40xbf16, #tpu.memory_space<vmem>>, vector<16x40xbf16>
    %c0_1 = arith.constant 0 : index
    %c0_2 = arith.constant 0 : index
    %1 = vector.load %arg2[%c0_1, %c0_2] : memref<16x40xbf16, #tpu.memory_space<vmem>>, vector<16x40xbf16>
    %c0_3 = arith.constant 0 : index
    %c0_4 = arith.constant 0 : index
    %2 = vector.load %arg3[%c0_3, %c0_4] : memref<40x1024xbf16, #tpu.memory_space<vmem>>, vector<40x1024xbf16>
    %c0_5 = arith.constant 0 : index
    %c0_6 = arith.constant 0 : index
    %3 = vector.load %arg4[%c0_5, %c0_6] : memref<40x1024xbf16, #tpu.memory_space<vmem>>, vector<40x1024xbf16>
    %cst = arith.constant dense<0.000000e+00> : vector<16x1024xf32>
    %4 = tpu.matmul %0, %2, %cst {dimension_numbers = #tpu.dot_dimension_numbers<[1], [0], [0], [1], [0, 0, 1, 1], [], []>} : vector<16x40xbf16>, vector<40x1024xbf16>, vector<16x1024xf32> -> vector<16x1024xf32>
    %cst_7 = arith.constant dense<0.000000e+00> : vector<16x1024xf32>
    %5 = tpu.matmul %1, %2, %cst_7 {dimension_numbers = #tpu.dot_dimension_numbers<[1], [0], [0], [1], [0, 0, 1, 1], [], []>} : vector<16x40xbf16>, vector<40x1024xbf16>, vector<16x1024xf32> -> vector<16x1024xf32>
    %cst_8 = arith.constant dense<0.000000e+00> : vector<16x1024xf32>
    %6 = tpu.matmul %0, %3, %cst_8 {dimension_numbers = #tpu.dot_dimension_numbers<[1], [0], [0], [1], [0, 0, 1, 1], [], []>} : vector<16x40xbf16>, vector<40x1024xbf16>, vector<16x1024xf32> -> vector<16x1024xf32>
    %cst_9 = arith.constant dense<0.000000e+00> : vector<16x1024xf32>
    %7 = tpu.matmul %1, %3, %cst_9 {dimension_numbers = #tpu.dot_dimension_numbers<[1], [0], [0], [1], [0, 0, 1, 1], [], []>} : vector<16x40xbf16>, vector<40x1024xbf16>, vector<16x1024xf32> -> vector<16x1024xf32>
    %8 = arith.maximumf %4, %5 : vector<16x1024xf32>
    %c0_10 = arith.constant 0 : index
    %c0_11 = arith.constant 0 : index
    %9 = vector.load %arg5[%c0_10, %c0_11] : memref<1x1024xf32, #tpu.memory_space<vmem>>, vector<1x1024xf32>
    %10 = vector.broadcast %9 : vector<1x1024xf32> to vector<16x1024xf32>
    %11 = arith.addf %8, %10 : vector<16x1024xf32>
    %12 = arith.maximumf %6, %7 : vector<16x1024xf32>
    %c0_12 = arith.constant 0 : index
    %c0_13 = arith.constant 0 : index
    %13 = vector.load %arg6[%c0_12, %c0_13] : memref<1x1024xf32, #tpu.memory_space<vmem>>, vector<1x1024xf32>
    %14 = vector.broadcast %13 : vector<1x1024xf32> to vector<16x1024xf32>
    %15 = arith.addf %12, %14 : vector<16x1024xf32>
    %16 = arith.maximumf %11, %15 : vector<16x1024xf32>
    %cst_14 = arith.constant 0.000000e+00 : f32
    %17 = vector.broadcast %cst_14 : f32 to vector<16x1024xf32>
    %18 = arith.maximumf %16, %17 : vector<16x1024xf32>
    %19 = arith.truncf %18 : vector<16x1024xf32> to vector<16x1024xbf16>
    %c0_15 = arith.constant 0 : index
    %c0_16 = arith.constant 0 : index
    %20 = vector.load %arg7[%c0_15, %c0_16] : memref<1024x512xbf16, #tpu.memory_space<vmem>>, vector<1024x512xbf16>
    %cst_17 = arith.constant dense<0.000000e+00> : vector<16x512xf32>
    %21 = tpu.matmul %19, %20, %cst_17 {dimension_numbers = #tpu.dot_dimension_numbers<[1], [0], [0], [1], [0, 0, 1, 1], [], []>} : vector<16x1024xbf16>, vector<1024x512xbf16>, vector<16x512xf32> -> vector<16x512xf32>
    %c0_18 = arith.constant 0 : index
    %c0_19 = arith.constant 0 : index
    %22 = vector.load %arg8[%c0_18, %c0_19] : memref<1x512xf32, #tpu.memory_space<vmem>>, vector<1x512xf32>
    %23 = vector.broadcast %22 : vector<1x512xf32> to vector<16x512xf32>
    %24 = arith.addf %21, %23 : vector<16x512xf32>
    %cst_20 = arith.constant 0.000000e+00 : f32
    %25 = vector.broadcast %cst_20 : f32 to vector<16x512xf32>
    %26 = arith.maximumf %24, %25 : vector<16x512xf32>
    %27 = arith.truncf %26 : vector<16x512xf32> to vector<16x512xbf16>
    %c0_21 = arith.constant 0 : index
    %c0_22 = arith.constant 0 : index
    %28 = vector.load %arg9[%c0_21, %c0_22] : memref<512x128xbf16, #tpu.memory_space<vmem>>, vector<512x128xbf16>
    %cst_23 = arith.constant dense<0.000000e+00> : vector<16x128xf32>
    %29 = tpu.matmul %27, %28, %cst_23 {dimension_numbers = #tpu.dot_dimension_numbers<[1], [0], [0], [1], [0, 0, 1, 1], [], []>} : vector<16x512xbf16>, vector<512x128xbf16>, vector<16x128xf32> -> vector<16x128xf32>
    %c0_24 = arith.constant 0 : index
    %c0_25 = arith.constant 0 : index
    %30 = vector.load %arg10[%c0_24, %c0_25] : memref<1x128xf32, #tpu.memory_space<vmem>>, vector<1x128xf32>
    %31 = vector.broadcast %30 : vector<1x128xf32> to vector<16x128xf32>
    %32 = arith.addf %29, %31 : vector<16x128xf32>
    %cst_26 = arith.constant 0.000000e+00 : f32
    %33 = vector.broadcast %cst_26 : f32 to vector<16x128xf32>
    %34 = arith.maximumf %32, %33 : vector<16x128xf32>
    %35 = arith.truncf %34 : vector<16x128xf32> to vector<16x128xbf16>
    %c0_27 = arith.constant 0 : index
    %c0_28 = arith.constant 0 : index
    %36 = vector.load %arg11[%c0_27, %c0_28] : memref<128x128xbf16, #tpu.memory_space<vmem>>, vector<128x128xbf16>
    %cst_29 = arith.constant dense<0.000000e+00> : vector<16x128xf32>
    %37 = tpu.matmul %35, %36, %cst_29 {dimension_numbers = #tpu.dot_dimension_numbers<[1], [0], [0], [1], [0, 0, 1, 1], [], []>} : vector<16x128xbf16>, vector<128x128xbf16>, vector<16x128xf32> -> vector<16x128xf32>
    %c0_30 = arith.constant 0 : index
    %c0_31 = arith.constant 0 : index
    %38 = vector.load %arg12[%c0_30, %c0_31] : memref<1x128xf32, #tpu.memory_space<vmem>>, vector<1x128xf32>
    %39 = vector.broadcast %38 : vector<1x128xf32> to vector<16x128xf32>
    %40 = arith.addf %37, %39 : vector<16x128xf32>
    %c0_32 = arith.constant 0 : index
    %c0_33 = arith.constant 0 : index
    %41 = vector.load %arg13[%c0_32, %c0_33] : memref<16x128xf32, #tpu.memory_space<vmem>>, vector<16x128xf32>
    tpu.vector_store %arg13[%c0_32, %c0_33], %40 {strides = array<i32>} : memref<16x128xf32, #tpu.memory_space<vmem>>, vector<16x128xf32>,
    return
  }
  func.func @transform_0(%arg0: i32) -> (i32, i32) {
    %c0_i32 = arith.constant 0 : i32
    %c0_i32_0 = arith.constant 0 : i32
    return %arg0, %c0_i32 : i32, i32
  }
  func.func @transform_1(%arg0: i32) -> (i32, i32) {
    %c0_i32 = arith.constant 0 : i32
    %c0_i32_0 = arith.constant 0 : i32
    return %arg0, %c0_i32 : i32, i32
  }
  func.func @transform_2(%arg0: i32) -> (i32, i32) {
    %c0_i32 = arith.constant 0 : i32
    %c0_i32_0 = arith.constant 0 : i32
    %c0_i32_1 = arith.constant 0 : i32
    return %c0_i32, %c0_i32_0 : i32, i32
  }
  func.func @transform_3(%arg0: i32) -> (i32, i32) {
    %c0_i32 = arith.constant 0 : i32
    %c0_i32_0 = arith.constant 0 : i32
    %c0_i32_1 = arith.constant 0 : i32
    return %c0_i32, %c0_i32_0 : i32, i32
  }
  func.func @transform_4(%arg0: i32) -> (i32, i32) {
    %c0_i32 = arith.constant 0 : i32
    %c0_i32_0 = arith.constant 0 : i32
    %c0_i32_1 = arith.constant 0 : i32
    return %c0_i32, %c0_i32_0 : i32, i32
  }
  func.func @transform_5(%arg0: i32) -> (i32, i32) {
    %c0_i32 = arith.constant 0 : i32
    %c0_i32_0 = arith.constant 0 : i32
    %c0_i32_1 = arith.constant 0 : i32
    return %c0_i32, %c0_i32_0 : i32, i32
  }
  func.func @transform_6(%arg0: i32) -> (i32, i32) {
    %c0_i32 = arith.constant 0 : i32
    %c0_i32_0 = arith.constant 0 : i32
    %c0_i32_1 = arith.constant 0 : i32
    return %c0_i32, %c0_i32_0 : i32, i32
  }
  func.func @transform_7(%arg0: i32) -> (i32, i32) {
    %c0_i32 = arith.constant 0 : i32
    %c0_i32_0 = arith.constant 0 : i32
    %c0_i32_1 = arith.constant 0 : i32
    return %c0_i32, %c0_i32_0 : i32, i32
  }
  func.func @transform_8(%arg0: i32) -> (i32, i32) {
    %c0_i32 = arith.constant 0 : i32
    %c0_i32_0 = arith.constant 0 : i32
    %c0_i32_1 = arith.constant 0 : i32
    return %c0_i32, %c0_i32_0 : i32, i32
  }
  func.func @transform_9(%arg0: i32) -> (i32, i32) {
    %c0_i32 = arith.constant 0 : i32
    %c0_i32_0 = arith.constant 0 : i32
    %c0_i32_1 = arith.constant 0 : i32
    return %c0_i32, %c0_i32_0 : i32, i32
  }
  func.func @transform_10(%arg0: i32) -> (i32, i32) {
    %c0_i32 = arith.constant 0 : i32
    %c0_i32_0 = arith.constant 0 : i32
    %c0_i32_1 = arith.constant 0 : i32
    return %c0_i32, %c0_i32_0 : i32, i32
  }
  func.func @transform_11(%arg0: i32) -> (i32, i32) {
    %c0_i32 = arith.constant 0 : i32
    %c0_i32_0 = arith.constant 0 : i32
    %c0_i32_1 = arith.constant 0 : i32
    return %c0_i32, %c0_i32_0 : i32, i32
  }
  func.func @transform_12(%arg0: i32) -> (i32, i32) {
    %c0_i32 = arith.constant 0 : i32
    %c0_i32_0 = arith.constant 0 : i32
    return %arg0, %c0_i32 : i32, i32
  }
}

</mosaic_0001>

<bundles_post_ra>
// kernel: tpu_custom_call.1
= control target key start
LH: loop header
LB: loop body
LE: loop exit
PB: predicated region body
PF: predicated region fallthrough
CT: control target
= control target key end

     0   :  { %s6845_s0 = inlined_call_operand.vmem [shape: bf16[48,40], index: 0, kind: input, shape index: {}]   ;;  %s6846_s1 = inlined_call_operand.vmem [shape: bf16[48,40], index: 1, kind: input, shape index: {}]   ;;  %s6847_s2 = inlined_call_operand.hbm [shape: bf16[40,1024], index: 2, kind: input, shape index: {}]   ;;  %s6848_s3 = inlined_call_operand.hbm [shape: bf16[40,1024], index: 3, kind: input, shape index: {}]   ;;  %s6849_s4 = inlined_call_operand.hbm [shape: f32[1,1024], index: 4, kind: input, shape index: {}]   ;;  %s6850_s5 = inlined_call_operand.vmem [shape: f32[1,1024], index: 5, kind: input, shape index: {}]   ;;  %s6851_s6 = inlined_call_operand.hbm [shape: bf16[1024,512], index: 6, kind: input, shape index: {}]   ;;  %s6852_s7 = inlined_call_operand.hbm [shape: f32[1,512], index: 7, kind: input, shape index: {}]   ;;  %s6853_s8 = inlined_call_operand.hbm [shape: bf16[512,128], index: 8, kind: input, shape index: {}]   ;;  %s6854_s9 = inlined_call_operand.vmem [shape: f32[1,128], index: 9, kind: input, shape index: {}]   ;;  %s6855_s10 = inlined_call_operand.vmem [shape: bf16[128,128], index: 10, kind: input, shape index: {}]   ;;  %s6856_s11 = inlined_call_operand.vmem [shape: f32[1,128], index: 11, kind: input, shape index: {}]   ;;  %s6857_s12 = inlined_call_operand.hbm [shape: f32[48,128], index: 12, kind: output, shape index: {}]  }
   0x1   :  { %6868 = sst [smem:[#allocation27_spill]] %s6848_s3 }
   0x2   :  { %6869 = sst [smem:[#allocation28_spill]] %s6851_s6 }
   0x3   :  { %6870 = sst [smem:[#allocation29_spill]] %s6857_s12 }
   0x4   :  { %17 = vsyncpa [#allocation3], 0 }
   0x5   :  { %18 = vsyncpa [#allocation6], 0 }
   0x6   :  { %19 = vsyncpa [#allocation9], 0 }
   0x7   :  { %20 = vsyncpa [#allocation12], 0 }
   0x8   :  { %21 = vsyncpa [#allocation4], 0 }
   0x9   :  { %23 = vsyncpa [#allocation4 + $0x1], 0  ;;  %s6149_s21 = smov 0   ;;  %s6151_s22 = smov 0  }
   0xa   :  { %s6153_s23 = smov 0   ;;  %s6155_s24 = smov 0  }
   0xb LB: > { %6871 = sst [smem:[#allocation19_spill]] %s6056_s21  ;;  %s6170_s25 = sadd.s32 4294967295, %s6068_s24   ;;  %s6068_s24 = sphi %s6155_s24, %s6898_s24   ;;  %s6064_s23 = sphi %s6153_s23, %s6900_s23   ;;  %s6060_s22 = sphi %s6151_s22, %s6902_s22   ;;  %s6056_s21 = sphi %s6149_s21, %s6901_s21  }
   0xc   : > { %6872 = sst [smem:[#allocation20_spill]] %s6064_s23  ;;  %s3991_s26 = sadd.s32 4294967294, %s6068_s24  }
   0xd   : > { %6873 = sst [smem:[#allocation21_spill]] %s6068_s24  ;;  %s6174_s27 = sadd.s32 1, %s6068_s24  }
   0xe   : > { %6874 = sst [smem:[#allocation22_spill]] %s6174_s27  ;;  %s298_s28 = sadd.s32 1, %s6064_s23 }
   0xf   : > { %s295_s29 = ssub.s32 %s6068_s24, %s6174_s27  ;;  %p308_p0 = scmp.ne.s32.totalorder %s6064_s23, %s6060_s22 }
  0x10   : > { %p296_p1 = scmp.eq.s32.totalorder %s295_s29, 0  ;;  %p309_p2 = scmp.eq.s32.totalorder %s6170_s25, 2 }
  0x11   : > { %p314_p3 = scmp.ne.s32.totalorder %s6060_s22, %s6056_s21  ;;  %p315_p4 = scmp.eq.s32.totalorder %s3991_s26, 2 }
  0x12   : > { %s6185_s30 = scalar_select %p296_p1, %s6064_s23, %s298_s28  }
  0x13   : > { %p6187_p5 = por %p309_p2, %p308_p0  ;;  %p6191_p6 = por %p315_p4, %p314_p3 }
  0x14   : > { %6875 = sst [smem:[#allocation23_spill]] %s6185_s30  ;;  %p3992_p7 = scmp.ge.s32.totalorder %s6068_s24, 1 }
  0x15   : > { %s6876_s13 = scalar_select %p6187_p5, 1, 0 }
  0x16   : > { %s6878_s14 = scalar_select %p6191_p6, 1, 0 }
  0x17   : > { %6877 = sst [smem:[#allocation24_spill]] %s6876_s13  ;;  %p322_p8 = scmp.lt.s32.totalorder %s6068_s24, 4 }
  0x18   : > { %6879 = sst [smem:[#allocation25_spill]] %s6878_s14  ;;  %p5749_p9 = scmp.eq.s32.totalorder %s6170_s25, 0 }
  0x19   : > { %p6198_p10 = pnand %p3992_p7, %p322_p8  ;;  %s6881_s3 = sld [smem:[#allocation27_spill]] }
  0x1a   : > { %s6882_s6 = sld [smem:[#allocation28_spill]]  ;;  %s6070_s29 = smov [#allocation5]  }
  0x1b   : > { %p5726_p11 = pneg %p6198_p10  ;;  %s349_s30 = sshll.u32 %s6070_s29, 4  ;;  %s350_s30 = int_to_ptr.vmem [resolvable:$true] %s349_s30 }
  0x1c   : > { %s6071_s16 = smov 512   ;;  %s6072_s17 = smov 32  }
  0x1d   : > { %p6212_p12 = pnand %p5749_p9, %p5726_p11  ;;  %s6074_s19 = smov 256  }
  0x1e   : > { %s6075_s20 = smov 16   ;;  %s333_s14 = sshll.u32 %s6847_s2, 4  ;;  %s334_s14 = int_to_ptr.hbm [resolvable:$true] %s333_s14 }
  0x1f   : > { %s347_s18 = sshll.u32 %s6881_s3, 4  ;;  %s6073_s3 = smov [#allocation8]   ;;  %s348_s18 = int_to_ptr.hbm [resolvable:$true] %s347_s18 }
  0x20   : > { %s376_s26 = sshll.u32 %s6882_s6, 4  ;;  %s378_s23 = sshll.u32 %s6073_s3, 4  ;;  %s377_s26 = int_to_ptr.hbm [resolvable:$true] %s376_s26  ;;  %s379_s23 = int_to_ptr.vmem [resolvable:$true] %s378_s23 }
  0x21   : > { %5732 = dma.hbm_to_vmem [thread:$0]  (!%p6212_p12), %s348_s18, 2560, %s350_s30, [#allocation6], %s6071_s16, %s6071_s16, %s6072_s17  }
  0x22   : > { %5738 = dma.hbm_to_vmem [thread:$0]  (!%p6212_p12), %s377_s26, 32768, %s379_s23, [#allocation9], %s6074_s19, %s6074_s19, %s6075_s20  }
  0x23   : > { %s6076_s29 = smov [#allocation2]   ;;  %s362_s30 = sshll.u32 %s6849_s4, 4  ;;  %s363_s30 = int_to_ptr.hbm [resolvable:$true] %s362_s30 }
  0x24   : > { %s335_s21 = sshll.u32 %s6076_s29, 4  ;;  %s6077_s3 = smov [#allocation7]   ;;  %s336_s21 = int_to_ptr.vmem [resolvable:$true] %s335_s21 }
  0x25   : > { %5729 = dma.hbm_to_vmem [thread:$0]  (!%p6212_p12), %s334_s14, 2560, %s336_s21, [#allocation3], %s6071_s16, %s6071_s16, %s6072_s17  }
  0x26   : > { %s364_s18 = sshll.u32 %s6077_s3, 4  ;;  %s391_s6 = sshll.u32 %s6852_s7, 4  ;;  %s365_s18 = int_to_ptr.vmem [resolvable:$true] %s364_s18  ;;  %s392_s6 = int_to_ptr.hbm [resolvable:$true] %s391_s6 }
  0x27   : > { %5735 = dma.hbm_to_vmem [thread:$0]  (!%p6212_p12), %s363_s30, 128, %s365_s18, [#allocation6]  }
  0x28   : > { %s402_s19 = sshll.u32 %s6853_s8, 4  ;;  %s6078_s12 = smov [#allocation10]   ;;  %s403_s19 = int_to_ptr.hbm [resolvable:$true] %s402_s19 }
  0x29   : > { %s393_s24 = sshll.u32 %s6078_s12, 4  ;;  %s6079_s21 = smov [#allocation11]   ;;  %s394_s24 = int_to_ptr.vmem [resolvable:$true] %s393_s24 }
  0x2a   : > { %5741 = dma.hbm_to_vmem [thread:$0]  (!%p6212_p12), %s392_s6, 64, %s394_s24, [#allocation9]  }
  0x2b   : > { %s404_s14 = sshll.u32 %s6079_s21, 4  ;;  %s6080_s13 = smov 64   ;;  %s405_s14 = int_to_ptr.vmem [resolvable:$true] %s404_s14 }
  0x2c   : > { %s6081_s16 = smov 4   ;;  %447 = sbr.rel (%p6198_p10) target bundleno = 951 (0x3b7), region = 68 }
  0x2d   : > { %5744 = dma.hbm_to_vmem [thread:$0]  (!%p6212_p12), %s403_s19, 4096, %s405_s14, [#allocation12], %s6080_s13, %s6080_s13, %s6081_s16  }
  0x31   : > { %6035 = dma.done.wait (%p5749_p9), [#allocation3], 2560  }
  0x32   : > { %6037 = vsyncadd (%p5749_p9), [#allocation3], 4294964736 }
  0x33   : > { %6039 = dma.done.wait (%p5749_p9), [#allocation6], 2688  }
  0x34   : > { %6041 = vsyncadd (%p5749_p9), [#allocation6], 4294964608 }
  0x35   : > { %6043 = dma.done.wait (%p5749_p9), [#allocation9], 32832  }
  0x36   : > { %6045 = vsyncadd (%p5749_p9), [#allocation9], 4294934464 }
  0x37   : > { %6047 = dma.done.wait (%p5749_p9), [#allocation12], 4096  }
  0x38   : > { %6049 = vsyncadd (%p5749_p9), [#allocation12], 4294963200  ;;  %s4008_s15 = sshll.u32 %s6170_s25, 1  ;;  %v554_v0 = vld [vmem:[#allocation2 + $0x80] sm:$0xff]  ;;  %v555_v1 = vld [vmem:[#allocation2 + $0x88] sm:$0xff]  ;;  %vm687_vm0 = vcmask 1043456  }
  0x39   : > { %p521_p13 = scmp.lt.s32.totalorder %s4008_s15, 5  ;;  %v6259_v2 = vld [vmem:[#allocation2 + $0x90] sm:$0xff]  ;;  %v635_v3 = vunpack.c.l.b16 %v554_v0  ;;  %v637_v4 = vunpack.c.l.b16 %v555_v1  ;;  %v638_v5 = vunpack.c.h.b16 %v555_v1  ;;  %v4050_v7 = vld [vmem:[#allocation2 + $0x40] sm:$0xf]  ;;  %v4058_v13 = vld [vmem:[#allocation2 + $0x48] sm:$0xf]  ;;  %v636_v19 = vunpack.c.h.b16 %v554_v0 }
  0x3a   : > { %v639_v6 = vunpack.c.l.b16 %v6259_v2  ;;  %v5383_v8 = vld [vmem:[#allocation2 + $0x5c] sm:$0xf0]  ;;  %v5384_v14 = vld [vmem:[#allocation2 + $0x64] sm:$0xf0]  ;;  %v5380_v15 = vld [vmem:[#allocation2 + $0x4c] sm:$0xf]  ;;  %v640_v53 = vunpack.c.h.b16 %v6259_v2 }
  0x3b   : > { %s6904_s15 = smov (!%p521_p13, %s4008_s15), 5  ;;  %v659_v9 = vpack.c.b16 %v635_v3, %v635_v3  ;;  %v661_v10 = vpack.c.b16 %v637_v4, %v637_v4  ;;  %v662_v11 = vpack.c.b16 %v638_v5, %v638_v5  ;;  %v4060_v16 = vld [vmem:[#allocation2 + $0x68] sm:$0xf0]  ;;  %v4066_v17 = vld [vmem:[#allocation2 + $0x50] sm:$0xf]  ;;  %v6279_v24 = vor.u32 %v5383_v8, %v4050_v7  ;;  %v557_v33 = vld [vmem:[#allocation2 + $0x98] sm:$0xff] }
  0x3c   : > { %v663_v12 = vpack.c.b16 %v639_v6, %v639_v6  ;;  %v5385_v18 = vld [vmem:[#allocation2 + $0x6c] sm:$0xf0]  ;;  %s4009_s28 = sshll.u32 %s6904_s15, 2  ;;  %v6281_v25 = vor.u32 %v5384_v14, %v4058_v13  ;;  %v4018_v26 = vld [vmem:[#allocation2] sm:$0xf]  ;;  %v6285_v29 = vor.u32 %v5380_v15, %v4060_v16  ;;  %v641_v37 = vunpack.c.l.b16 %v557_v33  ;;  %s517_s6 = sand.u32 1, %s6060_s22  }
  0x3d   : > { %v6265_v20 = vsel %vm687_vm0, %v659_v9, 0  ;;  %v6268_v21 = vsel %vm687_vm0, %v661_v10, 0  ;;  %v6271_v22 = vsel %vm687_vm0, %v662_v11, 0  ;;  %v5375_v27 = vld [vmem:[#allocation2 + $0x1c] sm:$0xf0]  ;;  %v6287_v30 = vor.u32 %v5385_v18, %v4066_v17  ;;  %s524_s29 = scalar_lea.vmem %s6845_s0, %s4009_s28  ;;  %s530_s18 = scalar_lea.vmem %s6846_s1, %s4009_s28 }
  0x3e   : > { %v6274_v23 = vsel %vm687_vm0, %v663_v12, 0  ;;  %717 = vmatpush.bf16.msra.mxu1 %v6265_v20  ;;  %745 = vmatpush.bf16.msra.mxu2 %v6268_v21  ;;  %v4026_v28 = vld [vmem:[#allocation2 + $0x8] sm:$0xf]  ;;  %v5372_v32 = vld [vmem:[#allocation2 + $0xc] sm:$0xf]  ;;  %v642_v38 = vunpack.c.h.b16 %v557_v33  ;;  %v660_v39 = vpack.c.b16 %v636_v19, %v636_v19  ;;  %v4019_v40 = vor.u32 %v5375_v27, %v4018_v26  ;;  %v6304_v45 = vld [vmem:[%s524_s29] sm:$0xff] }
  0x3f   : > { %759 = vmatpush.bf16.msra.mxu3 %v6271_v22  ;;  %773 = vmatpush.bf16.msra.mxu0 %v6274_v23  ;;  %v5376_v31 = vld [vmem:[#allocation2 + $0x24] sm:$0xf0]  ;;  %v4028_v34 = vld [vmem:[#allocation2 + $0x28] sm:$0xf0]  ;;  %v4034_v35 = vld [vmem:[#allocation2 + $0x10] sm:$0xf]  ;;  %v665_v42 = vpack.c.b16 %v641_v37, %v641_v37  ;;  %v664_v63 = vpack.c.b16 %v640_v53, %v640_v53 }
  0x40   : > { %v5377_v36 = vld [vmem:[#allocation2 + $0x2c] sm:$0xf0]  ;;  %v6296_v41 = vor.u32 %v5376_v31, %v4026_v28  ;;  %v6300_v43 = vor.u32 %v5372_v32, %v4028_v34  ;;  %v666_v46 = vpack.c.b16 %v642_v38, %v642_v38  ;;  %v5379_v47 = vld [vmem:[#allocation2 + $0x44] sm:$0xf]  ;;  %v4074_v49 = vld [vmem:[#allocation2 + $0x58] sm:$0xf] }
  0x41   : > { %v6302_v44 = vor.u32 %v5377_v36, %v4034_v35  ;;  %v4052_v48 = vld [vmem:[#allocation2 + $0x60] sm:$0xf0]  ;;  %v6307_v50 = vsel %vm687_vm0, %v660_v39, 0  ;;  %v6310_v51 = vsel %vm687_vm0, %v665_v42, 0  ;;  %v5386_v52 = vld [vmem:[#allocation2 + $0x74] sm:$0xf0] }
  0x42   : > { %718 = vmatpush.bf16.msra.mxu1 %v6279_v24  ;;  %746 = vmatpush.bf16.msra.mxu2 %v6281_v25  ;;  %vm683_vm1 = vcmask 326656   ;;  %v5382_v54 = vld [vmem:[#allocation2 + $0x5c] sm:$0xf]  ;;  %v710_v55 = vsel %vm687_vm0, %v666_v46, 0  ;;  %v6319_v56 = vor.u32 %v5379_v47, %v4052_v48  ;;  %v6321_v57 = vor.u32 %v5386_v52, %v4074_v49  ;;  %v5371_v59 = vld [vmem:[#allocation2 + $0x4] sm:$0xf] }
  0x43   : > { %760 = vmatpush.bf16.msra.mxu3 %v6285_v29  ;;  %774 = vmatpush.bf16.msra.mxu0 %v6287_v30  ;;  %v4076_v58 = vld [vmem:[#allocation2 + $0x78] sm:$0xf0]  ;;  %v4020_v60 = vld [vmem:[#allocation2 + $0x20] sm:$0xf0]  ;;  %v4042_v61 = vld [vmem:[#allocation2 + $0x18] sm:$0xf] }
  0x44   : > { %v5378_v62 = vld [vmem:[#allocation2 + $0x34] sm:$0xf0]  ;;  %v4079_v0 = vor.u32 %v5382_v54, %v4076_v58  ;;  %v4023_v1 = vor.u32 %v5371_v59, %v4020_v60  ;;  %v5374_v3 = vld [vmem:[#allocation2 + $0x1c] sm:$0xf]  ;;  %v6335_v5 = vsel %vm687_vm0, %v664_v63, 0  ;;  %v6338_v9 = vld [vmem:[#allocation5 + $0x80] sm:$0xff] }
  0x45   : > { %v4043_v2 = vor.u32 %v5378_v62, %v4042_v61  ;;  %v4044_v4 = vld [vmem:[#allocation2 + $0x38] sm:$0xf0]  ;;  %v5381_v6 = vld [vmem:[#allocation2 + $0x54] sm:$0xf]  ;;  %v996_v11 = vunpack.c.l.b16 %v6338_v9  ;;  %v6354_v14 = vld [vmem:[%s530_s18] sm:$0xff]  ;;  %s4007_s27 = sshll.u32 %s517_s6, 4 }
  0x46   : > { %719 = vmatpush.bf16.msra.mxu1 %v4019_v40  ;;  %747 = vmatpush.bf16.msra.mxu2 %v6296_v41  ;;  %v4068_v7 = vld [vmem:[#allocation2 + $0x70] sm:$0xf0]  ;;  %v4047_v8 = vor.u32 %v5374_v3, %v4044_v4  ;;  %v4134_v18 = vld [vmem:[#allocation5 + $0x40] sm:$0xf]  ;;  %v4142_v32 = vld [vmem:[#allocation5 + $0x48] sm:$0xf] }
  0x47   : > { %761 = vmatpush.bf16.msra.mxu3 %v6300_v43  ;;  %775 = vmatpush.bf16.msra.mxu0 %v6302_v44  ;;  %v6342_v10 = vor.u32 %v5381_v6, %v4068_v7  ;;  %v5373_v12 = vld [vmem:[#allocation2 + $0x14] sm:$0xf]  ;;  %v1020_v16 = vpack.c.b16 %v996_v11, %v996_v11  ;;  %v5399_v19 = vld [vmem:[#allocation5 + $0x5c] sm:$0xf0]  ;;  %v5400_v33 = vld [vmem:[#allocation5 + $0x64] sm:$0xf0] }
  0x48   : > { %v4036_v13 = vld [vmem:[#allocation2 + $0x30] sm:$0xf0]  ;;  %v5396_v35 = vld [vmem:[#allocation5 + $0x4c] sm:$0xf]  ;;  %v4150_v39 = vld [vmem:[#allocation5 + $0x50] sm:$0xf] }
  0x49   : > { %4080 = vmatmul.msk.bf16.vlgmr.msra.gmra.mxu1 %vm683_vm1, %v6304_v45  ;;  %4082 = vmatmul.msk.bf16.vlgmr.msra.gmra.mxu2 %vm683_vm1, %v6304_v45  ;;  %v6356_v15 = vor.u32 %v5373_v12, %v4036_v13  ;;  %v6371_v17 = vsel %vm687_vm0, %v1020_v16, 0  ;;  %v4144_v36 = vld [vmem:[#allocation5 + $0x68] sm:$0xf0]  ;;  %v4110_v42 = vld [vmem:[#allocation5 + $0x8] sm:$0xf]  ;;  %s5699_s12 = sshll.u32 %s6170_s25, 4 }
  0x4a   : > { %731 = vmatpush.bf16.msrb.mxu1 %v6307_v50  ;;  %801 = vmatpush.bf16.msrb.mxu2 %v6310_v51  ;;  %v5392_v46 = vld [vmem:[#allocation5 + $0x24] sm:$0xf0]  ;;  %v5388_v47 = vld [vmem:[#allocation5 + $0xc] sm:$0xf]  ;;  %v4118_v49 = vld [vmem:[#allocation5 + $0x10] sm:$0xf] }
  0x4b   : > { %4083 = vmatmul.msk.bf16.vlgmr.msra.gmra.mxu3 %vm683_vm1, %v6304_v45  ;;  %4084 = vmatmul.msk.bf16.vlgmr.msra.gmra.mxu0 %vm683_vm1, %v6304_v45  ;;  %v4112_v48 = vld [vmem:[#allocation5 + $0x28] sm:$0xf0]  ;;  %v6418_v52 = vor.u32 %v5392_v46, %v4110_v42  ;;  %v5395_v61 = vld [vmem:[#allocation5 + $0x44] sm:$0xf]  ;;  %v5398_v4 = vld [vmem:[#allocation5 + $0x5c] sm:$0xf] }
  0x4c   : > { %815 = vmatpush.bf16.msrb.mxu3 %v710_v55  ;;  %837 = vmatpush.bf16.msrb.mxu0 %v6265_v20  ;;  %v575_v20 = vld [vmem:[#allocation5 + $0x88] sm:$0xff]  ;;  %v6422_v53 = vor.u32 %v5388_v47, %v4112_v48  ;;  %v4136_v62 = vld [vmem:[#allocation5 + $0x60] sm:$0xf0]  ;;  %v4126_v11 = vld [vmem:[#allocation5 + $0x18] sm:$0xf]  ;;  %s519_s21 = scalar_lea.vmem [#allocation13], %s4007_s27 }
  0x4d   : > { %v999_v26 = vunpack.c.h.b16 %v575_v20  ;;  %v4139_v6 = vor.u32 %v5395_v61, %v4136_v62  ;;  %v5394_v12 = vld [vmem:[#allocation5 + $0x34] sm:$0xf0]  ;;  %v5390_v13 = vld [vmem:[#allocation5 + $0x1c] sm:$0xf]  ;;  %v4246_v47 = vld [vmem:[#allocation8 + $0x80] sm:$0xf] }
  0x4e   : > { %732 = vmatpush.bf16.msrb.mxu1 %v6319_v56  ;;  %802 = vmatpush.bf16.msrb.mxu2 %v6321_v57  ;;  %v5421_v48 = vld [vmem:[#allocation8 + $0x8c] sm:$0xf0]  ;;  %v4678_v62 = vld [vmem:[#allocation8 + $0x3e0] sm:$0xf]  ;;  %s6894_s16 = sld [smem:[#allocation29_spill]]  ;;  %s3854_s28 = sshll.u32 %s519_s21, 4  ;;  %s3855_s28 = int_to_ptr.vmem [resolvable:$true] %s3854_s28 }
  0x4f   : > { %v5497_v61 = vld [vmem:[#allocation8 + $0x2ec] sm:$0xf0]  ;;  %s3842_s20 = scalar_lea.sflag [#allocation4], %s517_s6 }
  0x50   : > { %816 = vmatpush.bf16.msrb.mxu3 %v4079_v0  ;;  %838 = vmatpush.bf16.msrb.mxu0 %v6279_v24  ;;  %v5391_v24 = vld [vmem:[#allocation5 + $0x1c] sm:$0xf0] }
  0x52   : > { %733 = vmatpush.bf16.msrb.mxu1 %v4023_v1  ;;  %803 = vmatpush.bf16.msrb.mxu2 %v4043_v2 }
  0x54   : > { %817 = vmatpush.bf16.msrb.mxu3 %v4047_v8  ;;  %839 = vmatpush.bf16.msrb.mxu0 %v4019_v40  ;;  %v5401_v40 = vld [vmem:[#allocation5 + $0x6c] sm:$0xf0]  ;;  %s3853_s15 = scalar_lea.hbm %s6894_s16, %s5699_s12  ;;  %s6010_s18 = scalar_lea.hbm %s6894_s16, 48 }
  0x55   : > { %s3856_s17 = sshll.u32 %s3853_s15, 4  ;;  %s3857_s17 = int_to_ptr.hbm [resolvable:$true] %s3856_s17 }
  0x56   : > { %787 = vmatpush.bf16.msra.mxu1 %v6335_v5  ;;  %865 = vmatpush.bf16.msra.mxu2 %v6268_v21  ;;  %v6378_v21 = vor.u32 %v5399_v19, %v4134_v18  ;;  %v4127_v18 = vor.u32 %v5394_v12, %v4126_v11  ;;  %v4662_v11 = vld [vmem:[#allocation8 + $0x3c0] sm:$0xf]  ;;  %s6004_s29 = sshra.s32 %s3857_s17, 4  ;;  %s6005_s29 = int_to_ptr.hbm [resolvable:$true] %s6004_s29 }
  0x57   : > { %s6006_s30 = scalar_lea.hbm %s6005_s29, 16  ;;  %p6011_p3 = scmp.lt.s32.totalorder %s6005_s29, %s6894_s16 }
  0x58   : > { %879 = vmatpush.bf16.msra.mxu3 %v6271_v22  ;;  %893 = vmatpush.bf16.msra.mxu0 %v6274_v23  ;;  %v6380_v22 = vld [vmem:[#allocation5 + $0x90] sm:$0xff]  ;;  %v4102_v23 = vld [vmem:[#allocation5] sm:$0xf]  ;;  %p6007_p0 = scmp.ne.s32.totalorder %s6005_s29, %s6006_s30  ;;  %p6012_p4 = scmp.lt.s32.totalorder %s6010_s18, %s6006_s30 }
  0x59   : > { %4081 = vmatmul.msk.bf16.vlgmr.msrb.gmra.mxu1 %vm683_vm1, %v6304_v45  ;;  %4086 = vmatmul.msk.bf16.vlgmr.msrb.gmra.mxu2 %vm683_vm1, %v6304_v45  ;;  %v1000_v27 = vunpack.c.l.b16 %v6380_v22  ;;  %v6386_v28 = vor.u32 %v5391_v24, %v4102_v23  ;;  %v5397_v24 = vld [vmem:[#allocation5 + $0x54] sm:$0xf] }
  0x5a   : > { %788 = vmatpush.bf16.msra.mxu1 %v6342_v10  ;;  %866 = vmatpush.bf16.msra.mxu2 %v6281_v25  ;;  %v998_v25 = vunpack.c.l.b16 %v575_v20  ;;  %v1001_v20 = vunpack.c.h.b16 %v6380_v22  ;;  %v5389_v22 = vld [vmem:[#allocation5 + $0x14] sm:$0xf]  ;;  %p6008_p1 = pnand %p6007_p0, %p6187_p5  ;;  %p6013_p7 = por %p6012_p4, %p6011_p3 }
  0x5b   : > { %4087 = vmatmul.msk.bf16.vlgmr.msrb.gmra.mxu3 %vm683_vm1, %v6304_v45  ;;  %4092 = vmatmul.msk.bf16.vlgmr.msrb.gmra.mxu0 %vm683_vm1, %v6354_v14  ;;  %v1024_v31 = vpack.c.b16 %v1000_v27, %v1000_v27 }
  0x5c   : > { %880 = vmatpush.bf16.msra.mxu3 %v6285_v29  ;;  %894 = vmatpush.bf16.msra.mxu0 %v6287_v30  ;;  %v1022_v29 = vpack.c.b16 %v998_v25, %v998_v25  ;;  %v1023_v30 = vpack.c.b16 %v999_v26, %v999_v26  ;;  %v4152_v25 = vld [vmem:[#allocation5 + $0x70] sm:$0xf0]  ;;  %p6009_p2 = pneg %p6008_p1 }
  0x5d   : > { %v6400_v38 = vsel %vm687_vm0, %v1024_v31, 0  ;;  %v4120_v26 = vld [vmem:[#allocation5 + $0x30] sm:$0xf0]  ;;  %v4294_v31 = vld [vmem:[#allocation8 + $0xe0] sm:$0xf] }
  0x5e   : > { %789 = vmatpush.bf16.msra.mxu1 %v6356_v15  ;;  %867 = vmatpush.bf16.msra.mxu2 %v6296_v41  ;;  %v6390_v34 = vsel %vm687_vm0, %v1022_v29, 0  ;;  %v6397_v37 = vsel %vm687_vm0, %v1023_v30, 0  ;;  %v6408_v41 = vor.u32 %v5400_v33, %v4142_v32  ;;  %v4123_v27 = vor.u32 %v5389_v22, %v4120_v26  ;;  %v5433_v32 = vld [vmem:[#allocation8 + $0xec] sm:$0xf0]  ;;  %v4646_v22 = vld [vmem:[#allocation8 + $0x3a0] sm:$0xf]  ;;  %p6014_p8 = pnand %p6013_p7, %p6009_p2 }
  0x60   : > { %881 = vmatpush.bf16.msra.mxu3 %v6300_v43  ;;  %895 = vmatpush.bf16.msra.mxu0 %v6302_v44  ;;  %v6412_v43 = vor.u32 %v5396_v35, %v4144_v36  ;;  %v6414_v44 = vor.u32 %v5401_v40, %v4150_v39  ;;  %v4278_v36 = vld [vmem:[#allocation8 + $0xc0] sm:$0xf] }
  0x62   : > { %851 = vmatpush.bf16.msrb.mxu1 %v6307_v50  ;;  %921 = vmatpush.bf16.msrb.mxu2 %v6310_v51  ;;  %v5393_v50 = vld [vmem:[#allocation5 + $0x2c] sm:$0xf0]  ;;  %v577_v51 = vld [vmem:[#allocation5 + $0x98] sm:$0xff] }
  0x63   : > { %v6424_v54 = vor.u32 %v5393_v50, %v4118_v49  ;;  %v4247_v49 = vor.u32 %v5421_v48, %v4246_v47  ;;  %v4790_v47 = vld [vmem:[#allocation8 + $0x4c0] sm:$0xf]  ;;  %v5557_v48 = vld [vmem:[#allocation8 + $0x4cc] sm:$0xf0] }
  0x64   : > { %935 = vmatpush.bf16.msrb.mxu3 %v710_v55  ;;  %1073 = vmatpush.bf16.msrb.mxu0 %v6371_v17  ;;  %v997_v55 = vunpack.c.h.b16 %v6338_v9 }
  0x66   : > { %852 = vmatpush.bf16.msrb.mxu1 %v6319_v56  ;;  %922 = vmatpush.bf16.msrb.mxu2 %v6321_v57  ;;  %v1002_v56 = vunpack.c.l.b16 %v577_v51  ;;  %v1003_v57 = vunpack.c.h.b16 %v577_v51  ;;  %v1021_v58 = vpack.c.b16 %v997_v55, %v997_v55 }
  0x68   : > { %936 = vmatpush.bf16.msrb.mxu3 %v4079_v0  ;;  %1074 = vmatpush.bf16.msrb.mxu0 %v6378_v21  ;;  %v1026_v59 = vpack.c.b16 %v1002_v56, %v1002_v56  ;;  %v1027_v60 = vpack.c.b16 %v1003_v57, %v1003_v57  ;;  %v6432_v63 = vsel %vm687_vm0, %v1021_v58, 0  ;;  %v4214_v57 = vld [vmem:[#allocation8 + $0x40] sm:$0xf]  ;;  %v5413_v58 = vld [vmem:[#allocation8 + $0x4c] sm:$0xf0] }
  0x69   : > { %4085 = vmatmul.msk.bf16.vlgmr.msra.gmra.mxu1 %vm683_vm1, %v6304_v45  ;;  %4094 = vmatmul.msk.bf16.vlgmr.msra.gmra.mxu2 %vm683_vm1, %v6354_v14 }
  0x6a   : > { %853 = vmatpush.bf16.msrb.mxu1 %v4023_v1  ;;  %923 = vmatpush.bf16.msrb.mxu2 %v4043_v2  ;;  %v6435_v0 = vsel %vm687_vm0, %v1026_v59, 0  ;;  %v4158_v1 = vld [vmem:[#allocation5 + $0x58] sm:$0xf]  ;;  %v1066_v3 = vsel %vm687_vm0, %v1027_v60, 0  ;;  %v4215_v59 = vor.u32 %v5413_v58, %v4214_v57  ;;  %v4550_v60 = vld [vmem:[#allocation8 + $0x2e0] sm:$0xf] }
  0x6b   : > { %4095 = vmatmul.msk.bf16.vlgmr.msra.gmra.mxu3 %vm683_vm1, %v6354_v14  ;;  %4096 = vmatmul.msk.bf16.vlgmr.msra.gmra.mxu0 %vm683_vm1, %v6354_v14  ;;  %v5402_v2 = vld [vmem:[#allocation5 + $0x74] sm:$0xf0]  ;;  %v4630_v57 = vld [vmem:[#allocation8 + $0x380] sm:$0xf] }
  0x6c   : > { %937 = vmatpush.bf16.msrb.mxu3 %v4047_v8  ;;  %1075 = vmatpush.bf16.msrb.mxu0 %v6386_v28  ;;  %v4159_v7 = vor.u32 %v5402_v2, %v4158_v1  ;;  %v5387_v8 = vld [vmem:[#allocation5 + $0x4] sm:$0xf]  ;;  %v5529_v1 = vld [vmem:[#allocation8 + $0x3ec] sm:$0xf0] }
  0x6e   : > { %907 = vmatpush.bf16.msra.mxu1 %v6335_v5  ;;  %1101 = vmatpush.bf16.msra.mxu2 %v6390_v34  ;;  %v4160_v5 = vld [vmem:[#allocation5 + $0x78] sm:$0xf0] }
  0x6f   : > { %v4163_v9 = vor.u32 %v5398_v4, %v4160_v5  ;;  %v4198_v4 = vld [vmem:[#allocation8 + $0x20] sm:$0xf]  ;;  %v5409_v5 = vld [vmem:[#allocation8 + $0x2c] sm:$0xf0] }
  0x70   : > { %1115 = vmatpush.bf16.msra.mxu3 %v6397_v37  ;;  %1129 = vmatpush.bf16.msra.mxu0 %v6400_v38 }
  0x72   : > { %908 = vmatpush.bf16.msra.mxu1 %v6342_v10  ;;  %1102 = vmatpush.bf16.msra.mxu2 %v6408_v41  ;;  %v4104_v10 = vld [vmem:[#allocation5 + $0x20] sm:$0xf0] }
  0x73   : > { %v4107_v16 = vor.u32 %v5387_v8, %v4104_v10  ;;  %v5493_v10 = vld [vmem:[#allocation8 + $0x2cc] sm:$0xf0] }
  0x74   : > { %1116 = vmatpush.bf16.msra.mxu3 %v6412_v43  ;;  %1130 = vmatpush.bf16.msra.mxu0 %v6414_v44 }
  0x76   : > { %909 = vmatpush.bf16.msra.mxu1 %v6356_v15  ;;  %1103 = vmatpush.bf16.msra.mxu2 %v6418_v52  ;;  %v4128_v15 = vld [vmem:[#allocation5 + $0x38] sm:$0xf0] }
  0x77   : > { %v4131_v19 = vor.u32 %v5390_v13, %v4128_v15  ;;  %v5525_v15 = vld [vmem:[#allocation8 + $0x3cc] sm:$0xf0] }
  0x78   : > { %1117 = vmatpush.bf16.msra.mxu3 %v6422_v53  ;;  %1131 = vmatpush.bf16.msra.mxu0 %v6424_v54 }
  0x79   : > { %4093 = vmatmul.msk.bf16.vlgmr.msrb.gmra.mxu1 %vm683_vm1, %v6354_v14  ;;  %4098 = vmatmul.msk.bf16.vlgmr.msrb.gmra.mxu2 %vm683_vm1, %v6354_v14 }
  0x7a   : > { %1087 = vmatpush.bf16.msrb.mxu1 %v6432_v63  ;;  %1157 = vmatpush.bf16.msrb.mxu2 %v6435_v0 }
  0x7b   : > { %4099 = vmatmul.msk.bf16.vlgmr.msrb.gmra.mxu3 %vm683_vm1, %v6354_v14  ;;  %4164 = vmatmul.msk.bf16.vlgmr.msrb.gmra.mxu0 %vm683_vm1, %v6304_v45 }
  0x7c   : > { %1171 = vmatpush.bf16.msrb.mxu3 %v1066_v3  ;;  %1185 = vmatpush.bf16.msrb.mxu0 %v6371_v17  ;;  %v1025_v17 = vpack.c.b16 %v1001_v20, %v1001_v20 }
  0x7e   : > { %1088 = vmatpush.bf16.msrb.mxu1 %v4139_v6  ;;  %1158 = vmatpush.bf16.msrb.mxu2 %v4159_v7  ;;  %v1060_v23 = vsel %vm687_vm0, %v1025_v17, 0  ;;  %v4806_v17 = vld [vmem:[#allocation8 + $0x4e0] sm:$0xf] }
  0x80   : > { %1172 = vmatpush.bf16.msrb.mxu3 %v4163_v9  ;;  %1186 = vmatpush.bf16.msrb.mxu0 %v6378_v21  ;;  %v4155_v21 = vor.u32 %v5397_v24, %v4152_v25  ;;  %v4518_v25 = vld [vmem:[#allocation8 + $0x2a0] sm:$0xf] }
  0x82   : > { %1089 = vmatpush.bf16.msrb.mxu1 %v4107_v16  ;;  %1159 = vmatpush.bf16.msrb.mxu2 %v4127_v18 }
  0x84   : > { %1173 = vmatpush.bf16.msrb.mxu3 %v4131_v19  ;;  %1187 = vmatpush.bf16.msrb.mxu0 %v6386_v28 }
  0x89   : > { %4097 = vmatmul.msk.bf16.vlgmr.msra.gmra.mxu1 %vm683_vm1, %v6354_v14  ;;  %4166 = vmatmul.msk.bf16.vlgmr.msra.gmra.mxu2 %vm683_vm1, %v6304_v45 }
  0x8a   : > { %1143 = vmatpush.bf16.msra.mxu1 %v1060_v23  ;;  %1213 = vmatpush.bf16.msra.mxu2 %v6390_v34  ;;  %v4295_v34 = vor.u32 %v5433_v32, %v4294_v31  ;;  %v5521_v31 = vld [vmem:[#allocation8 + $0x3ac] sm:$0xf0] }
  0x8b   : > { %4167 = vmatmul.msk.bf16.vlgmr.msra.gmra.mxu3 %vm683_vm1, %v6304_v45  ;;  %4168 = vmatmul.msk.bf16.vlgmr.msra.gmra.mxu0 %vm683_vm1, %v6304_v45 }
  0x8c   : > { %1227 = vmatpush.bf16.msra.mxu3 %v6397_v37  ;;  %1241 = vmatpush.bf16.msra.mxu0 %v6400_v38  ;;  %v5429_v37 = vld [vmem:[#allocation8 + $0xcc] sm:$0xf0] }
  0x8d   : > { %v4279_v38 = vor.u32 %v5429_v37, %v4278_v36  ;;  %v4647_v36 = vor.u32 %v5521_v31, %v4646_v22  ;;  %v4422_v37 = vld [vmem:[#allocation8 + $0x1e0] sm:$0xf]  ;;  %v5477_v31 = vld [vmem:[#allocation8 + $0x24c] sm:$0xf0] }
  0x8e   : > { %1144 = vmatpush.bf16.msra.mxu1 %v4155_v21  ;;  %1214 = vmatpush.bf16.msra.mxu2 %v6408_v41  ;;  %v5425_v41 = vld [vmem:[#allocation8 + $0xac] sm:$0xf0] }
  0x90   : > { %1228 = vmatpush.bf16.msra.mxu3 %v6412_v43  ;;  %1242 = vmatpush.bf16.msra.mxu0 %v6414_v44 }
  0x92   : > { %1145 = vmatpush.bf16.msra.mxu1 %v4123_v27  ;;  %1215 = vmatpush.bf16.msra.mxu2 %v6418_v52  ;;  %v4230_v52 = vld [vmem:[#allocation8 + $0x60] sm:$0xf] }
  0x94   : > { %1229 = vmatpush.bf16.msra.mxu3 %v6422_v53  ;;  %1243 = vmatpush.bf16.msra.mxu0 %v6424_v54  ;;  %v5417_v53 = vld [vmem:[#allocation8 + $0x6c] sm:$0xf0] }
  0x95   : > { %v4231_v55 = vor.u32 %v5417_v53, %v4230_v52  ;;  %v4791_v52 = vor.u32 %v5557_v48, %v4790_v47  ;;  %v4502_v53 = vld [vmem:[#allocation8 + $0x280] sm:$0xf]  ;;  %v5453_v48 = vld [vmem:[#allocation8 + $0x18c] sm:$0xf0] }
  0x96   : > { %v4374_v47 = vld [vmem:[#allocation8 + $0x180] sm:$0xf] }
  0x99   : > { %4165 = vmatmul.msk.bf16.vlgmr.msrb.gmra.mxu1 %vm683_vm1, %v6304_v45  ;;  %4170 = vmatmul.msk.bf16.vlgmr.msrb.gmra.mxu2 %vm683_vm1, %v6304_v45 }
  0x9a   : > { %1199 = vmatpush.bf16.msrb.mxu1 %v6432_v63  ;;  %1269 = vmatpush.bf16.msrb.mxu2 %v6435_v0  ;;  %v4551_v0 = vor.u32 %v5497_v61, %v4550_v60  ;;  %v4406_v61 = vld [vmem:[#allocation8 + $0x1c0] sm:$0xf] }
  0x9b   : > { %4171 = vmatmul.msk.bf16.vlgmr.msrb.gmra.mxu3 %vm683_vm1, %v6304_v45  ;;  %4172 = vmatmul.msk.bf16.vlgmr.msrb.gmra.mxu0 %vm683_vm1, %v6354_v14 }
  0x9c   : > { %1283 = vmatpush.bf16.msrb.mxu3 %v1066_v3  ;;  %2978 = vmatpush.bf16.msrb.mxu0 %v4295_v34  ;;  %v4679_v3 = vor.u32 %v5529_v1, %v4678_v62  ;;  %v5461_v62 = vld [vmem:[#allocation8 + $0x1cc] sm:$0xf0]  ;;  %v4774_v1 = vld [vmem:[#allocation8 + $0x4a0] sm:$0xf] }
  0x9e   : > { %1200 = vmatpush.bf16.msrb.mxu1 %v4139_v6  ;;  %1270 = vmatpush.bf16.msrb.mxu2 %v4159_v7  ;;  %v4199_v7 = vor.u32 %v5409_v5, %v4198_v4  ;;  %v4486_v5 = vld [vmem:[#allocation8 + $0x260] sm:$0xf] }
  0xa0   : > { %1284 = vmatpush.bf16.msrb.mxu3 %v4163_v9  ;;  %2979 = vmatpush.bf16.msrb.mxu0 %v4279_v38  ;;  %v4534_v9 = vld [vmem:[#allocation8 + $0x2c0] sm:$0xf]  ;;  %v5465_v38 = vld [vmem:[#allocation8 + $0x1ec] sm:$0xf0] }
  0xa1   : > { %v4535_v13 = vor.u32 %v5493_v10, %v4534_v9  ;;  %v4614_v9 = vld [vmem:[#allocation8 + $0x360] sm:$0xf] }
  0xa2   : > { %1201 = vmatpush.bf16.msrb.mxu1 %v4107_v16  ;;  %1271 = vmatpush.bf16.msrb.mxu2 %v4127_v18  ;;  %v4663_v16 = vor.u32 %v5525_v15, %v4662_v11  ;;  %v4182_v18 = vld [vmem:[#allocation8] sm:$0xf] }
  0xa4   : > { %1285 = vmatpush.bf16.msrb.mxu3 %v4131_v19  ;;  %v5405_v19 = vld [vmem:[#allocation8 + $0xc] sm:$0xf0] }
  0xa5   : > { %v4183_v20 = vor.u32 %v5405_v19, %v4182_v18  ;;  %v4390_v18 = vld [vmem:[#allocation8 + $0x1a0] sm:$0xf]  ;;  %v5457_v19 = vld [vmem:[#allocation8 + $0x1ac] sm:$0xf0] }
  0xa9   : > { %4169 = vmatmul.msk.bf16.vlgmr.msra.gmra.mxu1 %vm683_vm1, %v6304_v45  ;;  %4174 = vmatmul.msk.bf16.vlgmr.msra.gmra.mxu2 %vm683_vm1, %v6354_v14 }
  0xaa   : > { %1255 = vmatpush.bf16.msra.mxu1 %v1060_v23  ;;  %3006 = vmatpush.bf16.msra.mxu2 %v4551_v0  ;;  %v5561_v23 = vld [vmem:[#allocation8 + $0x4ec] sm:$0xf0]  ;;  %v4407_v0 = vor.u32 %v5461_v62, %v4406_v61 }
  0xab   : > { %4175 = vmatmul.msk.bf16.vlgmr.msra.gmra.mxu3 %vm683_vm1, %v6354_v14  ;;  %4176 = vmatmul.msk.bf16.vlgmr.msra.gmra.mxu0 %vm683_vm1, %v6354_v14  ;;  %v4807_v24 = vor.u32 %v5561_v23, %v4806_v17  ;;  %v4391_v17 = vor.u32 %v5457_v19, %v4390_v18  ;;  %v4758_v23 = vld [vmem:[#allocation8 + $0x480] sm:$0xf]  ;;  %v5541_v18 = vld [vmem:[#allocation8 + $0x44c] sm:$0xf0] }
  0xac   : > { %3020 = vmatpush.bf16.msra.mxu3 %v4679_v3  ;;  %v5553_v3 = vld [vmem:[#allocation8 + $0x4ac] sm:$0xf0] }
  0xad   : > { %v4775_v4 = vor.u32 %v5553_v3, %v4774_v1 }
  0xae   : > { %1256 = vmatpush.bf16.msra.mxu1 %v4155_v21  ;;  %3007 = vmatpush.bf16.msra.mxu2 %v4535_v13  ;;  %v5489_v21 = vld [vmem:[#allocation8 + $0x2ac] sm:$0xf0] }
  0xaf   : > { %v5513_v13 = vld [vmem:[#allocation8 + $0x36c] sm:$0xf0] }
  0xb0   : > { %3021 = vmatpush.bf16.msra.mxu3 %v4663_v16  ;;  %v4615_v16 = vor.u32 %v5513_v13, %v4614_v9  ;;  %v5633_v9 = vld [vmem:[#allocation8 + $0x72c] sm:$0xf0] }
  0xb2   : > { %1257 = vmatpush.bf16.msra.mxu1 %v4123_v27  ;;  %v4519_v27 = vor.u32 %v5489_v21, %v4518_v25  ;;  %v4870_v25 = vld [vmem:[#allocation8 + $0x560] sm:$0xf] }
  0xb4   : > { %3008 = vmatpush.bf16.msra.mxu2 %v4519_v27  ;;  %3022 = vmatpush.bf16.msra.mxu3 %v4647_v36  ;;  %v4470_v27 = vld [vmem:[#allocation8 + $0x240] sm:$0xf] }
  0xb5   : > { %v4471_v36 = vor.u32 %v5477_v31, %v4470_v27  ;;  %v5501_v31 = vld [vmem:[#allocation8 + $0x30c] sm:$0xf0] }
  0xb9   : > { %4173 = vmatmul.msk.bf16.vlgmr.msrb.gmra.mxu1 %vm683_vm1, %v6354_v14  ;;  %4178 = vmatmul.msk.bf16.vlgmr.msrb.gmra.mxu2 %vm683_vm1, %v6354_v14 }
  0xbb   : > { %4179 = vmatmul.msk.bf16.vlgmr.msrb.gmra.mxu3 %vm683_vm1, %v6354_v14 }
  0xc6   : > { %v6494_v45 = vpop.f32.mrf.mxu1 }
  0xc8   : > { %v6496_v28 = vpop.f32.mrf.mxu0 }
  0xc9   : > { %4177 = vmatmul.msk.bf16.vlgmr.msra.gmra.mxu1 %vm683_vm1, %v6354_v14  ;;  %v4262_v14 = vld [vmem:[#allocation8 + $0xa0] sm:$0xf] }
  0xca   : > { %v4263_v43 = vor.u32 %v5425_v41, %v4262_v14 }
  0xcc   : > { %v6500_v29 = vpop.f32.mrf.mxu2  ;;  %2980 = vmatpush.bf16.msrb.mxu0 %v4263_v43  ;;  %v4423_v43 = vor.u32 %v5465_v38, %v4422_v37  ;;  %v4598_v37 = vld [vmem:[#allocation8 + $0x340] sm:$0xf]  ;;  %v5509_v38 = vld [vmem:[#allocation8 + $0x34c] sm:$0xf0] }
  0xce   : > { %v6502_v30 = vpop.f32.mrf.mxu3  ;;  %v6504_v33 = vpop.f32.mrf.mxu1  ;;  %2992 = vmatpush.bf16.msrb.mxu1 %v4423_v43  ;;  %v4599_v43 = vor.u32 %v5509_v38, %v4598_v37  ;;  %v5625_v37 = vld [vmem:[#allocation8 + $0x6ec] sm:$0xf0] }
  0xd0   : > { %v6506_v35 = vpop.f32.mrf.mxu0  ;;  %2981 = vmatpush.bf16.msrb.mxu0 %v4247_v49 }
  0xd2   : > { %2993 = vmatpush.bf16.msrb.mxu1 %v4407_v0  ;;  %v5505_v0 = vld [vmem:[#allocation8 + $0x32c] sm:$0xf0] }
  0xd4   : > { %v6508_v39 = vpop.f32.mrf.mxu2  ;;  %2982 = vmatpush.bf16.msrb.mxu0 %v4231_v55  ;;  %v5485_v55 = vld [vmem:[#allocation8 + $0x28c] sm:$0xf0] }
  0xd5   : > { %v4503_v58 = vor.u32 %v5485_v55, %v4502_v53  ;;  %v4742_v53 = vld [vmem:[#allocation8 + $0x460] sm:$0xf]  ;;  %v5545_v55 = vld [vmem:[#allocation8 + $0x46c] sm:$0xf0] }
  0xd6   : > { %v6510_v40 = vpop.f32.mrf.mxu3  ;;  %v6512_v42 = vpop.f32.mrf.mxu1  ;;  %2994 = vmatpush.bf16.msrb.mxu1 %v4391_v17 }
  0xd7   : > { %3009 = vmatpush.bf16.msra.mxu2 %v4503_v58  ;;  %v4454_v58 = vld [vmem:[#allocation8 + $0x220] sm:$0xf] }
  0xd8   : > { %v6514_v44 = vpop.f32.mrf.mxu0  ;;  %2983 = vmatpush.bf16.msrb.mxu0 %v4215_v59  ;;  %v5517_v59 = vld [vmem:[#allocation8 + $0x38c] sm:$0xf0] }
  0xd9   : > { %v1292_v46 = vmax.f32 %v6494_v45, %v6514_v44  ;;  %v4631_v60 = vor.u32 %v5517_v59, %v4630_v57  ;;  %v4743_v57 = vor.u32 %v5545_v55, %v4742_v53  ;;  %v5473_v59 = vld [vmem:[#allocation8 + $0x22c] sm:$0xf0] }
  0xda   : > { %v4455_v62 = vor.u32 %v5473_v59, %v4454_v58  ;;  %v5445_v55 = vld [vmem:[#allocation8 + $0x14c] sm:$0xf0] }
  0xdb   : > { %3023 = vmatpush.bf16.msra.mxu3 %v4631_v60  ;;  %v4582_v60 = vld [vmem:[#allocation8 + $0x320] sm:$0xf]  ;;  %v5537_v58 = vld [vmem:[#allocation8 + $0x42c] sm:$0xf0] }
  0xdc   : > { %v6518_v50 = vpop.f32.mrf.mxu2  ;;  %2984 = vmatpush.bf16.msrb.mxu0 %v4199_v7  ;;  %v5481_v7 = vld [vmem:[#allocation8 + $0x26c] sm:$0xf0] }
  0xdd   : > { %v4487_v11 = vor.u32 %v5481_v7, %v4486_v5  ;;  %v4358_v5 = vld [vmem:[#allocation8 + $0x160] sm:$0xf]  ;;  %v5449_v7 = vld [vmem:[#allocation8 + $0x16c] sm:$0xf0] }
  0xde   : > { %v6520_v51 = vpop.f32.mrf.mxu3  ;;  %v6522_v54 = vpop.f32.mrf.mxu1  ;;  %v4359_v13 = vor.u32 %v5449_v7, %v4358_v5  ;;  %v5174_v5 = vld [vmem:[#allocation8 + $0x7c0] sm:$0xf] }
  0xdf   : > { %3010 = vmatpush.bf16.msra.mxu2 %v4487_v11  ;;  %3024 = vmatpush.bf16.msra.mxu3 %v4615_v16  ;;  %v4726_v16 = vld [vmem:[#allocation8 + $0x440] sm:$0xf] }
  0xe0   : > { %v6524_v56 = vpop.f32.mrf.mxu0  ;;  %2985 = vmatpush.bf16.msrb.mxu0 %v4183_v20  ;;  %v4727_v17 = vor.u32 %v5541_v18, %v4726_v16  ;;  %v5653_v16 = vld [vmem:[#allocation8 + $0x7cc] sm:$0xf0]  ;;  %v4326_v18 = vld [vmem:[#allocation8 + $0x120] sm:$0xf] }
  0xe3   : > { %3011 = vmatpush.bf16.msra.mxu2 %v4471_v36  ;;  %3025 = vmatpush.bf16.msra.mxu3 %v4599_v43  ;;  %v5062_v36 = vld [vmem:[#allocation8 + $0x6e0] sm:$0xf] }
  0xe4   : > { %v6526_v63 = vpop.f32.mrf.mxu2  ;;  %3034 = vmatpush.bf16.msra.mxu0 %v4807_v24  ;;  %v5549_v24 = vld [vmem:[#allocation8 + $0x48c] sm:$0xf0]  ;;  %v5063_v43 = vor.u32 %v5625_v37, %v5062_v36  ;;  %v5094_v36 = vld [vmem:[#allocation8 + $0x720] sm:$0xf] }
  0xe5   : > { %v4759_v22 = vor.u32 %v5549_v24, %v4758_v23  ;;  %v4438_v23 = vld [vmem:[#allocation8 + $0x200] sm:$0xf]  ;;  %v5469_v24 = vld [vmem:[#allocation8 + $0x20c] sm:$0xf0]  ;;  %v5095_v1 = vor.u32 %v5633_v9, %v5094_v36 }
  0xe6   : > { %v6528_v2 = vpop.f32.mrf.mxu3  ;;  %v6530_v6 = vpop.f32.mrf.mxu1  ;;  %v4439_v27 = vor.u32 %v5469_v24, %v4438_v23  ;;  %v5175_v24 = vor.u32 %v5653_v16, %v5174_v5  ;;  %v5014_v16 = vld [vmem:[#allocation8 + $0x680] sm:$0xf]  ;;  %v5629_v36 = vld [vmem:[#allocation8 + $0x70c] sm:$0xf0] }
  0xe7   : > { %3012 = vmatpush.bf16.msra.mxu2 %v4455_v62 }
  0xe8   : > { %v6532_v8 = vpop.f32.mrf.mxu0  ;;  %3035 = vmatpush.bf16.msra.mxu0 %v4791_v52  ;;  %v4375_v52 = vor.u32 %v5453_v48, %v4374_v47  ;;  %v5190_v47 = vld [vmem:[#allocation8 + $0x7e0] sm:$0xf]  ;;  %v5657_v48 = vld [vmem:[#allocation8 + $0x7ec] sm:$0xf0] }
  0xe9   : > { %v5191_v53 = vor.u32 %v5657_v48, %v5190_v47  ;;  %v5617_v47 = vld [vmem:[#allocation8 + $0x6ac] sm:$0xf0]  ;;  %v5158_v48 = vld [vmem:[#allocation8 + $0x7a0] sm:$0xf] }
  0xea   : > { %2995 = vmatpush.bf16.msrb.mxu1 %v4375_v52  ;;  %v4342_v52 = vld [vmem:[#allocation8 + $0x140] sm:$0xf] }
  0xeb   : > { %3013 = vmatpush.bf16.msra.mxu2 %v4439_v27  ;;  %v4343_v59 = vor.u32 %v5445_v55, %v4342_v52  ;;  %v4694_v27 = vld [vmem:[#allocation8 + $0x400] sm:$0xf] }
  0xec   : > { %v6536_v26 = vpop.f32.mrf.mxu2  ;;  %3036 = vmatpush.bf16.msra.mxu0 %v4775_v4  ;;  %v4583_v4 = vor.u32 %v5505_v0, %v4582_v60  ;;  %v5046_v0 = vld [vmem:[#allocation8 + $0x6c0] sm:$0xf] }
  0xed   : > { %v4310_v55 = vld [vmem:[#allocation8 + $0x100] sm:$0xf] }
  0xee   : > { %v6540_v34 = vpop.f32.mrf.mxu3  ;;  %v6544_v41 = vpop.f32.mrf.mxu1  ;;  %3026 = vmatpush.bf16.msra.mxu3 %v4583_v4  ;;  %2996 = vmatpush.bf16.msrb.mxu1 %v4359_v13  ;;  %v5621_v4 = vld [vmem:[#allocation8 + $0x6cc] sm:$0xf0] }
  0xef   : > { %3062 = vmatpush.bf16.msrb.mxu2 %v5063_v43  ;;  %v5047_v13 = vor.u32 %v5621_v4, %v5046_v0  ;;  %v5030_v43 = vld [vmem:[#allocation8 + $0x6a0] sm:$0xf]  ;;  %v5593_v0 = vld [vmem:[#allocation8 + $0x5ec] sm:$0xf0] }
  0xf0   : > { %v6546_v49 = vpop.f32.mrf.mxu0  ;;  %3037 = vmatpush.bf16.msra.mxu0 %v4759_v22  ;;  %v4566_v22 = vld [vmem:[#allocation8 + $0x300] sm:$0xf]  ;;  %v5031_v52 = vor.u32 %v5617_v47, %v5030_v43  ;;  %v5589_v47 = vld [vmem:[#allocation8 + $0x5cc] sm:$0xf0] }
  0xf1   : > { %v4567_v38 = vor.u32 %v5501_v31, %v4566_v22  ;;  %v5533_v31 = vld [vmem:[#allocation8 + $0x40c] sm:$0xf0]  ;;  %v4918_v43 = vld [vmem:[#allocation8 + $0x5c0] sm:$0xf] }
  0xf2   : > { %2997 = vmatpush.bf16.msrb.mxu1 %v4343_v59 }
  0xf3   : > { %3027 = vmatpush.bf16.msra.mxu3 %v4567_v38  ;;  %3063 = vmatpush.bf16.msrb.mxu2 %v5047_v13  ;;  %v4695_v38 = vor.u32 %v5533_v31, %v4694_v27  ;;  %v5645_v27 = vld [vmem:[#allocation8 + $0x78c] sm:$0xf0] }
  0xf4   : > { %v6548_v10 = vpop.f32.mrf.mxu2  ;;  %3038 = vmatpush.bf16.msra.mxu0 %v4743_v57  ;;  %v4710_v57 = vld [vmem:[#allocation8 + $0x420] sm:$0xf] }
  0xf5   : > { %v4711_v60 = vor.u32 %v5537_v58, %v4710_v57  ;;  %v5437_v57 = vld [vmem:[#allocation8 + $0x10c] sm:$0xf0] }
  0xf6   : > { %v6550_v15 = vpop.f32.mrf.mxu3  ;;  %v6552_v20 = vpop.f32.mrf.mxu1  ;;  %v4311_v59 = vor.u32 %v5437_v57, %v4310_v55  ;;  %v5126_v55 = vld [vmem:[#allocation8 + $0x760] sm:$0xf] }
  0xf7   : > { %3076 = vmatpush.bf16.msrb.mxu3 %v5191_v53  ;;  %v5649_v53 = vld [vmem:[#allocation8 + $0x7ac] sm:$0xf0]  ;;  %3064 = vmatpush.bf16.msrb.mxu2 %v5031_v52  ;;  %v4998_v52 = vld [vmem:[#allocation8 + $0x660] sm:$0xf] }
  0xf8   : > { %v6556_v21 = vpop.f32.mrf.mxu0  ;;  %3039 = vmatpush.bf16.msra.mxu0 %v4727_v17  ;;  %v5441_v17 = vld [vmem:[#allocation8 + $0x12c] sm:$0xf0]  ;;  %v5159_v58 = vor.u32 %v5649_v53, %v5158_v48  ;;  %v4919_v48 = vor.u32 %v5589_v47, %v4918_v43 }
  0xf9   : > { %v4327_v22 = vor.u32 %v5441_v17, %v4326_v18  ;;  %v5613_v18 = vld [vmem:[#allocation8 + $0x68c] sm:$0xf0]  ;;  %v5142_v17 = vld [vmem:[#allocation8 + $0x780] sm:$0xf] }
  0xfa   : > { %v5609_v53 = vld [vmem:[#allocation8 + $0x66c] sm:$0xf0] }
  0xfb   : > { %3077 = vmatpush.bf16.msrb.mxu3 %v5175_v24  ;;  %2998 = vmatpush.bf16.msrb.mxu1 %v4327_v22  ;;  %v5015_v22 = vor.u32 %v5613_v18, %v5014_v16  ;;  %v4999_v57 = vor.u32 %v5609_v53, %v4998_v52  ;;  %v5637_v47 = vld [vmem:[#allocation8 + $0x74c] sm:$0xf0]  ;;  %v6597_v52 = vld [vmem:[%s6850_s5] sm:$0xff] }
  0xfc   : > { %v6558_v61 = vpop.f32.mrf.mxu2  ;;  %3040 = vmatpush.bf16.msra.mxu0 %v4711_v60  ;;  %v4934_v60 = vld [vmem:[#allocation8 + $0x5e0] sm:$0xf] }
  0xfd   : > { %v4935_v5 = vor.u32 %v5593_v0, %v4934_v60  ;;  %3065 = vmatpush.bf16.msrb.mxu2 %v5015_v22  ;;  %v4902_v60 = vld [vmem:[#allocation8 + $0x5a0] sm:$0xf]  ;;  %v5585_v0 = vld [vmem:[#allocation8 + $0x5ac] sm:$0xf0] }
  0xfe   : > { %v6562_v3 = vpop.f32.mrf.mxu3  ;;  %v6566_v11 = vpop.f32.mrf.mxu1  ;;  %v4903_v16 = vor.u32 %v5585_v0, %v4902_v60  ;;  %v5605_v22 = vld [vmem:[#allocation8 + $0x64c] sm:$0xf0]  ;;  %v4966_v60 = vld [vmem:[#allocation8 + $0x620] sm:$0xf] }
  0xff   : > { %3078 = vmatpush.bf16.msrb.mxu3 %v5159_v58  ;;  %2999 = vmatpush.bf16.msrb.mxu1 %v4311_v59  ;;  %v5641_v58 = vld [vmem:[#allocation8 + $0x76c] sm:$0xf0] }
 0x100   : > { %v6568_v19 = vpop.f32.mrf.mxu0  ;;  %3041 = vmatpush.bf16.msra.mxu0 %v4695_v38  ;;  %v5143_v38 = vor.u32 %v5645_v27, %v5142_v17  ;;  %v5127_v59 = vor.u32 %v5641_v58, %v5126_v55  ;;  %v4982_v17 = vld [vmem:[#allocation8 + $0x640] sm:$0xf]  ;;  %v5601_v0 = vld [vmem:[#allocation8 + $0x62c] sm:$0xf0] }
 0x101   : > { %3066 = vmatpush.bf16.msrb.mxu2 %v4999_v57  ;;  %v5110_v27 = vld [vmem:[#allocation8 + $0x740] sm:$0xf]  ;;  %v4983_v43 = vor.u32 %v5605_v22, %v4982_v17  ;;  %v5581_v57 = vld [vmem:[#allocation8 + $0x58c] sm:$0xf0]  ;;  %v1360_v17 = vperm.slane %v6597_v52, 0  ;;  %v4967_v22 = vor.u32 %v5601_v0, %v4966_v60 }
 0x102   : > { %v5111_v53 = vor.u32 %v5637_v47, %v5110_v27  ;;  %v4886_v55 = vld [vmem:[#allocation8 + $0x580] sm:$0xf]  ;;  %v5577_v27 = vld [vmem:[#allocation8 + $0x56c] sm:$0xf0] }
 0x103   : > { %3048 = vmatpush.bf16.msra.mxu1 %v4935_v5  ;;  %3079 = vmatpush.bf16.msrb.mxu3 %v5143_v38  ;;  %v4887_v58 = vor.u32 %v5581_v57, %v4886_v55  ;;  %v4871_v55 = vor.u32 %v5577_v27, %v4870_v25  ;;  %v4950_v57 = vld [vmem:[#allocation8 + $0x600] sm:$0xf]  ;;  %v5573_v27 = vld [vmem:[#allocation8 + $0x54c] sm:$0xf0] }
 0x104   : > { %v6570_v62 = vpop.f32.mrf.mxu2 }
 0x105   : > { %3067 = vmatpush.bf16.msrb.mxu2 %v4983_v43 }
 0x106   : > { %v6572_v7 = vpop.f32.mrf.mxu3  ;;  %v6574_v23 = vpop.f32.mrf.mxu1 }
 0x107   : > { %6884 = vst [vmem:[#allocation26_spill] sm:$0xff] %v6574_v23  ;;  %3049 = vmatpush.bf16.msra.mxu1 %v4919_v48  ;;  %3080 = vmatpush.bf16.msrb.mxu3 %v5127_v59  ;;  %v6599_v59 = vld [vmem:[#allocation7] sm:$0xff] }
 0x108   : > { %v6578_v37 = vpop.f32.mrf.mxu0  ;;  %v1310_v47 = vperm.slane %v6599_v59, 0 }
 0x109   : > { %3068 = vmatpush.bf16.msrb.mxu2 %v4967_v22  ;;  %v4854_v22 = vld [vmem:[#allocation8 + $0x540] sm:$0xf] }
 0x10a   : > { %v1326_v25 = vadd.f32 %v1310_v47, %v1292_v46  ;;  %v4855_v12 = vor.u32 %v5573_v27, %v4854_v22  ;;  %v1364_v22 = vperm.slane %v6597_v52, 4 }
 0x10b   : > { %3050 = vmatpush.bf16.msra.mxu1 %v4903_v16  ;;  %3081 = vmatpush.bf16.msrb.mxu3 %v5111_v53 }
 0x10c   : > { %v6580_v4 = vpop.f32.mrf.mxu2 }
 0x10e   : > { %v6582_v13 = vpop.f32.mrf.mxu3  ;;  %v6584_v24 = vpop.f32.mrf.mxu1 }
 0x10f   : > { %3051 = vmatpush.bf16.msra.mxu1 %v4887_v58  ;;  %3082 = vmatpush.bf16.msrb.mxu3 %v5095_v1  ;;  %v1300_v58 = vmax.f32 %v6504_v33, %v6524_v56 }
 0x110   : > { %v6586_v31 = vpop.f32.mrf.mxu0 }
 0x111   : > { %v1334_v33 = vadd.f32 %v1310_v47, %v1300_v58  ;;  %v4822_v47 = vld [vmem:[#allocation8 + $0x500] sm:$0xf]  ;;  %v4280_v58 = vld [vmem:[#allocation8 + $0xd0] sm:$0xf0] }
 0x113   : > { %3052 = vmatpush.bf16.msra.mxu1 %v4871_v55  ;;  %v4838_v55 = vld [vmem:[#allocation8 + $0x520] sm:$0xf] }
 0x114   : > { %v6588_v5 = vpop.f32.mrf.mxu2 }
 0x116   : > { %v6590_v18 = vpop.f32.mrf.mxu3  ;;  %v6592_v38 = vpop.f32.mrf.mxu1 }
 0x117   : > { %3053 = vmatpush.bf16.msra.mxu1 %v4855_v12  ;;  %v5427_v12 = vld [vmem:[#allocation8 + $0xc4] sm:$0xf] }
 0x118   : > { %v1189_v48 = vpop.f32.mrf.mxu0  ;;  %v4283_v27 = vor.u32 %v5427_v12, %v4280_v58  ;;  %v1363_v12 = vperm.slane %v6597_v52, 3  ;;  %v4248_v58 = vld [vmem:[#allocation8 + $0x90] sm:$0xf0] }
 0x119   : > { %v1342_v16 = vmax.f32 %v6556_v21, %v1189_v48  ;;  %v5597_v21 = vld [vmem:[#allocation8 + $0x60c] sm:$0xf0]  ;;  %v5078_v48 = vld [vmem:[#allocation8 + $0x700] sm:$0xf] }
 0x11a   : > { %v4951_v9 = vor.u32 %v5597_v21, %v4950_v57  ;;  %v5079_v32 = vor.u32 %v5629_v36, %v5078_v48  ;;  %v5569_v57 = vld [vmem:[#allocation8 + $0x52c] sm:$0xf0]  ;;  %v5431_v48 = vld [vmem:[#allocation8 + $0xe4] sm:$0xf]  ;;  %v4296_v36 = vld [vmem:[#allocation8 + $0xf0] sm:$0xf0] }
 0x11b   : > { %v1376_v60 = vadd.f32 %v1360_v17, %v1342_v16  ;;  %v4839_v45 = vor.u32 %v5569_v57, %v4838_v55  ;;  %v4264_v55 = vld [vmem:[#allocation8 + $0xb0] sm:$0xf0] }
 0x11c   : > { %v6604_v43 = vpop.f32.mrf.mxu2  ;;  %3069 = vmatpush.bf16.msrb.mxu2 %v4951_v9  ;;  %3083 = vmatpush.bf16.msrb.mxu3 %v5079_v32  ;;  %v4299_v9 = vor.u32 %v5431_v48, %v4296_v36 }
 0x11d   : > { %v1392_v56 = vmax.f32 %v1326_v25, %v1376_v60  ;;  %3054 = vmatpush.bf16.msra.mxu1 %v4839_v45  ;;  %v5565_v60 = vld [vmem:[#allocation8 + $0x50c] sm:$0xf0]  ;;  %v1362_v45 = vperm.slane %v6597_v52, 2 }
 0x11e   : > { %v6606_v53 = vpop.f32.mrf.mxu3  ;;  %v6610_v0 = vpop.f32.mrf.mxu1  ;;  %v4823_v25 = vor.u32 %v5565_v60, %v4822_v47  ;;  %v1312_v60 = vperm.slane %v6599_v59, 2 }
 0x11f   : > { %v1408_v46 = vmax.f32 %v1392_v56, 0.0 }
 0x120   : > { %v1191_v14 = vpop.f32.mrf.mxu0 }
 0x121   : > { %v1350_v1 = vmax.f32 %v6568_v19, %v1191_v14  ;;  %3055 = vmatpush.bf16.msra.mxu1 %v4823_v25 }
 0x123   : > { %v1384_v16 = vadd.f32 %v1360_v17, %v1350_v1 }
 0x124   : > { %v6616_v23 = vpop.f32.mrf.mxu2 }
 0x125   : > { %v1400_v21 = vmax.f32 %v1334_v33, %v1384_v16  ;;  %v1314_v33 = vperm.slane %v6599_v59, 4  ;;  %v5423_v16 = vld [vmem:[#allocation8 + $0xa4] sm:$0xf] }
 0x126   : > { %v6618_v44 = vpop.f32.mrf.mxu3  ;;  %v6620_v19 = vpop.f32.mrf.mxu1 }
 0x127   : > { %v1416_v14 = vmax.f32 %v1400_v21, 0.0  ;;  %v1304_v21 = vmax.f32 %v6506_v35, %v6546_v49  ;;  %v5419_v49 = vld [vmem:[#allocation8 + $0x84] sm:$0xf] }
 0x128   : > { %v1245_v32 = vpop.f32.mrf.mxu0 }
 0x129   : > { %v6622_v17 = vpack.c.bf16 %v1416_v14, %v1408_v46  ;;  %v1346_v1 = vmax.f32 %v6578_v37, %v1245_v32  ;;  %v4267_v14 = vor.u32 %v5423_v16, %v4264_v55  ;;  %v6885_v32 = vmax.f32 %v6496_v28, %v6532_v8 }
 0x12a   : > { %v1338_v25 = vadd.f32 %v1314_v33, %v1304_v21  ;;  %v4251_v8 = vor.u32 %v5419_v49, %v4248_v58  ;;  %v5411_v58 = vld [vmem:[#allocation8 + $0x44] sm:$0xf] }
 0x12b   : > { %2986 = vmatmul.bf16.vlgmr.msrb.gmra.mxu0 %v6622_v17  ;;  %v1380_v48 = vadd.f32 %v1364_v22, %v1346_v1 }
 0x12c   : > { %3090 = vmatpush.bf16.msrb.mxu0 %v4299_v9  ;;  %v1217_v56 = vpop.f32.mrf.mxu2  ;;  %v1330_v9 = vadd.f32 %v1314_v33, %v6885_v32  ;;  %v6886_v32 = vmax.f32 %v6500_v29, %v6536_v26 }
 0x12d   : > { %v1344_v37 = vmax.f32 %v6580_v4, %v1217_v56  ;;  %v1313_v4 = vperm.slane %v6599_v59, 3  ;;  %v1302_v56 = vmax.f32 %v6508_v39, %v6548_v10  ;;  %v6887_v39 = vmax.f32 %v6502_v30, %v6540_v34 }
 0x12e   : > { %v1231_v57 = vpop.f32.mrf.mxu3  ;;  %v6630_v36 = vpop.f32.mrf.mxu1  ;;  %v1396_v1 = vmax.f32 %v1330_v9, %v1380_v48  ;;  %v1328_v33 = vadd.f32 %v1312_v60, %v6886_v32  ;;  %v1361_v34 = vperm.slane %v6597_v52, 1  ;;  %v1301_v32 = vmax.f32 %v6522_v54, %v6566_v11  ;;  %v4664_v54 = vld [vmem:[#allocation8 + $0x3d0] sm:$0xf0] }
 0x12f   : > { %v1345_v47 = vmax.f32 %v6582_v13, %v1231_v57  ;;  %v1378_v28 = vadd.f32 %v1362_v45, %v1344_v37  ;;  %v1303_v13 = vmax.f32 %v6510_v40, %v6550_v15  ;;  %v5415_v57 = vld [vmem:[#allocation8 + $0x64] sm:$0xf]  ;;  %v1329_v10 = vadd.f32 %v1313_v4, %v6887_v39 }
 0x130   : > { %3091 = vmatpush.bf16.msrb.mxu0 %v4283_v27  ;;  %v1247_v46 = vpop.f32.mrf.mxu0  ;;  %v1412_v48 = vmax.f32 %v1396_v1, 0.0  ;;  %v5495_v1 = vld [vmem:[#allocation8 + $0x2e4] sm:$0xf] }
 0x131   : > { %v1354_v35 = vmax.f32 %v6586_v31, %v1247_v46  ;;  %v1379_v16 = vadd.f32 %v1363_v12, %v1345_v47  ;;  %v4232_v46 = vld [vmem:[#allocation8 + $0x70] sm:$0xf0]  ;;  %v1394_v9 = vmax.f32 %v1328_v33, %v1378_v28  ;;  %v1337_v49 = vadd.f32 %v1313_v4, %v1303_v13 }
 0x132   : > { %v4680_v4 = vld [vmem:[#allocation8 + $0x3f0] sm:$0xf0]  ;;  %v1316_v28 = vperm.slane %v6599_v59, 6 }
 0x133   : > { %v1388_v27 = vadd.f32 %v1364_v22, %v1354_v35  ;;  %v4235_v35 = vor.u32 %v5415_v57, %v4232_v46  ;;  %v1395_v29 = vmax.f32 %v1329_v10, %v1379_v16  ;;  %v5407_v57 = vld [vmem:[#allocation8 + $0x24] sm:$0xf]  ;;  %v4200_v46 = vld [vmem:[#allocation8 + $0x30] sm:$0xf0] }
 0x134   : > { %3092 = vmatpush.bf16.msrb.mxu0 %v4267_v14  ;;  %v1219_v55 = vpop.f32.mrf.mxu2  ;;  %v1336_v14 = vadd.f32 %v1312_v60, %v1302_v56  ;;  %v1311_v60 = vperm.slane %v6599_v59, 1  ;;  %v5491_v10 = vld [vmem:[#allocation8 + $0x2c4] sm:$0xf] }
 0x135   : > { %v1404_v31 = vmax.f32 %v1338_v25, %v1388_v27  ;;  %v1352_v22 = vmax.f32 %v6588_v5, %v1219_v55  ;;  %v4216_v25 = vld [vmem:[#allocation8 + $0x50] sm:$0xf0]  ;;  %v1411_v16 = vmax.f32 %v1395_v29, 0.0 }
 0x136   : > { %v1233_v21 = vpop.f32.mrf.mxu3  ;;  %v1203_v15 = vpop.f32.mrf.mxu1  ;;  %v4219_v13 = vor.u32 %v5411_v58, %v4216_v25  ;;  %v5403_v58 = vld [vmem:[#allocation8 + $0x4] sm:$0xf]  ;;  %v4184_v25 = vld [vmem:[#allocation8 + $0x10] sm:$0xf0] }
 0x137   : > { %v1420_v37 = vmax.f32 %v1404_v31, 0.0  ;;  %v1353_v40 = vmax.f32 %v6590_v18, %v1233_v21  ;;  %v1386_v47 = vadd.f32 %v1362_v45, %v1352_v22  ;;  %v1343_v30 = vmax.f32 %v6592_v38, %v1203_v15  ;;  %v4552_v18 = vld [vmem:[#allocation8 + $0x2f0] sm:$0xf0]  ;;  %v5527_v45 = vld [vmem:[#allocation8 + $0x3e4] sm:$0xf] }
 0x138   : > { %3093 = vmatpush.bf16.msrb.mxu0 %v4251_v8  ;;  %v1410_v8 = vmax.f32 %v1394_v9, 0.0  ;;  %v4555_v55 = vor.u32 %v5495_v1, %v4552_v18  ;;  %v4683_v39 = vor.u32 %v5527_v45, %v4680_v4  ;;  %v1317_v15 = vperm.slane %v6599_v59, 7  ;;  %v5487_v45 = vld [vmem:[#allocation8 + $0x2a4] sm:$0xf] }
 0x139   : > { %v6654_v26 = vpack.c.bf16 %v1420_v37, %v1412_v48  ;;  %v1387_v5 = vadd.f32 %v1363_v12, %v1353_v40  ;;  %v1402_v27 = vmax.f32 %v1336_v14, %v1386_v47  ;;  %v1377_v22 = vadd.f32 %v1361_v34, %v1343_v30  ;;  %v4536_v48 = vld [vmem:[#allocation8 + $0x2d0] sm:$0xf0] }
 0x13a   : > { %v6888_v37 = vmax.f32 %v6512_v42, %v6552_v20  ;;  %v1366_v9 = vperm.slane %v6597_v52, 6  ;;  %v4203_v42 = vor.u32 %v5407_v57, %v4200_v46  ;;  %v1335_v30 = vadd.f32 %v1311_v60, %v1301_v32  ;;  %v4424_v57 = vld [vmem:[#allocation8 + $0x1f0] sm:$0xf0] }
 0x13b   : > { %v1403_v56 = vmax.f32 %v1337_v49, %v1387_v5  ;;  %3042 = vmatmul.bf16.vlgmr.msra.gmra.mxu0 %v6654_v26  ;;  %v1418_v12 = vmax.f32 %v1402_v27, 0.0  ;;  %v1367_v49 = vperm.slane %v6597_v52, 7  ;;  %v4539_v5 = vor.u32 %v5491_v10, %v4536_v48  ;;  %v5559_v27 = vld [vmem:[#allocation8 + $0x4e4] sm:$0xf]  ;;  %v4792_v32 = vld [vmem:[#allocation8 + $0x4d0] sm:$0xf0] }
 0x13c   : > { %3094 = vmatpush.bf16.msrb.mxu0 %v4235_v35  ;;  %v1273_v38 = vpop.f32.mrf.mxu2  ;;  %v1327_v40 = vadd.f32 %v1311_v60, %v6888_v37  ;;  %v5523_v35 = vld [vmem:[#allocation8 + $0x3c4] sm:$0xf]  ;;  %v1306_v4 = vmax.f32 %v6526_v63, %v6570_v62  ;;  %v6889_v60 = vmax.f32 %v6518_v50, %v6558_v61  ;;  %v6890_v63 = vmax.f32 %v6520_v51, %v6562_v3 }
 0x13d   : > { %v1419_v31 = vmax.f32 %v1403_v56, 0.0  ;;  %v6663_v33 = vpack.c.bf16 %v1418_v12, %v1410_v8  ;;  %v1348_v11 = vmax.f32 %v6604_v43, %v1273_v38  ;;  %v4667_v18 = vor.u32 %v5523_v35, %v4664_v54  ;;  %v4808_v56 = vld [vmem:[#allocation8 + $0x4f0] sm:$0xf0]  ;;  %v5519_v12 = vld [vmem:[#allocation8 + $0x3a4] sm:$0xf] }
 0x13e   : > { %v1287_v21 = vpop.f32.mrf.mxu3  ;;  %v1205_v47 = vpop.f32.mrf.mxu1  ;;  %v1393_v1 = vmax.f32 %v1327_v40, %v1377_v22  ;;  %v1315_v8 = vperm.slane %v6599_v59, 5  ;;  %v4187_v38 = vor.u32 %v5403_v58, %v4184_v25  ;;  %v4811_v46 = vor.u32 %v5559_v27, %v4808_v56  ;;  %v5555_v61 = vld [vmem:[#allocation8 + $0x4c4] sm:$0xf]  ;;  %v4504_v40 = vld [vmem:[#allocation8 + $0x290] sm:$0xf0] }
 0x13f   : > { %v6669_v14 = vpack.c.bf16 %v1419_v31, %v1411_v16  ;;  %v1351_v29 = vmax.f32 %v6610_v0, %v1205_v47  ;;  %3014 = vmatmul.bf16.vlgmr.msra.gmra.mxu2 %v6663_v33  ;;  %v1349_v20 = vmax.f32 %v6606_v53, %v1287_v21  ;;  %v4520_v0 = vld [vmem:[#allocation8 + $0x2b0] sm:$0xf0]  ;;  %v1307_v53 = vmax.f32 %v6528_v2, %v6572_v7  ;;  %v5483_v37 = vld [vmem:[#allocation8 + $0x284] sm:$0xf] }
 0x140   : > { %3095 = vmatpush.bf16.msrb.mxu0 %v4219_v13  ;;  %3118 = vmatpush.bf16.msra.mxu2 %v4555_v55  ;;  %v4648_v13 = vld [vmem:[#allocation8 + $0x3b0] sm:$0xf0]  ;;  %v1382_v16 = vadd.f32 %v1366_v9, %v1348_v11  ;;  %v5463_v55 = vld [vmem:[#allocation8 + $0x1e4] sm:$0xf]  ;;  %v1333_v2 = vadd.f32 %v1317_v15, %v6890_v63  ;;  %v4523_v50 = vor.u32 %v5487_v45, %v4520_v0  ;;  %v1409_v22 = vmax.f32 %v1393_v1, 0.0 }
 0x141   : > { %3028 = vmatmul.bf16.vlgmr.msra.gmra.mxu3 %v6669_v14  ;;  %v1385_v43 = vadd.f32 %v1361_v34, %v1351_v29  ;;  %v1332_v34 = vadd.f32 %v1316_v28, %v6889_v60  ;;  %v1383_v62 = vadd.f32 %v1367_v49, %v1349_v20  ;;  %v4651_v48 = vor.u32 %v5519_v12, %v4648_v13  ;;  %v5515_v11 = vld [vmem:[#allocation8 + $0x384] sm:$0xf]  ;;  %v4632_v29 = vld [vmem:[#allocation8 + $0x390] sm:$0xf0] }
 0x142   : > { %3132 = vmatpush.bf16.msra.mxu3 %v4683_v39  ;;  %v1340_v51 = vadd.f32 %v1316_v28, %v1306_v4  ;;  %v1341_v3 = vadd.f32 %v1317_v15, %v1307_v53  ;;  %v4427_v54 = vor.u32 %v5463_v55, %v4424_v57  ;;  %v5459_v58 = vld [vmem:[#allocation8 + $0x1c4] sm:$0xf]  ;;  %v4408_v25 = vld [vmem:[#allocation8 + $0x1d0] sm:$0xf0]  ;;  %v1365_v28 = vperm.slane %v6597_v52, 5 }
 0x143   : > { %v1401_v31 = vmax.f32 %v1335_v30, %v1385_v43  ;;  %v1399_v27 = vmax.f32 %v1333_v2, %v1383_v62  ;;  %v5551_v43 = vld [vmem:[#allocation8 + $0x4a4] sm:$0xf]  ;;  %v4488_v0 = vld [vmem:[#allocation8 + $0x270] sm:$0xf0] }
 0x144   : > { %3096 = vmatpush.bf16.msrb.mxu0 %v4203_v42  ;;  %3119 = vmatpush.bf16.msra.mxu2 %v4539_v5  ;;  %v1275_v7 = vpop.f32.mrf.mxu2  ;;  %v1398_v42 = vmax.f32 %v1332_v34, %v1382_v16  ;;  %v5479_v56 = vld [vmem:[#allocation8 + $0x264] sm:$0xf]  ;;  %v4616_v4 = vld [vmem:[#allocation8 + $0x370] sm:$0xf0] }
 0x145   : > { %v1417_v21 = vmax.f32 %v1401_v31, 0.0  ;;  %v1356_v39 = vmax.f32 %v6616_v23, %v1275_v7  ;;  %v4795_v23 = vor.u32 %v5555_v61, %v4792_v32  ;;  %v5511_v52 = vld [vmem:[#allocation8 + $0x364] sm:$0xf]  ;;  %v4392_v60 = vld [vmem:[#allocation8 + $0x1b0] sm:$0xf0]  ;;  %v1415_v34 = vmax.f32 %v1399_v27, 0.0 }
 0x146   : > { %3133 = vmatpush.bf16.msra.mxu3 %v4667_v18  ;;  %v1289_v10 = vpop.f32.mrf.mxu3  ;;  %v1259_v35 = vpop.f32.mrf.mxu1  ;;  %v4776_v18 = vld [vmem:[#allocation8 + $0x4b0] sm:$0xf0]  ;;  %v1414_v53 = vmax.f32 %v1398_v42, 0.0  ;;  %v5455_v13 = vld [vmem:[#allocation8 + $0x1a4] sm:$0xf]  ;;  %v4491_v63 = vor.u32 %v5479_v56, %v4488_v0  ;;  %v4619_v2 = vor.u32 %v5511_v52, %v4616_v4 }
 0x147   : > { %v1357_v47 = vmax.f32 %v6618_v44, %v1289_v10  ;;  %v6697_v20 = vpack.c.bf16 %v1417_v21, %v1409_v22  ;;  %v1390_v5 = vadd.f32 %v1366_v9, %v1356_v39  ;;  %v4507_v44 = vor.u32 %v5483_v37, %v4504_v40  ;;  %v4760_v62 = vld [vmem:[#allocation8 + $0x490] sm:$0xf0]  ;;  %v5475_v7 = vld [vmem:[#allocation8 + $0x244] sm:$0xf] }
 0x148   : > { %3097 = vmatpush.bf16.msrb.mxu0 %v4187_v38  ;;  %3120 = vmatpush.bf16.msra.mxu2 %v4523_v50  ;;  %v1347_v1 = vmax.f32 %v6620_v19, %v1259_v35  ;;  %v4635_v9 = vor.u32 %v5515_v11, %v4632_v29  ;;  %v1305_v19 = vmax.f32 %v6544_v41, %v6584_v24  ;;  %v5547_v38 = vld [vmem:[#allocation8 + $0x484] sm:$0xf]  ;;  %v4600_v32 = vld [vmem:[#allocation8 + $0x350] sm:$0xf0] }
 0x149   : > { %v1391_v30 = vadd.f32 %v1367_v49, %v1357_v47  ;;  %v1406_v15 = vmax.f32 %v1340_v51, %v1390_v5  ;;  %3000 = vmatmul.bf16.vlgmr.msrb.gmra.mxu1 %v6697_v20  ;;  %v4411_v49 = vor.u32 %v5459_v58, %v4408_v25  ;;  %v4779_v31 = vor.u32 %v5551_v43, %v4776_v18  ;;  %v5507_v24 = vld [vmem:[#allocation8 + $0x344] sm:$0xf]  ;;  %v4376_v37 = vld [vmem:[#allocation8 + $0x190] sm:$0xf0] }
 0x14a   : > { %3134 = vmatpush.bf16.msra.mxu3 %v4651_v48  ;;  %3104 = vmatpush.bf16.msrb.mxu1 %v4427_v54  ;;  %v1381_v57 = vadd.f32 %v1365_v28, %v1347_v1  ;;  %v4395_v41 = vor.u32 %v5455_v13, %v4392_v60  ;;  %v6891_v22 = vld [vmem:[#allocation26_spill] sm:$0xff]  ;;  %v1339_v40 = vadd.f32 %v1315_v8, %v1305_v19  ;;  %v4744_v11 = vld [vmem:[#allocation8 + $0x470] sm:$0xf0] }
 0x14b   : > { %v1407_v45 = vmax.f32 %v1341_v3, %v1391_v30  ;;  %3098 = vmatmul.bf16.vlgmr.msrb.gmra.mxu0 %v6622_v17  ;;  %v1422_v12 = vmax.f32 %v1406_v15, 0.0  ;;  %v6892_v21 = vmax.f32 %v6530_v6, %v6891_v22  ;;  %v5451_v48 = vld [vmem:[#allocation8 + $0x184] sm:$0xf]  ;;  %v4763_v51 = vor.u32 %v5547_v38, %v4760_v62  ;;  %v4456_v42 = vld [vmem:[#allocation8 + $0x230] sm:$0xf0] }
 0x14c   : > { %3146 = vmatpush.bf16.msra.mxu0 %v4811_v46  ;;  %3121 = vmatpush.bf16.msra.mxu2 %v4507_v44  ;;  %v4472_v46 = vld [vmem:[#allocation8 + $0x250] sm:$0xf0]  ;;  %v4603_v6 = vor.u32 %v5507_v24, %v4600_v32  ;;  %v5543_v54 = vld [vmem:[#allocation8 + $0x464] sm:$0xf]  ;;  %v4379_v29 = vor.u32 %v5451_v48, %v4376_v37  ;;  %v5434_v48 = vld [vmem:[#allocation8 + $0xf4] sm:$0xf0] }
 0x14d   : > { %v1423_v16 = vmax.f32 %v1407_v45, 0.0  ;;  %v6707_v55 = vpack.c.bf16 %v1422_v12, %v1414_v53  ;;  %v1331_v39 = vadd.f32 %v1315_v8, %v6892_v21  ;;  %v4475_v3 = vor.u32 %v5475_v7, %v4472_v46  ;;  %v5503_v5 = vld [vmem:[#allocation8 + $0x324] sm:$0xf]  ;;  %v4360_v25 = vld [vmem:[#allocation8 + $0x170] sm:$0xf0] }
 0x14e   : > { %3135 = vmatpush.bf16.msra.mxu3 %v4635_v9  ;;  %3105 = vmatpush.bf16.msrb.mxu1 %v4411_v49  ;;  %v1261_v61 = vpop.f32.mrf.mxu1  ;;  %v5447_v8 = vld [vmem:[#allocation8 + $0x164] sm:$0xf]  ;;  %v4747_v58 = vor.u32 %v5543_v54, %v4744_v11  ;;  %v4728_v30 = vld [vmem:[#allocation8 + $0x450] sm:$0xf0] }
 0x14f   : > { %v6709_v50 = vpack.c.bf16 %v1423_v16, %v1415_v34  ;;  %v1355_v10 = vmax.f32 %v6630_v36, %v1261_v61  ;;  %3070 = vmatmul.bf16.vlgmr.msrb.gmra.mxu2 %v6707_v55  ;;  %v1397_v47 = vmax.f32 %v1331_v39, %v1381_v57  ;;  %v5471_v36 = vld [vmem:[#allocation8 + $0x224] sm:$0xf]  ;;  %v4440_v43 = vld [vmem:[#allocation8 + $0x210] sm:$0xf0]  ;;  %v4363_v0 = vor.u32 %v5447_v8, %v4360_v25 }
 0x150   : > { %3147 = vmatpush.bf16.msra.mxu0 %v4795_v23  ;;  %3122 = vmatpush.bf16.msra.mxu2 %v4491_v63  ;;  %v4584_v23 = vld [vmem:[#allocation8 + $0x330] sm:$0xf0]  ;;  %v5539_v27 = vld [vmem:[#allocation8 + $0x444] sm:$0xf]  ;;  %v4459_v15 = vor.u32 %v5471_v36, %v4456_v42 }
 0x151   : > { %3084 = vmatmul.bf16.vlgmr.msrb.gmra.mxu3 %v6709_v50  ;;  %v1389_v35 = vadd.f32 %v1365_v28, %v1355_v10  ;;  %v1413_v44 = vmax.f32 %v1397_v47, 0.0  ;;  %v4587_v1 = vor.u32 %v5503_v5, %v4584_v23  ;;  %v5467_v9 = vld [vmem:[#allocation8 + $0x204] sm:$0xf]  ;;  %v4568_v56 = vld [vmem:[#allocation8 + $0x310] sm:$0xf0]  ;;  %v4731_v12 = vor.u32 %v5539_v27, %v4728_v30 }
 0x152   : > { %3136 = vmatpush.bf16.msra.mxu3 %v4619_v2  ;;  %3106 = vmatpush.bf16.msrb.mxu1 %v4395_v41  ;;  %v5499_v18 = vld [vmem:[#allocation8 + $0x304] sm:$0xf]  ;;  %v5064_v52 = vld [vmem:[#allocation8 + $0x6f0] sm:$0xf0]  ;;  %v4443_v19 = vor.u32 %v5467_v9, %v4440_v43  ;;  %v4302_v10 = vld [vmem:[#allocation8 + $0xe8] sm:$0xf] }
 0x153   : > { %v1405_v59 = vmax.f32 %v1339_v40, %v1389_v35  ;;  %v5623_v45 = vld [vmem:[#allocation8 + $0x6e4] sm:$0xf]  ;;  %v5192_v53 = vld [vmem:[#allocation8 + $0x7f0] sm:$0xf0]  ;;  %v4571_v34 = vor.u32 %v5499_v18, %v4568_v56  ;;  %v4303_v11 = vor.u32 %v5434_v48, %v4302_v10  ;;  %v4286_v23 = vld [vmem:[#allocation8 + $0xc8] sm:$0xf] }
 0x154   : > { %3148 = vmatpush.bf16.msra.mxu0 %v4779_v31  ;;  %3123 = vmatpush.bf16.msra.mxu2 %v4475_v3  ;;  %v5655_v4 = vld [vmem:[#allocation8 + $0x7e4] sm:$0xf]  ;;  %v4344_v60 = vld [vmem:[#allocation8 + $0x150] sm:$0xf0]  ;;  %v5067_v38 = vor.u32 %v5623_v45, %v5064_v52  ;;  %v4270_v18 = vld [vmem:[#allocation8 + $0xa8] sm:$0xf] }
 0x155   : > { %v1421_v28 = vmax.f32 %v1405_v59, 0.0  ;;  %v5443_v13 = vld [vmem:[#allocation8 + $0x144] sm:$0xf]  ;;  %v4712_v31 = vld [vmem:[#allocation8 + $0x430] sm:$0xf0]  ;;  %v5195_v57 = vor.u32 %v5655_v4, %v5192_v53 }
 0x156   : > { %3137 = vmatpush.bf16.msra.mxu3 %v4603_v6  ;;  %3107 = vmatpush.bf16.msrb.mxu1 %v4379_v29  ;;  %v5535_v16 = vld [vmem:[#allocation8 + $0x424] sm:$0xf]  ;;  %v4347_v2 = vor.u32 %v5443_v13, %v4344_v60  ;;  %v5048_v62 = vld [vmem:[#allocation8 + $0x6d0] sm:$0xf0]  ;;  %v5430_v59 = vld [vmem:[#allocation8 + $0xd4] sm:$0xf0] }
 0x157   : > { %v6721_v49 = vpack.c.bf16 %v1421_v28, %v1413_v44  ;;  %v5619_v63 = vld [vmem:[#allocation8 + $0x6c4] sm:$0xf]  ;;  %v5176_v46 = vld [vmem:[#allocation8 + $0x7d0] sm:$0xf0]  ;;  %v4715_v61 = vor.u32 %v5535_v16, %v4712_v31  ;;  %v4287_v28 = vor.u32 %v5430_v59, %v4286_v23  ;;  %v5426_v56 = vld [vmem:[#allocation8 + $0xb4] sm:$0xf0] }
 0x158   : > { %3149 = vmatpush.bf16.msra.mxu0 %v4763_v51  ;;  %3124 = vmatpush.bf16.msra.mxu2 %v4459_v15  ;;  %v5651_v7 = vld [vmem:[#allocation8 + $0x7c4] sm:$0xf]  ;;  %v4328_v24 = vld [vmem:[#allocation8 + $0x130] sm:$0xf0]  ;;  %v5051_v21 = vor.u32 %v5619_v63, %v5048_v62  ;;  %v4254_v16 = vld [vmem:[#allocation8 + $0x88] sm:$0xf] }
 0x159   : > { %3056 = vmatmul.bf16.vlgmr.msra.gmra.mxu1 %v6721_v49  ;;  %v5439_v41 = vld [vmem:[#allocation8 + $0x124] sm:$0xf]  ;;  %v4696_v22 = vld [vmem:[#allocation8 + $0x410] sm:$0xf0]  ;;  %v5179_v39 = vor.u32 %v5651_v7, %v5176_v46  ;;  %v5422_v31 = vld [vmem:[#allocation8 + $0x94] sm:$0xf0] }
 0x15a   : > { %3138 = vmatpush.bf16.msra.mxu3 %v4587_v1  ;;  %3108 = vmatpush.bf16.msrb.mxu1 %v4363_v0  ;;  %v5531_v32 = vld [vmem:[#allocation8 + $0x404] sm:$0xf]  ;;  %v4331_v40 = vor.u32 %v5439_v41, %v4328_v24  ;;  %v5032_v51 = vld [vmem:[#allocation8 + $0x6b0] sm:$0xf0]  ;;  %v4255_v7 = vor.u32 %v5422_v31, %v4254_v16  ;;  %v5498_v59 = vld [vmem:[#allocation8 + $0x2f4] sm:$0xf0] }
 0x15b   : > { %v5615_v37 = vld [vmem:[#allocation8 + $0x6a4] sm:$0xf]  ;;  %v5160_v47 = vld [vmem:[#allocation8 + $0x7b0] sm:$0xf0]  ;;  %v4699_v35 = vor.u32 %v5531_v32, %v4696_v22  ;;  %v4238_v32 = vld [vmem:[#allocation8 + $0x68] sm:$0xf] }
 0x15c   : > { %3150 = vmatpush.bf16.msra.mxu0 %v4747_v58  ;;  %3125 = vmatpush.bf16.msra.mxu2 %v4443_v19  ;;  %v5647_v3 = vld [vmem:[#allocation8 + $0x7a4] sm:$0xf]  ;;  %v4312_v54 = vld [vmem:[#allocation8 + $0x110] sm:$0xf0]  ;;  %v5035_v42 = vor.u32 %v5615_v37, %v5032_v51  ;;  %v5418_v22 = vld [vmem:[#allocation8 + $0x74] sm:$0xf0] }
 0x15d   : > { %v5435_v6 = vld [vmem:[#allocation8 + $0x104] sm:$0xf]  ;;  %v4936_v29 = vld [vmem:[#allocation8 + $0x5f0] sm:$0xf0]  ;;  %v5163_v5 = vor.u32 %v5647_v3, %v5160_v47  ;;  %v4222_v47 = vld [vmem:[#allocation8 + $0x48] sm:$0xf] }
 0x15e   : > { %3139 = vmatpush.bf16.msra.mxu3 %v4571_v34  ;;  %3109 = vmatpush.bf16.msrb.mxu1 %v4347_v2  ;;  %v5591_v36 = vld [vmem:[#allocation8 + $0x5e4] sm:$0xf]  ;;  %v4315_v58 = vor.u32 %v5435_v6, %v4312_v54  ;;  %v5016_v25 = vld [vmem:[#allocation8 + $0x690] sm:$0xf0]  ;;  %v5414_v54 = vld [vmem:[#allocation8 + $0x54] sm:$0xf0] }
 0x15f   : > { %3126 = vmatmul.bf16.vlgmr.msra.gmra.mxu2 %v6663_v33  ;;  %v5611_v8 = vld [vmem:[#allocation8 + $0x684] sm:$0xf]  ;;  %v5144_v30 = vld [vmem:[#allocation8 + $0x790] sm:$0xf0]  ;;  %v4939_v44 = vor.u32 %v5591_v36, %v4936_v29  ;;  %v4814_v16 = vld [vmem:[#allocation8 + $0x4e8] sm:$0xf] }
 0x160   : > { %3151 = vmatpush.bf16.msra.mxu0 %v4731_v12  ;;  %3174 = vmatpush.bf16.msrb.mxu2 %v5067_v38  ;;  %v5643_v27 = vld [vmem:[#allocation8 + $0x784] sm:$0xf]  ;;  %v4920_v1 = vld [vmem:[#allocation8 + $0x5d0] sm:$0xf0]  ;;  %v5019_v9 = vor.u32 %v5611_v8, %v5016_v25  ;;  %v4271_v12 = vor.u32 %v5426_v56, %v4270_v18  ;;  %v4686_v8 = vld [vmem:[#allocation8 + $0x3e8] sm:$0xf]  ;;  %v4223_v25 = vor.u32 %v5414_v54, %v4222_v47 }
 0x161   : > { %3140 = vmatmul.bf16.vlgmr.msra.gmra.mxu3 %v6669_v14  ;;  %v5587_v15 = vld [vmem:[#allocation8 + $0x5c4] sm:$0xf]  ;;  %v5147_v43 = vor.u32 %v5643_v27, %v5144_v30  ;;  %v5000_v0 = vld [vmem:[#allocation8 + $0x670] sm:$0xf0]  ;;  %v4542_v18 = vld [vmem:[#allocation8 + $0x2c8] sm:$0xf] }
 0x162   : > { %3188 = vmatpush.bf16.msrb.mxu3 %v5195_v57  ;;  %3110 = vmatpush.bf16.msrb.mxu1 %v4331_v40  ;;  %v5607_v45 = vld [vmem:[#allocation8 + $0x664] sm:$0xf]  ;;  %v5128_v4 = vld [vmem:[#allocation8 + $0x770] sm:$0xf0]  ;;  %v4923_v53 = vor.u32 %v5587_v15, %v4920_v1  ;;  %v4239_v40 = vor.u32 %v5418_v22, %v4238_v32  ;;  %v5562_v31 = vld [vmem:[#allocation8 + $0x4f4] sm:$0xf0] }
 0x163   : > { %v5639_v52 = vld [vmem:[#allocation8 + $0x764] sm:$0xf]  ;;  %v4904_v60 = vld [vmem:[#allocation8 + $0x5b0] sm:$0xf0]  ;;  %v5003_v19 = vor.u32 %v5607_v45, %v5000_v0  ;;  %v5494_v45 = vld [vmem:[#allocation8 + $0x2d4] sm:$0xf0]  ;;  %v4815_v32 = vor.u32 %v5562_v31, %v4814_v16 }
 0x164   : > { %3152 = vmatpush.bf16.msra.mxu0 %v4715_v61  ;;  %3175 = vmatpush.bf16.msrb.mxu2 %v5051_v21  ;;  %v5583_v13 = vld [vmem:[#allocation8 + $0x5a4] sm:$0xf]  ;;  %v5131_v34 = vor.u32 %v5639_v52, %v5128_v4  ;;  %v4984_v57 = vld [vmem:[#allocation8 + $0x650] sm:$0xf0]  ;;  %v4670_v0 = vld [vmem:[#allocation8 + $0x3c8] sm:$0xf] }
 0x165   : > { %v5603_v38 = vld [vmem:[#allocation8 + $0x644] sm:$0xf]  ;;  %v5112_v2 = vld [vmem:[#allocation8 + $0x750] sm:$0xf0]  ;;  %v4907_v62 = vor.u32 %v5583_v13, %v4904_v60  ;;  %v5526_v52 = vld [vmem:[#allocation8 + $0x3d4] sm:$0xf0]  ;;  %v4543_v60 = vor.u32 %v5494_v45, %v4542_v18 }
 0x166   : > { %3189 = vmatpush.bf16.msrb.mxu3 %v5179_v39  ;;  %3111 = vmatpush.bf16.msrb.mxu1 %v4315_v58  ;;  %v5635_v63 = vld [vmem:[#allocation8 + $0x744] sm:$0xf]  ;;  %v4888_v61 = vld [vmem:[#allocation8 + $0x590] sm:$0xf0]  ;;  %v4987_v41 = vor.u32 %v5603_v38, %v4984_v57  ;;  %v5530_v58 = vld [vmem:[#allocation8 + $0x3f4] sm:$0xf0] }
 0x167   : > { %v5579_v46 = vld [vmem:[#allocation8 + $0x584] sm:$0xf]  ;;  %v5115_v24 = vor.u32 %v5635_v63, %v5112_v2  ;;  %v4968_v39 = vld [vmem:[#allocation8 + $0x630] sm:$0xf0]  ;;  %v4687_v1 = vor.u32 %v5530_v58, %v4686_v8  ;;  %v4190_v13 = vld [vmem:[#allocation8 + $0x8] sm:$0xf] }
 0x168   : > { %3153 = vmatpush.bf16.msra.mxu0 %v4699_v35  ;;  %3176 = vmatpush.bf16.msrb.mxu2 %v5035_v42  ;;  %v5599_v21 = vld [vmem:[#allocation8 + $0x624] sm:$0xf]  ;;  %v5096_v48 = vld [vmem:[#allocation8 + $0x730] sm:$0xf0]  ;;  %v4891_v37 = vor.u32 %v5579_v46, %v4888_v61  ;;  %v4526_v57 = vld [vmem:[#allocation8 + $0x2a8] sm:$0xf] }
 0x169   : > { %3112 = vmatmul.bf16.vlgmr.msrb.gmra.mxu1 %v6697_v20  ;;  %v5631_v10 = vld [vmem:[#allocation8 + $0x724] sm:$0xf]  ;;  %v4872_v3 = vld [vmem:[#allocation8 + $0x570] sm:$0xf0]  ;;  %v4971_v35 = vor.u32 %v5599_v21, %v4968_v39  ;;  %v5490_v63 = vld [vmem:[#allocation8 + $0x2b4] sm:$0xf0] }
 0x16a   : > { %3190 = vmatpush.bf16.msrb.mxu3 %v5163_v5  ;;  %3160 = vmatpush.bf16.msra.mxu1 %v4939_v44  ;;  %v5575_v51 = vld [vmem:[#allocation8 + $0x564] sm:$0xf]  ;;  %v5099_v6 = vor.u32 %v5631_v10, %v5096_v48  ;;  %v4952_v36 = vld [vmem:[#allocation8 + $0x610] sm:$0xf0]  ;;  %v4558_v5 = vld [vmem:[#allocation8 + $0x2e8] sm:$0xf]  ;;  %v4527_v22 = vor.u32 %v5490_v63, %v4526_v57 }
 0x16b   : > { %3154 = vmatmul.bf16.vlgmr.msra.gmra.mxu0 %v6654_v26  ;;  %v5627_v29 = vld [vmem:[#allocation8 + $0x704] sm:$0xf]  ;;  %v5080_v42 = vld [vmem:[#allocation8 + $0x710] sm:$0xf0]  ;;  %v4875_v23 = vor.u32 %v5575_v51, %v4872_v3  ;;  %v4559_v15 = vor.u32 %v5498_v59, %v4558_v5  ;;  %v4654_v2 = vld [vmem:[#allocation8 + $0x3a8] sm:$0xf] }
 0x16c   : > { %3202 = vmatpush.bf16.msrb.mxu0 %v4303_v11  ;;  %3177 = vmatpush.bf16.msrb.mxu2 %v5019_v9  ;;  %v5595_v11 = vld [vmem:[#allocation8 + $0x604] sm:$0xf]  ;;  %v4856_v30 = vld [vmem:[#allocation8 + $0x550] sm:$0xf0]  ;;  %v4206_v9 = vld [vmem:[#allocation8 + $0x28] sm:$0xf] }
 0x16d   : > { %v5571_v27 = vld [vmem:[#allocation8 + $0x544] sm:$0xf]  ;;  %v4955_v44 = vor.u32 %v5595_v11, %v4952_v36  ;;  %v4824_v46 = vld [vmem:[#allocation8 + $0x510] sm:$0xf0]  ;;  %v4798_v10 = vld [vmem:[#allocation8 + $0x4c8] sm:$0xf] }
 0x16e   : > { %3191 = vmatpush.bf16.msrb.mxu3 %v5147_v43  ;;  %3161 = vmatpush.bf16.msra.mxu1 %v4923_v53  ;;  %v5410_v43 = vld [vmem:[#allocation8 + $0x34] sm:$0xf0]  ;;  %v4859_v56 = vor.u32 %v5571_v27, %v4856_v30  ;;  %v5567_v4 = vld [vmem:[#allocation8 + $0x524] sm:$0xf]  ;;  %v4840_v53 = vld [vmem:[#allocation8 + $0x530] sm:$0xf0] }
 0x16f   : > { %v4843_v38 = vor.u32 %v5567_v4, %v4840_v53  ;;  %v5558_v48 = vld [vmem:[#allocation8 + $0x4d4] sm:$0xf0]  ;;  %v4638_v3 = vld [vmem:[#allocation8 + $0x388] sm:$0xf] }
 0x170   : > { %3203 = vmatpush.bf16.msrb.mxu0 %v4287_v28  ;;  %3178 = vmatpush.bf16.msrb.mxu2 %v5003_v19  ;;  %v5083_v28 = vor.u32 %v5627_v29, %v5080_v42  ;;  %v4671_v19 = vor.u32 %v5526_v52, %v4670_v0  ;;  %v5486_v51 = vld [vmem:[#allocation8 + $0x294] sm:$0xf0]  ;;  %v4799_v54 = vor.u32 %v5558_v48, %v4798_v10  ;;  %v4782_v29 = vld [vmem:[#allocation8 + $0x4a8] sm:$0xf] }
 0x171   : > { %v5518_v47 = vld [vmem:[#allocation8 + $0x394] sm:$0xf0]  ;;  %v4494_v5 = vld [vmem:[#allocation8 + $0x268] sm:$0xf] }
 0x172   : > { %3192 = vmatpush.bf16.msrb.mxu3 %v5131_v34  ;;  %3162 = vmatpush.bf16.msra.mxu1 %v4907_v62  ;;  %v5406_v34 = vld [vmem:[#allocation8 + $0x14] sm:$0xf0]  ;;  %v4639_v36 = vor.u32 %v5518_v47, %v4638_v3  ;;  %v4622_v8 = vld [vmem:[#allocation8 + $0x368] sm:$0xf] }
 0x173   : > { %v5522_v62 = vld [vmem:[#allocation8 + $0x3b4] sm:$0xf0]  ;;  %v4191_v61 = vor.u32 %v5406_v34, %v4190_v13  ;;  %v4382_v0 = vld [vmem:[#allocation8 + $0x188] sm:$0xf] }
 0x174   : > { %3204 = vmatpush.bf16.msrb.mxu0 %v4271_v12  ;;  %3179 = vmatpush.bf16.msrb.mxu2 %v4987_v41  ;;  %v4207_v12 = vor.u32 %v5410_v43, %v4206_v9  ;;  %v4430_v41 = vld [vmem:[#allocation8 + $0x1e8] sm:$0xf]  ;;  %v4655_v21 = vor.u32 %v5522_v62, %v4654_v2  ;;  %v5554_v42 = vld [vmem:[#allocation8 + $0x4b4] sm:$0xf0] }
 0x175   : > { %v5482_v59 = vld [vmem:[#allocation8 + $0x274] sm:$0xf0]  ;;  %v4783_v30 = vor.u32 %v5554_v42, %v4782_v29  ;;  %v4478_v9 = vld [vmem:[#allocation8 + $0x248] sm:$0xf] }
 0x176   : > { %3193 = vmatpush.bf16.msrb.mxu3 %v5115_v24  ;;  %3163 = vmatpush.bf16.msra.mxu1 %v4891_v37  ;;  %v5466_v24 = vld [vmem:[#allocation8 + $0x1f4] sm:$0xf0]  ;;  %v4510_v37 = vld [vmem:[#allocation8 + $0x288] sm:$0xf] }
 0x177   : > { %v4511_v11 = vor.u32 %v5486_v51, %v4510_v37  ;;  %v5514_v58 = vld [vmem:[#allocation8 + $0x374] sm:$0xf0]  ;;  %v4750_v13 = vld [vmem:[#allocation8 + $0x468] sm:$0xf] }
 0x178   : > { %3205 = vmatpush.bf16.msrb.mxu0 %v4255_v7  ;;  %3180 = vmatpush.bf16.msrb.mxu2 %v4971_v35  ;;  %v5563_v7 = vld [vmem:[#allocation8 + $0x504] sm:$0xf]  ;;  %v4414_v35 = vld [vmem:[#allocation8 + $0x1c8] sm:$0xf]  ;;  %v5458_v27 = vld [vmem:[#allocation8 + $0x1b4] sm:$0xf0] }
 0x179   : > { %v4827_v39 = vor.u32 %v5563_v7, %v4824_v46  ;;  %v5478_v18 = vld [vmem:[#allocation8 + $0x254] sm:$0xf0]  ;;  %v4590_v31 = vld [vmem:[#allocation8 + $0x328] sm:$0xf] }
 0x17a   : > { %3194 = vmatpush.bf16.msrb.mxu3 %v5099_v6  ;;  %3164 = vmatpush.bf16.msra.mxu1 %v4875_v23  ;;  %v5462_v6 = vld [vmem:[#allocation8 + $0x1d4] sm:$0xf0]  ;;  %v4479_v53 = vor.u32 %v5478_v18, %v4478_v9  ;;  %v4366_v57 = vld [vmem:[#allocation8 + $0x168] sm:$0xf] }
 0x17b   : > { %v4415_v23 = vor.u32 %v5462_v6, %v4414_v35  ;;  %v5510_v45 = vld [vmem:[#allocation8 + $0x354] sm:$0xf0]  ;;  %v4734_v62 = vld [vmem:[#allocation8 + $0x448] sm:$0xf] }
 0x17c   : > { %3206 = vmatpush.bf16.msrb.mxu0 %v4239_v40  ;;  %3181 = vmatpush.bf16.msrb.mxu2 %v4955_v44  ;;  %v4431_v40 = vor.u32 %v5466_v24, %v4430_v41  ;;  %v4495_v44 = vor.u32 %v5482_v59, %v4494_v5  ;;  %v5454_v52 = vld [vmem:[#allocation8 + $0x194] sm:$0xf0]  ;;  %v4446_v41 = vld [vmem:[#allocation8 + $0x208] sm:$0xf] }
 0x17d   : > { %v4383_v34 = vor.u32 %v5454_v52, %v4382_v0  ;;  %v5474_v16 = vld [vmem:[#allocation8 + $0x234] sm:$0xf0]  ;;  %v5198_v48 = vld [vmem:[#allocation8 + $0x7e8] sm:$0xf] }
 0x17e   : > { %3195 = vmatpush.bf16.msrb.mxu3 %v5083_v28  ;;  %3165 = vmatpush.bf16.msra.mxu1 %v4859_v56  ;;  %v4623_v28 = vor.u32 %v5514_v58, %v4622_v8  ;;  %v4606_v56 = vld [vmem:[#allocation8 + $0x348] sm:$0xf]  ;;  %v5450_v63 = vld [vmem:[#allocation8 + $0x174] sm:$0xf0] }
 0x17f   : > { %3182 = vmatmul.bf16.vlgmr.msrb.gmra.mxu2 %v6707_v55  ;;  %v5470_v24 = vld [vmem:[#allocation8 + $0x214] sm:$0xf0]  ;;  %v4350_v51 = vld [vmem:[#allocation8 + $0x148] sm:$0xf] }
 0x180   : > { %3207 = vmatpush.bf16.msrb.mxu0 %v4223_v25  ;;  %3230 = vmatpush.bf16.msra.mxu2 %v4559_v15  ;;  %v4398_v25 = vld [vmem:[#allocation8 + $0x1a8] sm:$0xf]  ;;  %v5626_v10 = vld [vmem:[#allocation8 + $0x6f4] sm:$0xf0]  ;;  %v4447_v47 = vor.u32 %v5470_v24, %v4446_v41 }
 0x181   : > { %3196 = vmatmul.bf16.vlgmr.msrb.gmra.mxu3 %v6709_v50  ;;  %v4766_v15 = vld [vmem:[#allocation8 + $0x488] sm:$0xf]  ;;  %v4399_v43 = vor.u32 %v5458_v27, %v4398_v25  ;;  %v5658_v37 = vld [vmem:[#allocation8 + $0x7f4] sm:$0xf0] }
 0x182   : > { %3244 = vmatpush.bf16.msra.mxu3 %v4687_v1  ;;  %3166 = vmatpush.bf16.msra.mxu1 %v4843_v38  ;;  %v5550_v1 = vld [vmem:[#allocation8 + $0x494] sm:$0xf0]  ;;  %v5054_v29 = vld [vmem:[#allocation8 + $0x6c8] sm:$0xf] }
 0x183   : > { %v4767_v4 = vor.u32 %v5550_v1, %v4766_v15  ;;  %v5506_v38 = vld [vmem:[#allocation8 + $0x334] sm:$0xf0]  ;;  %v4334_v8 = vld [vmem:[#allocation8 + $0x128] sm:$0xf]  ;;  %v5432_v15 = vld [vmem:[#allocation8 + $0xec] sm:$0xf] }
 0x184   : > { %3208 = vmatpush.bf16.msrb.mxu0 %v4207_v12  ;;  %3231 = vmatpush.bf16.msra.mxu2 %v4543_v60  ;;  %v4607_v12 = vor.u32 %v5510_v45, %v4606_v56  ;;  %v5546_v60 = vld [vmem:[#allocation8 + $0x474] sm:$0xf0]  ;;  %v4591_v46 = vor.u32 %v5506_v38, %v4590_v31  ;;  %v4702_v27 = vld [vmem:[#allocation8 + $0x408] sm:$0xf]  ;;  %v4304_v1 = vld [vmem:[#allocation8 + $0xf8] sm:$0xf0] }
 0x185   : > { %v4751_v2 = vor.u32 %v5546_v60, %v4750_v13  ;;  %v5446_v3 = vld [vmem:[#allocation8 + $0x154] sm:$0xf0]  ;;  %v5166_v56 = vld [vmem:[#allocation8 + $0x7a8] sm:$0xf]  ;;  %v4307_v13 = vor.u32 %v5432_v15, %v4304_v1  ;;  %v4288_v31 = vld [vmem:[#allocation8 + $0xd8] sm:$0xf0] }
 0x186   : > { %3245 = vmatpush.bf16.msra.mxu3 %v4671_v19  ;;  %3167 = vmatpush.bf16.msra.mxu1 %v4827_v39  ;;  %v4462_v19 = vld [vmem:[#allocation8 + $0x228] sm:$0xf]  ;;  %v4351_v42 = vor.u32 %v5446_v3, %v4350_v51  ;;  %v5622_v5 = vld [vmem:[#allocation8 + $0x6d4] sm:$0xf0] }
 0x187   : > { %v4463_v7 = vor.u32 %v5474_v16, %v4462_v19  ;;  %v5070_v39 = vld [vmem:[#allocation8 + $0x6e8] sm:$0xf]  ;;  %v5654_v59 = vld [vmem:[#allocation8 + $0x7d4] sm:$0xf0]  ;;  %v5428_v16 = vld [vmem:[#allocation8 + $0xcc] sm:$0xf] }
 0x188   : > { %3209 = vmatpush.bf16.msrb.mxu0 %v4191_v61  ;;  %3232 = vmatpush.bf16.msra.mxu2 %v4527_v22  ;;  %v5542_v61 = vld [vmem:[#allocation8 + $0x454] sm:$0xf0]  ;;  %v4574_v22 = vld [vmem:[#allocation8 + $0x308] sm:$0xf]  ;;  %v5071_v6 = vor.u32 %v5626_v10, %v5070_v39 }
 0x189   : > { %3168 = vmatmul.bf16.vlgmr.msra.gmra.mxu1 %v6721_v49  ;;  %v5442_v58 = vld [vmem:[#allocation8 + $0x134] sm:$0xf0]  ;;  %v4318_v0 = vld [vmem:[#allocation8 + $0x108] sm:$0xf] }
 0x18a   : > { %3246 = vmatpush.bf16.msra.mxu3 %v4655_v21  ;;  %3216 = vmatpush.bf16.msrb.mxu1 %v4431_v40  ;;  %v5502_v21 = vld [vmem:[#allocation8 + $0x314] sm:$0xf0]  ;;  %v4735_v40 = vor.u32 %v5542_v61, %v4734_v62  ;;  %v4335_v9 = vor.u32 %v5442_v58, %v4334_v8  ;;  %v5022_v38 = vld [vmem:[#allocation8 + $0x688] sm:$0xf]  ;;  %v4291_v61 = vor.u32 %v5428_v16, %v4288_v31  ;;  %v4560_v16 = vld [vmem:[#allocation8 + $0x2f8] sm:$0xf0] }
 0x18b   : > { %3210 = vmatmul.bf16.vlgmr.msrb.gmra.mxu0 %v6622_v17  ;;  %v4575_v35 = vor.u32 %v5502_v21, %v4574_v22  ;;  %v5618_v18 = vld [vmem:[#allocation8 + $0x6b4] sm:$0xf0]  ;;  %v4272_v22 = vld [vmem:[#allocation8 + $0xb8] sm:$0xf0]  ;;  %v5006_v21 = vld [vmem:[#allocation8 + $0x668] sm:$0xf] }
 0x18c   : > { %3258 = vmatpush.bf16.msra.mxu0 %v4815_v32  ;;  %3233 = vmatpush.bf16.msra.mxu2 %v4511_v11  ;;  %v4367_v32 = vor.u32 %v5450_v63, %v4366_v57  ;;  %v4718_v11 = vld [vmem:[#allocation8 + $0x428] sm:$0xf]  ;;  %v5650_v45 = vld [vmem:[#allocation8 + $0x7b4] sm:$0xf0]  ;;  %v5528_v31 = vld [vmem:[#allocation8 + $0x3ec] sm:$0xf] }
 0x18d   : > { %v5438_v52 = vld [vmem:[#allocation8 + $0x114] sm:$0xf0]  ;;  %v5167_v19 = vor.u32 %v5650_v45, %v5166_v56  ;;  %v5102_v1 = vld [vmem:[#allocation8 + $0x728] sm:$0xf]  ;;  %v5412_v45 = vld [vmem:[#allocation8 + $0x4c] sm:$0xf] }
 0x18e   : > { %3247 = vmatpush.bf16.msra.mxu3 %v4639_v36  ;;  %3217 = vmatpush.bf16.msrb.mxu1 %v4415_v23  ;;  %v5538_v36 = vld [vmem:[#allocation8 + $0x434] sm:$0xf0]  ;;  %v5182_v23 = vld [vmem:[#allocation8 + $0x7c8] sm:$0xf] }
 0x18f   : > { %v4719_v25 = vor.u32 %v5538_v36, %v4718_v11  ;;  %v5614_v63 = vld [vmem:[#allocation8 + $0x694] sm:$0xf0]  ;;  %v4990_v11 = vld [vmem:[#allocation8 + $0x648] sm:$0xf] }
 0x190   : > { %3259 = vmatpush.bf16.msra.mxu0 %v4799_v54  ;;  %3234 = vmatpush.bf16.msra.mxu2 %v4495_v44  ;;  %v5199_v54 = vor.u32 %v5658_v37, %v5198_v48  ;;  %v5183_v44 = vor.u32 %v5654_v59, %v5182_v23  ;;  %v5646_v62 = vld [vmem:[#allocation8 + $0x794] sm:$0xf0]  ;;  %v5023_v41 = vor.u32 %v5614_v63, %v5022_v38  ;;  %v5134_v48 = vld [vmem:[#allocation8 + $0x768] sm:$0xf]  ;;  %v4688_v38 = vld [vmem:[#allocation8 + $0x3f8] sm:$0xf0] }
 0x191   : > { %v5610_v10 = vld [vmem:[#allocation8 + $0x674] sm:$0xf0]  ;;  %v4894_v23 = vld [vmem:[#allocation8 + $0x588] sm:$0xf] }
 0x192   : > { %3248 = vmatpush.bf16.msra.mxu3 %v4623_v28  ;;  %3218 = vmatpush.bf16.msrb.mxu1 %v4399_v43  ;;  %v5534_v28 = vld [vmem:[#allocation8 + $0x414] sm:$0xf0]  ;;  %v5038_v43 = vld [vmem:[#allocation8 + $0x6a8] sm:$0xf] }
 0x193   : > { %v5039_v60 = vor.u32 %v5618_v18, %v5038_v43  ;;  %v5642_v37 = vld [vmem:[#allocation8 + $0x774] sm:$0xf0]  ;;  %v4878_v43 = vld [vmem:[#allocation8 + $0x568] sm:$0xf] }
 0x194   : > { %3260 = vmatpush.bf16.msra.mxu0 %v4783_v30  ;;  %3235 = vmatpush.bf16.msra.mxu2 %v4479_v53  ;;  %v5055_v30 = vor.u32 %v5622_v5, %v5054_v29  ;;  %v4942_v53 = vld [vmem:[#allocation8 + $0x5e8] sm:$0xf]  ;;  %v5586_v51 = vld [vmem:[#allocation8 + $0x5b4] sm:$0xf0] }
 0x195   : > { %v5606_v29 = vld [vmem:[#allocation8 + $0x654] sm:$0xf0]  ;;  %v4862_v63 = vld [vmem:[#allocation8 + $0x548] sm:$0xf] }
 0x196   : > { %3249 = vmatpush.bf16.msra.mxu3 %v4607_v12  ;;  %3219 = vmatpush.bf16.msrb.mxu1 %v4383_v34  ;;  %v5594_v12 = vld [vmem:[#allocation8 + $0x5f4] sm:$0xf0]  ;;  %v4319_v34 = vor.u32 %v5438_v52, %v4318_v0  ;;  %v4991_v58 = vor.u32 %v5606_v29, %v4990_v11  ;;  %v4528_v29 = vld [vmem:[#allocation8 + $0x2b8] sm:$0xf0] }
 0x197   : > { %v4943_v57 = vor.u32 %v5594_v12, %v4942_v53  ;;  %v5638_v5 = vld [vmem:[#allocation8 + $0x754] sm:$0xf0]  ;;  %v4958_v53 = vld [vmem:[#allocation8 + $0x608] sm:$0xf] }
 0x198   : > { %3261 = vmatpush.bf16.msra.mxu0 %v4767_v4  ;;  %3236 = vmatpush.bf16.msra.mxu2 %v4463_v7  ;;  %v4703_v4 = vor.u32 %v5534_v28, %v4702_v27  ;;  %v4926_v7 = vld [vmem:[#allocation8 + $0x5c8] sm:$0xf]  ;;  %v5582_v59 = vld [vmem:[#allocation8 + $0x594] sm:$0xf0]  ;;  %v5416_v27 = vld [vmem:[#allocation8 + $0x6c] sm:$0xf] }
 0x199   : > { %v4895_v28 = vor.u32 %v5582_v59, %v4894_v23  ;;  %v5602_v15 = vld [vmem:[#allocation8 + $0x634] sm:$0xf0]  ;;  %v4830_v23 = vld [vmem:[#allocation8 + $0x508] sm:$0xf] }
 0x19a   : > { %3250 = vmatpush.bf16.msra.mxu3 %v4591_v46  ;;  %3220 = vmatpush.bf16.msrb.mxu1 %v4367_v32  ;;  %v5590_v46 = vld [vmem:[#allocation8 + $0x5d4] sm:$0xf0]  ;;  %v5424_v32 = vld [vmem:[#allocation8 + $0xac] sm:$0xf] }
 0x19b   : > { %v4927_v39 = vor.u32 %v5590_v46, %v4926_v7  ;;  %v4275_v3 = vor.u32 %v5424_v32, %v4272_v22  ;;  %v5578_v18 = vld [vmem:[#allocation8 + $0x574] sm:$0xf0]  ;;  %v5492_v32 = vld [vmem:[#allocation8 + $0x2cc] sm:$0xf] }
 0x19c   : > { %3262 = vmatpush.bf16.msra.mxu0 %v4751_v2  ;;  %3237 = vmatpush.bf16.msra.mxu2 %v4447_v47  ;;  %v5150_v2 = vld [vmem:[#allocation8 + $0x788] sm:$0xf]  ;;  %v5007_v47 = vor.u32 %v5610_v10, %v5006_v21  ;;  %v5598_v12 = vld [vmem:[#allocation8 + $0x614] sm:$0xf0]  ;;  %v4544_v21 = vld [vmem:[#allocation8 + $0x2d8] sm:$0xf0] }
 0x19d   : > { %v5151_v24 = vor.u32 %v5646_v62, %v5150_v2  ;;  %v5574_v2 = vld [vmem:[#allocation8 + $0x554] sm:$0xf0]  ;;  %v4959_v62 = vor.u32 %v5598_v12, %v4958_v53  ;;  %v4672_v10 = vld [vmem:[#allocation8 + $0x3d8] sm:$0xf0] }
 0x19e   : > { %3251 = vmatpush.bf16.msra.mxu3 %v4575_v35  ;;  %3221 = vmatpush.bf16.msrb.mxu1 %v4351_v42  ;;  %v5135_v35 = vor.u32 %v5642_v37, %v5134_v48  ;;  %v5118_v42 = vld [vmem:[#allocation8 + $0x748] sm:$0xf]  ;;  %v4863_v22 = vor.u32 %v5574_v2, %v4862_v63  ;;  %v5570_v37 = vld [vmem:[#allocation8 + $0x534] sm:$0xf0]  ;;  %v4400_v63 = vld [vmem:[#allocation8 + $0x1b8] sm:$0xf0] }
 0x19f   : > { %3238 = vmatmul.bf16.vlgmr.msra.gmra.mxu2 %v6663_v33  ;;  %v4846_v48 = vld [vmem:[#allocation8 + $0x528] sm:$0xf]  ;;  %v5566_v59 = vld [vmem:[#allocation8 + $0x514] sm:$0xf0] }
 0x1a0   : > { %3263 = vmatpush.bf16.msra.mxu0 %v4735_v40  ;;  %3286 = vmatpush.bf16.msrb.mxu2 %v5071_v6  ;;  %v4910_v40 = vld [vmem:[#allocation8 + $0x5a8] sm:$0xf]  ;;  %v5420_v6 = vld [vmem:[#allocation8 + $0x8c] sm:$0xf]  ;;  %v4847_v11 = vor.u32 %v5570_v37, %v4846_v48 }
 0x1a1   : > { %3252 = vmatmul.bf16.vlgmr.msra.gmra.mxu3 %v6669_v14  ;;  %v4911_v36 = vor.u32 %v5586_v51, %v4910_v40  ;;  %v5404_v51 = vld [vmem:[#allocation8 + $0xc] sm:$0xf] }
 0x1a2   : > { %3300 = vmatpush.bf16.msrb.mxu3 %v5199_v54  ;;  %3222 = vmatpush.bf16.msrb.mxu1 %v4335_v9  ;;  %v4256_v54 = vld [vmem:[#allocation8 + $0x98] sm:$0xf0]  ;;  %v5634_v9 = vld [vmem:[#allocation8 + $0x734] sm:$0xf0] }
 0x1a3   : > { %v4259_v8 = vor.u32 %v5420_v6, %v4256_v54  ;;  %v5103_v52 = vor.u32 %v5634_v9, %v5102_v1  ;;  %v5560_v6 = vld [vmem:[#allocation8 + $0x4ec] sm:$0xf]  ;;  %v4816_v54 = vld [vmem:[#allocation8 + $0x4f8] sm:$0xf0] }
 0x1a4   : > { %3264 = vmatpush.bf16.msra.mxu0 %v4719_v25  ;;  %3287 = vmatpush.bf16.msrb.mxu2 %v5055_v30  ;;  %v5119_v25 = vor.u32 %v5638_v5, %v5118_v42  ;;  %v4240_v30 = vld [vmem:[#allocation8 + $0x78] sm:$0xf0]  ;;  %v5520_v42 = vld [vmem:[#allocation8 + $0x3ac] sm:$0xf] }
 0x1a5   : > { %v4243_v56 = vor.u32 %v5416_v27, %v4240_v30  ;;  %v4656_v5 = vld [vmem:[#allocation8 + $0x3b8] sm:$0xf0]  ;;  %v4819_v27 = vor.u32 %v5560_v6, %v4816_v54  ;;  %v5484_v9 = vld [vmem:[#allocation8 + $0x28c] sm:$0xf] }
 0x1a6   : > { %3301 = vmatpush.bf16.msrb.mxu3 %v5183_v44  ;;  %3223 = vmatpush.bf16.msrb.mxu1 %v4319_v34  ;;  %v4974_v44 = vld [vmem:[#allocation8 + $0x628] sm:$0xf]  ;;  %v5496_v34 = vld [vmem:[#allocation8 + $0x2ec] sm:$0xf]  ;;  %v4800_v1 = vld [vmem:[#allocation8 + $0x4d8] sm:$0xf0] }
 0x1a7   : > { %v4975_v0 = vor.u32 %v5602_v15, %v4974_v44  ;;  %v4563_v46 = vor.u32 %v5496_v34, %v4560_v16  ;;  %v4659_v44 = vor.u32 %v5520_v42, %v4656_v5  ;;  %v5556_v15 = vld [vmem:[#allocation8 + $0x4cc] sm:$0xf]  ;;  %v4496_v16 = vld [vmem:[#allocation8 + $0x278] sm:$0xf0] }
 0x1a8   : > { %3265 = vmatpush.bf16.msra.mxu0 %v4703_v4  ;;  %3288 = vmatpush.bf16.msrb.mxu2 %v5039_v60  ;;  %v4224_v4 = vld [vmem:[#allocation8 + $0x58] sm:$0xf0]  ;;  %v5086_v60 = vld [vmem:[#allocation8 + $0x708] sm:$0xf]  ;;  %v5504_v54 = vld [vmem:[#allocation8 + $0x32c] sm:$0xf] }
 0x1a9   : > { %3224 = vmatmul.bf16.vlgmr.msrb.gmra.mxu1 %v6697_v20  ;;  %v4464_v6 = vld [vmem:[#allocation8 + $0x238] sm:$0xf0]  ;;  %v5448_v42 = vld [vmem:[#allocation8 + $0x16c] sm:$0xf] }
 0x1aa   : > { %3302 = vmatpush.bf16.msrb.mxu3 %v5167_v19  ;;  %3272 = vmatpush.bf16.msra.mxu1 %v4943_v57  ;;  %v5630_v19 = vld [vmem:[#allocation8 + $0x714] sm:$0xf0]  ;;  %v4227_v57 = vor.u32 %v5412_v45, %v4224_v4  ;;  %v4640_v45 = vld [vmem:[#allocation8 + $0x398] sm:$0xf0]  ;;  %v4803_v4 = vor.u32 %v5556_v15, %v4800_v1  ;;  %v5500_v15 = vld [vmem:[#allocation8 + $0x30c] sm:$0xf] }
 0x1ab   : > { %3266 = vmatmul.bf16.vlgmr.msra.gmra.mxu0 %v6654_v26  ;;  %v5087_v7 = vor.u32 %v5630_v19, %v5086_v60  ;;  %v4784_v60 = vld [vmem:[#allocation8 + $0x4b8] sm:$0xf0]  ;;  %v5480_v19 = vld [vmem:[#allocation8 + $0x26c] sm:$0xf] }
 0x1ac   : > { %3314 = vmatpush.bf16.msrb.mxu0 %v4307_v13  ;;  %3289 = vmatpush.bf16.msrb.mxu2 %v5023_v41  ;;  %v4879_v13 = vor.u32 %v5578_v18, %v4878_v43  ;;  %v5408_v41 = vld [vmem:[#allocation8 + $0x2c] sm:$0xf]  ;;  %v4512_v18 = vld [vmem:[#allocation8 + $0x298] sm:$0xf0] }
 0x1ad   : > { %v4515_v53 = vor.u32 %v5484_v9, %v4512_v18  ;;  %v4368_v5 = vld [vmem:[#allocation8 + $0x178] sm:$0xf0]  ;;  %v5624_v9 = vld [vmem:[#allocation8 + $0x6ec] sm:$0xf] }
 0x1ae   : > { %3303 = vmatpush.bf16.msrb.mxu3 %v5151_v24  ;;  %3273 = vmatpush.bf16.msra.mxu1 %v4927_v39  ;;  %v4208_v24 = vld [vmem:[#allocation8 + $0x38] sm:$0xf0]  ;;  %v5524_v39 = vld [vmem:[#allocation8 + $0x3cc] sm:$0xf] }
 0x1af   : > { %v4211_v40 = vor.u32 %v5408_v41, %v4208_v24  ;;  %v5476_v41 = vld [vmem:[#allocation8 + $0x24c] sm:$0xf]  ;;  %v4480_v24 = vld [vmem:[#allocation8 + $0x258] sm:$0xf0] }
 0x1b0   : > { %3315 = vmatpush.bf16.msrb.mxu0 %v4291_v61  ;;  %3290 = vmatpush.bf16.msrb.mxu2 %v5007_v47  ;;  %v4691_v61 = vor.u32 %v5528_v31, %v4688_v38  ;;  %v4675_v47 = vor.u32 %v5524_v39, %v4672_v10  ;;  %v5512_v31 = vld [vmem:[#allocation8 + $0x36c] sm:$0xf]  ;;  %v4624_v38 = vld [vmem:[#allocation8 + $0x378] sm:$0xf0]  ;;  %v4483_v37 = vor.u32 %v5476_v41, %v4480_v24  ;;  %v6750_v41 = vld [vmem:[#allocation10] sm:$0xf] }
 0x1b1   : > { %v5452_v39 = vld [vmem:[#allocation8 + $0x18c] sm:$0xf]  ;;  %v4384_v10 = vld [vmem:[#allocation8 + $0x198] sm:$0xf0] }
 0x1b2   : > { %3304 = vmatpush.bf16.msrb.mxu3 %v5135_v35  ;;  %3274 = vmatpush.bf16.msra.mxu1 %v4911_v36  ;;  %v4192_v35 = vld [vmem:[#allocation8 + $0x18] sm:$0xf0]  ;;  %v5488_v36 = vld [vmem:[#allocation8 + $0x2ac] sm:$0xf] }
 0x1b3   : > { %v4531_v30 = vor.u32 %v5488_v36, %v4528_v29  ;;  %v4576_v1 = vld [vmem:[#allocation8 + $0x318] sm:$0xf0]  ;;  %v5656_v18 = vld [vmem:[#allocation8 + $0x7ec] sm:$0xf] }
 0x1b4   : > { %3316 = vmatpush.bf16.msrb.mxu0 %v4275_v3  ;;  %3291 = vmatpush.bf16.msrb.mxu2 %v4991_v58  ;;  %v4547_v3 = vor.u32 %v5492_v32, %v4544_v21  ;;  %v5464_v58 = vld [vmem:[#allocation8 + $0x1ec] sm:$0xf]  ;;  %v6740_v21 = vpop.f32.mrf.mxu0 }
 0x1b5   : > { %v5508_v32 = vld [vmem:[#allocation8 + $0x34c] sm:$0xf] }
 0x1b6   : > { %3305 = vmatpush.bf16.msrb.mxu3 %v5119_v25  ;;  %3275 = vmatpush.bf16.msra.mxu1 %v4895_v28  ;;  %v4432_v25 = vld [vmem:[#allocation8 + $0x1f8] sm:$0xf0]  ;;  %v4831_v28 = vor.u32 %v5566_v59, %v4830_v23  ;;  %v5540_v59 = vld [vmem:[#allocation8 + $0x44c] sm:$0xf] }
 0x1b7   : > { %v4435_v43 = vor.u32 %v5464_v58, %v4432_v25 }
 0x1b8   : > { %3317 = vmatpush.bf16.msrb.mxu0 %v4259_v8  ;;  %3292 = vmatpush.bf16.msrb.mxu2 %v4975_v0  ;;  %v4195_v8 = vor.u32 %v5404_v51, %v4192_v35  ;;  %v5460_v0 = vld [vmem:[#allocation8 + $0x1cc] sm:$0xf]  ;;  %v4387_v35 = vor.u32 %v5452_v39, %v4384_v10 }
 0x1b9   : > { %v5544_v51 = vld [vmem:[#allocation8 + $0x46c] sm:$0xf] }
 0x1ba   : > { %3306 = vmatpush.bf16.msrb.mxu3 %v5103_v52  ;;  %3276 = vmatpush.bf16.msra.mxu1 %v4879_v13  ;;  %v4416_v52 = vld [vmem:[#allocation8 + $0x1d8] sm:$0xf0]  ;;  %v5552_v13 = vld [vmem:[#allocation8 + $0x4ac] sm:$0xf] }
 0x1bb   : > { %v4419_v34 = vor.u32 %v5460_v0, %v4416_v52  ;;  %v4787_v2 = vor.u32 %v5552_v13, %v4784_v60  ;;  %v5444_v0 = vld [vmem:[#allocation8 + $0x14c] sm:$0xf]  ;;  %v4352_v52 = vld [vmem:[#allocation8 + $0x158] sm:$0xf0] }
 0x1bc   : > { %3318 = vmatpush.bf16.msrb.mxu0 %v4243_v56  ;;  %3293 = vmatpush.bf16.msrb.mxu2 %v4959_v62  ;;  %v5516_v56 = vld [vmem:[#allocation8 + $0x38c] sm:$0xf]  ;;  %v4499_v62 = vor.u32 %v5480_v19, %v4496_v16 }
 0x1bd   : > { %v4643_v12 = vor.u32 %v5516_v56, %v4640_v45  ;;  %v5200_v56 = vld [vmem:[#allocation8 + $0x7f8] sm:$0xf0]  ;;  %v5536_v19 = vld [vmem:[#allocation8 + $0x42c] sm:$0xf] }
 0x1be   : > { %3307 = vmatpush.bf16.msrb.mxu3 %v5087_v7  ;;  %3277 = vmatpush.bf16.msra.mxu1 %v4863_v22  ;;  %v4627_v7 = vor.u32 %v5512_v31, %v4624_v38  ;;  %v4608_v22 = vld [vmem:[#allocation8 + $0x358] sm:$0xf0]  ;;  %v5203_v60 = vor.u32 %v5656_v18, %v5200_v56  ;;  %v5620_v16 = vld [vmem:[#allocation8 + $0x6cc] sm:$0xf]  ;;  %v4355_v31 = vor.u32 %v5444_v0, %v4352_v52 }
 0x1bf   : > { %3294 = vmatmul.bf16.vlgmr.msrb.gmra.mxu2 %v6707_v55  ;;  %v5056_v38 = vld [vmem:[#allocation8 + $0x6d8] sm:$0xf0]  ;;  %v5608_v52 = vld [vmem:[#allocation8 + $0x66c] sm:$0xf] }
 0x1c0   : > { %3319 = vmatpush.bf16.msrb.mxu0 %v4227_v57  ;;  %3342 = vmatpush.bf16.msra.mxu2 %v4563_v46  ;;  %v5456_v57 = vld [vmem:[#allocation8 + $0x1ac] sm:$0xf] }
 0x1c1   : > { %3308 = vmatmul.bf16.vlgmr.msrb.gmra.mxu3 %v6709_v50  ;;  %v5548_v46 = vld [vmem:[#allocation8 + $0x48c] sm:$0xf] }
 0x1c2   : > { %3356 = vmatpush.bf16.msra.mxu3 %v4691_v61  ;;  %3278 = vmatpush.bf16.msra.mxu1 %v4847_v11  ;;  %v4768_v61 = vld [vmem:[#allocation8 + $0x498] sm:$0xf0]  ;;  %v6742_v36 = vpop.f32.mrf.mxu2 }
 0x1c3   : > { %v4771_v48 = vor.u32 %v5548_v46, %v4768_v61  ;;  %v4592_v11 = vld [vmem:[#allocation8 + $0x338] sm:$0xf0] }
 0x1c4   : > { %3320 = vmatpush.bf16.msrb.mxu0 %v4211_v40  ;;  %3343 = vmatpush.bf16.msra.mxu2 %v4547_v3  ;;  %v4611_v40 = vor.u32 %v5508_v32, %v4608_v22  ;;  %v4752_v3 = vld [vmem:[#allocation8 + $0x478] sm:$0xf0]  ;;  %v4595_v25 = vor.u32 %v5504_v54, %v4592_v11  ;;  %v5532_v32 = vld [vmem:[#allocation8 + $0x40c] sm:$0xf]  ;;  %v1690_v11 = vperm.slane %v6750_v41, 0 }
 0x1c5   : > { %v4755_v23 = vor.u32 %v5544_v51, %v4752_v3  ;;  %v4704_v22 = vld [vmem:[#allocation8 + $0x418] sm:$0xf0]  ;;  %v5436_v3 = vld [vmem:[#allocation8 + $0x10c] sm:$0xf] }
 0x1c6   : > { %3357 = vmatpush.bf16.msra.mxu3 %v4675_v47  ;;  %3279 = vmatpush.bf16.msra.mxu1 %v4831_v28  ;;  %v5472_v47 = vld [vmem:[#allocation8 + $0x22c] sm:$0xf]  ;;  %v6744_v29 = vpop.f32.mrf.mxu1  ;;  %v4371_v28 = vor.u32 %v5448_v42, %v4368_v5  ;;  %v5168_v51 = vld [vmem:[#allocation8 + $0x7b8] sm:$0xf0] }
 0x1c7   : > { %v4467_v58 = vor.u32 %v5472_v47, %v4464_v6  ;;  %v4320_v47 = vld [vmem:[#allocation8 + $0x118] sm:$0xf0]  ;;  %v5592_v6 = vld [vmem:[#allocation8 + $0x5ec] sm:$0xf] }
 0x1c8   : > { %3321 = vmatpush.bf16.msrb.mxu0 %v4195_v8  ;;  %3344 = vmatpush.bf16.msra.mxu2 %v4531_v30  ;;  %v6746_v8 = vpop.f32.mrf.mxu3  ;;  %v5468_v30 = vld [vmem:[#allocation8 + $0x20c] sm:$0xf]  ;;  %v4944_v54 = vld [vmem:[#allocation8 + $0x5f8] sm:$0xf0] }
 0x1c9   : > { %3280 = vmatmul.bf16.vlgmr.msra.gmra.mxu1 %v6721_v49  ;;  %v5666_v42 = vld [vmem:[#allocation11 + $0x38] sm:$0xff] }
 0x1ca   : > { %3358 = vmatpush.bf16.msra.mxu3 %v4659_v44  ;;  %3328 = vmatpush.bf16.msrb.mxu1 %v4435_v43  ;;  %v4448_v44 = vld [vmem:[#allocation8 + $0x218] sm:$0xf0] }
 0x1cb   : > { %3322 = vmatmul.bf16.vlgmr.msrb.gmra.mxu0 %v6622_v17  ;;  %v4403_v17 = vor.u32 %v5456_v57, %v4400_v63  ;;  %v5072_v43 = vld [vmem:[#allocation8 + $0x6f8] sm:$0xf0]  ;;  %v5652_v57 = vld [vmem:[#allocation8 + $0x7cc] sm:$0xf] }
 0x1cc   : > { %3370 = vmatpush.bf16.msra.mxu0 %v4819_v27  ;;  %3345 = vmatpush.bf16.msra.mxu2 %v4515_v53  ;;  %v4736_v27 = vld [vmem:[#allocation8 + $0x458] sm:$0xf0]  ;;  %v4451_v53 = vor.u32 %v5468_v30, %v4448_v44  ;;  %v5075_v13 = vor.u32 %v5624_v9, %v5072_v43  ;;  %v5644_v30 = vld [vmem:[#allocation8 + $0x78c] sm:$0xf]  ;;  %v5665_v43 = vld [vmem:[#allocation11 + $0x30] sm:$0xff] }
 0x1cd   : > { %v4739_v45 = vor.u32 %v5540_v59, %v4736_v27  ;;  %v5184_v63 = vld [vmem:[#allocation8 + $0x7d8] sm:$0xf0] }
 0x1ce   : > { %3359 = vmatpush.bf16.msra.mxu3 %v4643_v12  ;;  %3329 = vmatpush.bf16.msrb.mxu1 %v4419_v34  ;;  %v4579_v12 = vor.u32 %v5500_v15, %v4576_v1  ;;  %v4720_v34 = vld [vmem:[#allocation8 + $0x438] sm:$0xf0]  ;;  %v3003_v46 = vpop.f32.mrf.mxu1  ;;  %v5187_v24 = vor.u32 %v5652_v57, %v5184_v63  ;;  %v2988_v1 = vadd.f32 %v6740_v21, %v1690_v11 }
 0x1cf   : > { %v4723_v61 = vor.u32 %v5536_v19, %v4720_v34  ;;  %v5024_v27 = vld [vmem:[#allocation8 + $0x698] sm:$0xf0]  ;;  %v5584_v19 = vld [vmem:[#allocation8 + $0x5ac] sm:$0xf] }
 0x1d0   : > { %3371 = vmatpush.bf16.msra.mxu0 %v4803_v4  ;;  %3346 = vmatpush.bf16.msra.mxu2 %v4499_v62  ;;  %v2989_v4 = vpop.f32.mrf.mxu0  ;;  %v4336_v62 = vld [vmem:[#allocation8 + $0x138] sm:$0xf0]  ;;  %v6752_v39 = vpop.f32.mrf.mxu3 }
 0x1d1   : > { %v5152_v44 = vld [vmem:[#allocation8 + $0x798] sm:$0xf0] }
 0x1d2   : > { %3360 = vmatpush.bf16.msra.mxu3 %v4627_v7  ;;  %3330 = vmatpush.bf16.msrb.mxu1 %v4403_v17  ;;  %v6748_v7 = vpop.f32.mrf.mxu2  ;;  %v5059_v17 = vor.u32 %v5620_v16, %v5056_v38  ;;  %v4928_v15 = vld [vmem:[#allocation8 + $0x5d8] sm:$0xf0]  ;;  %v5155_v0 = vor.u32 %v5644_v30, %v5152_v44  ;;  %v5572_v30 = vld [vmem:[#allocation8 + $0x54c] sm:$0xf] }
 0x1d3   : > { %v5008_v21 = vld [vmem:[#allocation8 + $0x678] sm:$0xf0] }
 0x1d4   : > { %3372 = vmatpush.bf16.msra.mxu0 %v4787_v2  ;;  %3347 = vmatpush.bf16.msra.mxu2 %v4483_v37  ;;  %v5440_v2 = vld [vmem:[#allocation8 + $0x12c] sm:$0xf]  ;;  %v5040_v37 = vld [vmem:[#allocation8 + $0x6b8] sm:$0xf0] }
 0x1d5   : > { %v4339_v10 = vor.u32 %v5440_v2, %v4336_v62  ;;  %v4912_v34 = vld [vmem:[#allocation8 + $0x5b8] sm:$0xf0]  ;;  %v5636_v62 = vld [vmem:[#allocation8 + $0x74c] sm:$0xf] }
 0x1d6   : > { %3361 = vmatpush.bf16.msra.mxu3 %v4611_v40  ;;  %3331 = vmatpush.bf16.msrb.mxu1 %v4387_v35  ;;  %v5648_v40 = vld [vmem:[#allocation8 + $0x7ac] sm:$0xf]  ;;  %v4707_v35 = vor.u32 %v5532_v32, %v4704_v22  ;;  %v6762_v56 = vpop.f32.mrf.mxu1  ;;  %v4915_v63 = vor.u32 %v5584_v19, %v4912_v34  ;;  %v4992_v2 = vld [vmem:[#allocation8 + $0x658] sm:$0xf0] }
 0x1d7   : > { %v5171_v59 = vor.u32 %v5648_v40, %v5168_v51  ;;  %v5632_v40 = vld [vmem:[#allocation8 + $0x72c] sm:$0xf]  ;;  %v5104_v51 = vld [vmem:[#allocation8 + $0x738] sm:$0xf0] }
 0x1d8   : > { %3373 = vmatpush.bf16.msra.mxu0 %v4771_v48  ;;  %3348 = vmatpush.bf16.msra.mxu2 %v4467_v58  ;;  %v5616_v48 = vld [vmem:[#allocation8 + $0x6ac] sm:$0xf]  ;;  %v4864_v44 = vld [vmem:[#allocation8 + $0x558] sm:$0xf0] }
 0x1d9   : > { %v5043_v5 = vor.u32 %v5616_v48, %v5040_v37  ;;  %v5612_v58 = vld [vmem:[#allocation8 + $0x68c] sm:$0xf]  ;;  %v4976_v37 = vld [vmem:[#allocation8 + $0x638] sm:$0xf0] }
 0x1da   : > { %3362 = vmatpush.bf16.msra.mxu3 %v4595_v25  ;;  %3332 = vmatpush.bf16.msrb.mxu1 %v4371_v28  ;;  %v4947_v25 = vor.u32 %v5592_v6, %v4944_v54  ;;  %v5588_v28 = vld [vmem:[#allocation8 + $0x5cc] sm:$0xf]  ;;  %v6760_v18 = vpop.f32.mrf.mxu2  ;;  %v4880_v6 = vld [vmem:[#allocation8 + $0x578] sm:$0xf0] }
 0x1db   : > { %v5564_v34 = vld [vmem:[#allocation8 + $0x50c] sm:$0xf] }
 0x1dc   : > { %3374 = vmatpush.bf16.msra.mxu0 %v4755_v23  ;;  %3349 = vmatpush.bf16.msra.mxu2 %v4451_v53  ;;  %v6757_v23 = vpop.f32.mrf.mxu0  ;;  %v4931_v53 = vor.u32 %v5588_v28, %v4928_v15  ;;  %v5661_v15 = vld [vmem:[#allocation11 + $0x10] sm:$0xff] }
 0x1de   : > { %3363 = vmatpush.bf16.msra.mxu3 %v4579_v12  ;;  %3333 = vmatpush.bf16.msrb.mxu1 %v4355_v31  ;;  %v5640_v12 = vld [vmem:[#allocation8 + $0x76c] sm:$0xf] }
 0x1df   : > { %3350 = vmatmul.bf16.vlgmr.msra.gmra.mxu2 %v6663_v33  ;;  %v4323_v33 = vor.u32 %v5436_v3, %v4320_v47  ;;  %v5664_v31 = vld [vmem:[#allocation11 + $0x28] sm:$0xff]  ;;  %v3059_v47 = vpop.f32.mrf.mxu1 }
 0x1e0   : > { %3375 = vmatpush.bf16.msra.mxu0 %v4739_v45  ;;  %3398 = vmatpush.bf16.msrb.mxu2 %v5075_v13  ;;  %v5027_v45 = vor.u32 %v5612_v58, %v5024_v27  ;;  %v5136_v13 = vld [vmem:[#allocation8 + $0x778] sm:$0xf0] }
 0x1e1   : > { %3364 = vmatmul.bf16.vlgmr.msra.gmra.mxu3 %v6669_v14  ;;  %v2990_v14 = vadd.f32 %v2989_v4, %v1690_v11  ;;  %v3002_v4 = vadd.f32 %v6744_v29, %v2988_v1  ;;  %v5011_v29 = vor.u32 %v5608_v52, %v5008_v21  ;;  %v5139_v38 = vor.u32 %v5640_v12, %v5136_v13  ;;  %v5088_v27 = vld [vmem:[#allocation8 + $0x718] sm:$0xf0] }
 0x1e2   : > { %3412 = vmatpush.bf16.msrb.mxu3 %v5203_v60  ;;  %3334 = vmatpush.bf16.msrb.mxu1 %v4339_v10  ;;  %v6766_v60 = vpop.f32.mrf.mxu3  ;;  %v5600_v10 = vld [vmem:[#allocation8 + $0x62c] sm:$0xf]  ;;  %v3073_v3 = vpop.f32.mrf.mxu2  ;;  %v4848_v52 = vld [vmem:[#allocation8 + $0x538] sm:$0xf0] }
 0x1e3   : > { %v3004_v9 = vadd.f32 %v3003_v46, %v2990_v14  ;;  %v3016_v57 = vadd.f32 %v6742_v36, %v3002_v4  ;;  %v5120_v46 = vld [vmem:[#allocation8 + $0x758] sm:$0xf0] }
 0x1e4   : > { %3376 = vmatpush.bf16.msra.mxu0 %v4723_v61  ;;  %3399 = vmatpush.bf16.msrb.mxu2 %v5059_v17  ;;  %v3045_v61 = vpop.f32.mrf.mxu0  ;;  %v5580_v17 = vld [vmem:[#allocation8 + $0x58c] sm:$0xf]  ;;  %v5123_v22 = vor.u32 %v5636_v62, %v5120_v46  ;;  %v4960_v14 = vld [vmem:[#allocation8 + $0x618] sm:$0xf0] }
 0x1e5   : > { %v3018_v16 = vadd.f32 %v6748_v7, %v3004_v9  ;;  %v3030_v48 = vadd.f32 %v6746_v8, %v3016_v57 }
 0x1e6   : > { %3413 = vmatpush.bf16.msrb.mxu3 %v5187_v24  ;;  %3335 = vmatpush.bf16.msrb.mxu1 %v4323_v33  ;;  %v4896_v24 = vld [vmem:[#allocation8 + $0x598] sm:$0xf0] }
 0x1e7   : > { %v3032_v7 = vadd.f32 %v6752_v39, %v3018_v16  ;;  %v4899_v36 = vor.u32 %v5580_v17, %v4896_v24  ;;  %v5662_v39 = vld [vmem:[#allocation11 + $0x18] sm:$0xff]  ;;  %v3044_v8 = vadd.f32 %v6757_v23, %v3030_v48  ;;  %v4867_v23 = vor.u32 %v5572_v30, %v4864_v44  ;;  %v3113_v21 = vpop.f32.mrf.mxu1 }
 0x1e8   : > { %3377 = vmatpush.bf16.msra.mxu0 %v4707_v35  ;;  %3400 = vmatpush.bf16.msrb.mxu2 %v5043_v5  ;;  %v5576_v35 = vld [vmem:[#allocation8 + $0x56c] sm:$0xf]  ;;  %v5107_v5 = vor.u32 %v5632_v40, %v5104_v51  ;;  %v4832_v16 = vld [vmem:[#allocation8 + $0x518] sm:$0xf0]  ;;  %v5671_v40 = vld [vmem:[#allocation11 + $0x60] sm:$0xff] }
 0x1e9   : > { %3336 = vmatmul.bf16.vlgmr.msrb.gmra.mxu1 %v6697_v20  ;;  %v5663_v20 = vld [vmem:[#allocation11 + $0x20] sm:$0xff]  ;;  %v3046_v54 = vadd.f32 %v3045_v61, %v3032_v7  ;;  %v4883_v58 = vor.u32 %v5576_v35, %v4880_v6  ;;  %v3058_v28 = vadd.f32 %v6762_v56, %v3044_v8  ;;  %v5660_v56 = vld [vmem:[#allocation11 + $0x8] sm:$0xff]  ;;  %v5670_v35 = vld [vmem:[#allocation11 + $0x58] sm:$0xff] }
 0x1ea   : > { %3414 = vmatpush.bf16.msrb.mxu3 %v5171_v59  ;;  %3384 = vmatpush.bf16.msra.mxu1 %v4947_v25  ;;  %v3087_v11 = vpop.f32.mrf.mxu3  ;;  %v5596_v59 = vld [vmem:[#allocation8 + $0x60c] sm:$0xf] }
 0x1eb   : > { %3378 = vmatmul.bf16.vlgmr.msra.gmra.mxu0 %v6654_v26  ;;  %v5604_v26 = vld [vmem:[#allocation8 + $0x64c] sm:$0xf]  ;;  %v3060_v33 = vadd.f32 %v3059_v47, %v3046_v54  ;;  %v4963_v9 = vor.u32 %v5596_v59, %v4960_v14  ;;  %v3072_v4 = vadd.f32 %v6760_v18, %v3058_v28  ;;  %v5659_v18 = vld [vmem:[#allocation11] sm:$0xff]  ;;  %v5682_v59 = vld [vmem:[#allocation11 + $0xb8] sm:$0xff] }
 0x1ec   : > { %3698 = vmatpush.bf16.msrb.mxu0 %v5666_v42  ;;  %3401 = vmatpush.bf16.msrb.mxu2 %v5027_v45  ;;  %v4995_v32 = vor.u32 %v5604_v26, %v4992_v2  ;;  %v4979_v42 = vor.u32 %v5600_v10, %v4976_v37  ;;  %v5628_v25 = vld [vmem:[#allocation8 + $0x70c] sm:$0xf]  ;;  %v3099_v1 = vpop.f32.mrf.mxu0  ;;  %v4835_v26 = vor.u32 %v5564_v34, %v4832_v16  ;;  %v5667_v28 = vld [vmem:[#allocation11 + $0x40] sm:$0xff] }
 0x1ed   : > { %v3074_v45 = vadd.f32 %v3073_v3, %v3060_v33 }
 0x1ee   : > { %3415 = vmatpush.bf16.msrb.mxu3 %v5155_v0  ;;  %3385 = vmatpush.bf16.msra.mxu1 %v4931_v53  ;;  %v5568_v0 = vld [vmem:[#allocation8 + $0x52c] sm:$0xf]  ;;  %v3127_v53 = vpop.f32.mrf.mxu2 }
 0x1ef   : > { %v3088_v12 = vadd.f32 %v3087_v11, %v3074_v45  ;;  %v4851_v13 = vor.u32 %v5568_v0, %v4848_v52  ;;  %v3115_v24 = vpop.f32.mrf.mxu1  ;;  %v5669_v11 = vld [vmem:[#allocation11 + $0x50] sm:$0xff]  ;;  %v5678_v45 = vld [vmem:[#allocation11 + $0x98] sm:$0xff]  ;;  %v5676_v52 = vld [vmem:[#allocation11 + $0x88] sm:$0xff] }
 0x1f0   : > { %3699 = vmatpush.bf16.msrb.mxu0 %v5665_v43  ;;  %3402 = vmatpush.bf16.msrb.mxu2 %v5011_v29  ;;  %v5091_v43 = vor.u32 %v5628_v25, %v5088_v27  ;;  %v3086_v29 = vadd.f32 %v6766_v60, %v3072_v4  ;;  %v5673_v60 = vld [vmem:[#allocation11 + $0x70] sm:$0xff]  ;;  %v5668_v25 = vld [vmem:[#allocation11 + $0x48] sm:$0xff] }
 0x1f2   : > { %3416 = vmatpush.bf16.msrb.mxu3 %v5139_v38  ;;  %3386 = vmatpush.bf16.msra.mxu1 %v4915_v63  ;;  %v3141_v19 = vpop.f32.mrf.mxu3  ;;  %v3430_v38 = vmax.f32 %v3088_v12, 0.0  ;;  %v5674_v63 = vld [vmem:[#allocation11 + $0x78] sm:$0xff]  ;;  %v3426_v62 = vmax.f32 %v3086_v29, 0.0  ;;  %v5675_v12 = vld [vmem:[#allocation11 + $0x80] sm:$0xff] }
 0x1f4   : > { %3700 = vmatpush.bf16.msrb.mxu0 %v5664_v31  ;;  %3403 = vmatpush.bf16.msrb.mxu2 %v4995_v32  ;;  %v1691_v31 = vperm.slane %v6750_v41, 1  ;;  %v3101_v57 = vpop.f32.mrf.mxu0  ;;  %v3434_v46 = vpack.c.bf16 %v3430_v38, %v3426_v62 }
 0x1f6   : > { %3417 = vmatpush.bf16.msrb.mxu3 %v5123_v22  ;;  %3387 = vmatpush.bf16.msra.mxu1 %v4899_v36  ;;  %v3100_v2 = vadd.f32 %v3099_v1, %v1691_v31  ;;  %v3129_v17 = vpop.f32.mrf.mxu2  ;;  %v5672_v22 = vld [vmem:[#allocation11 + $0x68] sm:$0xff] }
 0x1f8   : > { %3701 = vmatpush.bf16.msrb.mxu0 %v5663_v20  ;;  %3404 = vmatpush.bf16.msrb.mxu2 %v4979_v42  ;;  %v3114_v61 = vadd.f32 %v3113_v21, %v3100_v2  ;;  %v1692_v21 = vperm.slane %v6750_v41, 2 }
 0x1fa   : > { %3418 = vmatpush.bf16.msrb.mxu3 %v5107_v5  ;;  %3388 = vmatpush.bf16.msra.mxu1 %v4883_v58  ;;  %v3128_v7 = vadd.f32 %v3127_v53, %v3114_v61  ;;  %v5681_v58 = vld [vmem:[#allocation11 + $0xb0] sm:$0xff] }
 0x1fc   : > { %3702 = vmatpush.bf16.msrb.mxu0 %v5662_v39  ;;  %3405 = vmatpush.bf16.msrb.mxu2 %v4963_v9  ;;  %v3155_v32 = vpop.f32.mrf.mxu0  ;;  %v3142_v48 = vadd.f32 %v3141_v19, %v3128_v7  ;;  %v5680_v9 = vld [vmem:[#allocation11 + $0xa8] sm:$0xff] }
 0x1fe   : > { %3419 = vmatpush.bf16.msrb.mxu3 %v5091_v43  ;;  %3389 = vmatpush.bf16.msra.mxu1 %v4867_v23  ;;  %v3156_v3 = vadd.f32 %v3155_v32, %v3142_v48  ;;  %v5679_v43 = vld [vmem:[#allocation11 + $0xa0] sm:$0xff]  ;;  %v5677_v23 = vld [vmem:[#allocation11 + $0x90] sm:$0xff] }
 0x1ff   : > { %3406 = vmatmul.bf16.vlgmr.msrb.gmra.mxu2 %v6707_v55  ;;  %v3102_v55 = vadd.f32 %v3101_v57, %v1691_v31 }
 0x200   : > { %3703 = vmatpush.bf16.msrb.mxu0 %v5661_v15  ;;  %3726 = vmatpush.bf16.msra.mxu2 %v5682_v59 }
 0x201   : > { %3420 = vmatmul.bf16.vlgmr.msrb.gmra.mxu3 %v6709_v50  ;;  %v3143_v50 = vpop.f32.mrf.mxu3  ;;  %v3116_v20 = vadd.f32 %v3115_v24, %v3102_v55 }
 0x202   : > { %3390 = vmatpush.bf16.msra.mxu1 %v4851_v13  ;;  %v3183_v36 = vpop.f32.mrf.mxu2 }
 0x203   : > { %v3130_v10 = vadd.f32 %v3129_v17, %v3116_v20 }
 0x204   : > { %3704 = vmatpush.bf16.msrb.mxu0 %v5660_v56  ;;  %v3157_v54 = vpop.f32.mrf.mxu0  ;;  %3727 = vmatpush.bf16.msra.mxu2 %v5681_v58  ;;  %v5683_v58 = vld [vmem:[#allocation11 + $0xc0] sm:$0xff] }
 0x205   : > { %v3144_v47 = vadd.f32 %v3143_v50, %v3130_v10 }
 0x206   : > { %3391 = vmatpush.bf16.msra.mxu1 %v4835_v26  ;;  %v3169_v37 = vpop.f32.mrf.mxu1 }
 0x207   : > { %v3170_v6 = vadd.f32 %v3169_v37, %v3156_v3  ;;  %v3158_v39 = vadd.f32 %v3157_v54, %v3144_v47  ;;  %v5689_v37 = vld [vmem:[#allocation11 + $0xf0] sm:$0xff]  ;;  %v5687_v54 = vld [vmem:[#allocation11 + $0xe0] sm:$0xff] }
 0x208   : > { %3705 = vmatpush.bf16.msrb.mxu0 %v5659_v18  ;;  %3728 = vmatpush.bf16.msra.mxu2 %v5680_v9 }
 0x209   : > { %3392 = vmatmul.bf16.vlgmr.msra.gmra.mxu1 %v6721_v49  ;;  %v3197_v51 = vpop.f32.mrf.mxu3  ;;  %v3184_v42 = vadd.f32 %v3183_v36, %v3170_v6  ;;  %v5688_v6 = vld [vmem:[#allocation11 + $0xe8] sm:$0xff] }
 0x20a   : > { %3712 = vmatpush.bf16.msrb.mxu1 %v5674_v63  ;;  %v3185_v8 = vpop.f32.mrf.mxu2 }
 0x20b   : > { %3706 = vmatmul.bf16.vlgmr.msrb.gmra.mxu0 %v3434_v46  ;;  %v3198_v27 = vadd.f32 %v3197_v51, %v3184_v42  ;;  %v5684_v42 = vld [vmem:[#allocation11 + $0xc8] sm:$0xff] }
 0x20c   : > { %3729 = vmatpush.bf16.msra.mxu2 %v5679_v43  ;;  %v3211_v0 = vpop.f32.mrf.mxu0 }
 0x20d   : > { %v3427_v15 = vmax.f32 %v3198_v27, 0.0  ;;  %v3212_v13 = vadd.f32 %v3211_v0, %v1692_v21 }
 0x20e   : > { %3713 = vmatpush.bf16.msrb.mxu1 %v5673_v60  ;;  %v3171_v49 = vpop.f32.mrf.mxu1 }
 0x20f   : > { %v3172_v5 = vadd.f32 %v3171_v49, %v3158_v39  ;;  %v5686_v39 = vld [vmem:[#allocation11 + $0xd8] sm:$0xff]  ;;  %v5685_v49 = vld [vmem:[#allocation11 + $0xd0] sm:$0xff] }
 0x210   : > { %3730 = vmatpush.bf16.msra.mxu2 %v5678_v45 }
 0x211   : > { %v3186_v33 = vadd.f32 %v3185_v8, %v3172_v5  ;;  %v3199_v14 = vpop.f32.mrf.mxu3  ;;  %v1693_v8 = vperm.slane %v6750_v41, 3 }
 0x212   : > { %3714 = vmatpush.bf16.msrb.mxu1 %v5672_v22  ;;  %v5690_v22 = vld [vmem:[#allocation11 + $0xf8] sm:$0xff] }
 0x213   : > { %v3200_v30 = vadd.f32 %v3199_v14, %v3186_v33  ;;  %3740 = vmatpush.bf16.msra.mxu3 %v5690_v22 }
 0x214   : > { %3731 = vmatpush.bf16.msra.mxu2 %v5677_v23  ;;  %v3213_v19 = vpop.f32.mrf.mxu0 }
 0x215   : > { %v3431_v44 = vmax.f32 %v3200_v30, 0.0  ;;  %v3214_v29 = vadd.f32 %v3213_v19, %v1692_v21 }
 0x216   : > { %3715 = vmatpush.bf16.msrb.mxu1 %v5671_v40 }
 0x217   : > { %v3435_v1 = vpack.c.bf16 %v3431_v44, %v3427_v15  ;;  %3741 = vmatpush.bf16.msra.mxu3 %v5689_v37 }
 0x218   : > { %3732 = vmatpush.bf16.msra.mxu2 %v5676_v52 }
 0x21a   : > { %3716 = vmatpush.bf16.msrb.mxu1 %v5670_v35 }
 0x21b   : > { %3742 = vmatpush.bf16.msra.mxu3 %v5688_v6 }
 0x21c   : > { %3733 = vmatpush.bf16.msra.mxu2 %v5675_v12 }
 0x21e   : > { %3717 = vmatpush.bf16.msrb.mxu1 %v5669_v11 }
 0x21f   : > { %3743 = vmatpush.bf16.msra.mxu3 %v5687_v54 }
 0x222   : > { %3718 = vmatpush.bf16.msrb.mxu1 %v5668_v25  ;;  %v3239_v4 = vpop.f32.mrf.mxu2 }
 0x223   : > { %3744 = vmatpush.bf16.msra.mxu3 %v5686_v39 }
 0x224   : > { %v3253_v56 = vpop.f32.mrf.mxu3 }
 0x226   : > { %3719 = vmatpush.bf16.msrb.mxu1 %v5667_v28  ;;  %v3225_v53 = vpop.f32.mrf.mxu1 }
 0x227   : > { %v3226_v34 = vadd.f32 %v3225_v53, %v3212_v13  ;;  %3745 = vmatpush.bf16.msra.mxu3 %v5685_v49 }
 0x228   : > { %v3267_v57 = vpop.f32.mrf.mxu0 }
 0x229   : > { %3720 = vmatmul.bf16.vlgmr.msrb.gmra.mxu1 %v3435_v1  ;;  %v3240_v18 = vadd.f32 %v3239_v4, %v3226_v34 }
 0x22a   : > { %v3241_v16 = vpop.f32.mrf.mxu2 }
 0x22b   : > { %v3254_v63 = vadd.f32 %v3253_v56, %v3240_v18  ;;  %3746 = vmatpush.bf16.msra.mxu3 %v5684_v42 }
 0x22c   : > { %v3255_v38 = vpop.f32.mrf.mxu3 }
 0x22d   : > { %v3268_v61 = vadd.f32 %v3267_v57, %v3254_v63 }
 0x22e   : > { %v3227_v31 = vpop.f32.mrf.mxu1 }
 0x22f   : > { %v3228_v26 = vadd.f32 %v3227_v31, %v3214_v29  ;;  %3747 = vmatpush.bf16.msra.mxu3 %v5683_v58 }
 0x230   : > { %v3269_v55 = vpop.f32.mrf.mxu0 }
 0x231   : > { %v3242_v2 = vadd.f32 %v3241_v16, %v3228_v26 }
 0x233   : > { %v3256_v60 = vadd.f32 %v3255_v38, %v3242_v2  ;;  %v5698_v2 = vld [vmem:[%s6855_s10 + $0x38] sm:$0xff] }
 0x234   : > { %3825 = vmatpush.bf16.msra.mxu0 %v5698_v2 }
 0x235   : > { %v3270_v7 = vadd.f32 %v3269_v55, %v3256_v60  ;;  %v5692_v60 = vld [vmem:[%s6855_s10 + $0x8] sm:$0xff]  ;;  %v5691_v55 = vld [vmem:[%s6855_s10] sm:$0xff] }
 0x242   : > { %v3295_v62 = vpop.f32.mrf.mxu2 }
 0x244   : > { %v3309_v17 = vpop.f32.mrf.mxu3 }
 0x246   : > { %v3281_v46 = vpop.f32.mrf.mxu1 }
 0x247   : > { %v3282_v24 = vadd.f32 %v3281_v46, %v3268_v61  ;;  %v5696_v46 = vld [vmem:[%s6855_s10 + $0x28] sm:$0xff]  ;;  %v5695_v61 = vld [vmem:[%s6855_s10 + $0x20] sm:$0xff] }
 0x248   : > { %v3323_v11 = vpop.f32.mrf.mxu0 }
 0x249   : > { %v3296_v50 = vadd.f32 %v3295_v62, %v3282_v24  ;;  %v3324_v14 = vadd.f32 %v3323_v11, %v1693_v8  ;;  %v5697_v62 = vld [vmem:[%s6855_s10 + $0x30] sm:$0xff] }
 0x24a   : > { %v3297_v10 = vpop.f32.mrf.mxu2  ;;  %3826 = vmatpush.bf16.msra.mxu0 %v5697_v62  ;;  %v5693_v24 = vld [vmem:[%s6855_s10 + $0x10] sm:$0xff] }
 0x24b   : > { %v3310_v48 = vadd.f32 %v3309_v17, %v3296_v50  ;;  %v5694_v17 = vld [vmem:[%s6855_s10 + $0x18] sm:$0xff] }
 0x24c   : > { %v3311_v40 = vpop.f32.mrf.mxu3 }
 0x24d   : > { %v3428_v3 = vmax.f32 %v3310_v48, 0.0 }
 0x24e   : > { %v3283_v20 = vpop.f32.mrf.mxu1  ;;  %3827 = vmatpush.bf16.msra.mxu0 %v5696_v46 }
 0x24f   : > { %v3284_v32 = vadd.f32 %v3283_v20, %v3270_v7 }
 0x250   : > { %v3325_v25 = vpop.f32.mrf.mxu0 }
 0x251   : > { %v3298_v36 = vadd.f32 %v3297_v10, %v3284_v32  ;;  %v3326_v28 = vadd.f32 %v3325_v25, %v1693_v8  ;;  %v5808_v32 = vld [vmem:[%s6854_s9] ss:$0 sm:$0xff] }
 0x252   : > { %3828 = vmatpush.bf16.msra.mxu0 %v5695_v61 }
 0x253   : > { %v3312_v51 = vadd.f32 %v3311_v40, %v3298_v36 }
 0x255   : > { %v3432_v47 = vmax.f32 %v3312_v51, 0.0 }
 0x256   : > { %3829 = vmatpush.bf16.msra.mxu0 %v5694_v17 }
 0x257   : > { %v3436_v35 = vpack.c.bf16 %v3432_v47, %v3428_v3 }
 0x259   : > { %3734 = vmatmul.bf16.vlgmr.msra.gmra.mxu2 %v3436_v35 }
 0x25a   : > { %3830 = vmatpush.bf16.msra.mxu0 %v5693_v24 }
 0x25e   : > { %3831 = vmatpush.bf16.msra.mxu0 %v5692_v60 }
 0x262   : > { %v3351_v5 = vpop.f32.mrf.mxu2  ;;  %3832 = vmatpush.bf16.msra.mxu0 %v5691_v55 }
 0x264   : > { %v3365_v33 = vpop.f32.mrf.mxu3 }
 0x266   : > { %v3337_v59 = vpop.f32.mrf.mxu1 }
 0x267   : > { %v3338_v27 = vadd.f32 %v3337_v59, %v3324_v14 }
 0x268   : > { %v3379_v43 = vpop.f32.mrf.mxu0 }
 0x269   : > { %v3352_v15 = vadd.f32 %v3351_v5, %v3338_v27  ;;  %v5809_v5 = vld [vmem:[%s6856_s11] ss:$0 sm:$0xff] }
 0x26a   : > { %v3353_v30 = vpop.f32.mrf.mxu2 }
 0x26b   : > { %v3366_v45 = vadd.f32 %v3365_v33, %v3352_v15 }
 0x26c   : > { %v3367_v1 = vpop.f32.mrf.mxu3 }
 0x26d   : > { %v3380_v4 = vadd.f32 %v3379_v43, %v3366_v45 }
 0x26e   : > { %v3339_v44 = vpop.f32.mrf.mxu1 }
 0x26f   : > { %v3340_v9 = vadd.f32 %v3339_v44, %v3326_v28 }
 0x270   : > { %v3381_v56 = vpop.f32.mrf.mxu0 }
 0x271   : > { %v3354_v23 = vadd.f32 %v3353_v30, %v3340_v9 }
 0x273   : > { %v3368_v21 = vadd.f32 %v3367_v1, %v3354_v23 }
 0x275   : > { %v3382_v13 = vadd.f32 %v3381_v56, %v3368_v21 }
 0x282   : > { %v3407_v0 = vpop.f32.mrf.mxu2 }
 0x284   : > { %v3421_v53 = vpop.f32.mrf.mxu3 }
 0x286   : > { %v3393_v52 = vpop.f32.mrf.mxu1 }
 0x287   : > { %v3394_v41 = vadd.f32 %v3393_v52, %v3380_v4 }
 0x288   : > { %v3707_v50 = vpop.f32.mrf.mxu0 }
 0x289   : > { %v3408_v12 = vadd.f32 %v3407_v0, %v3394_v41  ;;  %v3708_v48 = vadd.f32 %v5808_v32, %v3707_v50 }
 0x28a   : > { %v3409_v16 = vpop.f32.mrf.mxu2 }
 0x28b   : > { %v3422_v31 = vadd.f32 %v3421_v53, %v3408_v12 }
 0x28c   : > { %v3423_v18 = vpop.f32.mrf.mxu3 }
 0x28d   : > { %v3429_v26 = vmax.f32 %v3422_v31, 0.0 }
 0x28e   : > { %v3395_v19 = vpop.f32.mrf.mxu1 }
 0x28f   : > { %v3396_v34 = vadd.f32 %v3395_v19, %v3382_v13 }
 0x290   : > { %v3709_v22 = vpop.f32.mrf.mxu0 }
 0x291   : > { %v3410_v29 = vadd.f32 %v3409_v16, %v3396_v34  ;;  %v3710_v37 = vadd.f32 %v5808_v32, %v3709_v22 }
 0x293   : > { %v3424_v38 = vadd.f32 %v3423_v18, %v3410_v29 }
 0x295   : > { %v3433_v57 = vmax.f32 %v3424_v38, 0.0 }
 0x297   : > { %v3437_v63 = vpack.c.bf16 %v3433_v57, %v3429_v26 }
 0x299   : > { %3748 = vmatmul.bf16.vlgmr.msra.gmra.mxu3 %v3437_v63 }
 0x2a6   : > { %v3721_v7 = vpop.f32.mrf.mxu1 }
 0x2a7   : > { %v3722_v40 = vadd.f32 %v3721_v7, %v3708_v48 }
 0x2ae   : > { %v3723_v36 = vpop.f32.mrf.mxu1 }
 0x2af   : > { %v3724_v3 = vadd.f32 %v3723_v36, %v3710_v37 }
 0x2dc   : > { %v3735_v20 = vpop.f32.mrf.mxu2 }
 0x2dd   : > { %v3736_v47 = vadd.f32 %v3735_v20, %v3722_v40 }
 0x2e4   : > { %v3737_v51 = vpop.f32.mrf.mxu2 }
 0x2e5   : > { %v3738_v35 = vadd.f32 %v3737_v51, %v3724_v3 }
 0x31c   : > { %v3749_v10 = vpop.f32.mrf.mxu3 }
 0x31d   : > { %v3750_v6 = vadd.f32 %v3749_v10, %v3736_v47 }
 0x31f   : > { %v3754_v49 = vmax.f32 %v3750_v6, 0.0 }
 0x324   : > { %v3751_v54 = vpop.f32.mrf.mxu3 }
 0x325   : > { %v3752_v39 = vadd.f32 %v3751_v54, %v3738_v35 }
 0x327   : > { %v3755_v11 = vmax.f32 %v3752_v39, 0.0 }
 0x329   : > { %v3756_v42 = vpack.c.bf16 %v3755_v11, %v3754_v49 }
 0x32b   : > { %3833 = vmatmul.bf16.vlgmr.msra.gmra.mxu0 %v3756_v42 }
 0x3a8   : > { %v3834_v59 = vpop.f32.mrf.mxu0 }
 0x3a9   : > { %v3835_v8 = vadd.f32 %v5809_v5, %v3834_v59 }
 0x3ab   : > { %3839 = vst [vmem:[%s519_s21] sm:$0xff] %v3835_v8 }
 0x3b0   : > { %v3836_v33 = vpop.f32.mrf.mxu0 }
 0x3b1   : > { %v3837_v58 = vadd.f32 %v5809_v5, %v3836_v33 }
 0x3b3   : > { %3840 = vst [vmem:[%s519_s21 + $0x8] sm:$0xff] %v3837_v58 }
 0x3b4   : > { %6017 = shalt.err (!%p6014_p8)
}
 0x3b5   : > { %s6082_s6 = smov 128   ;;  %s6083_s26 = smov 8  }
 0x3b6   : > { %5724 = dma.vmem_to_hbm [thread:$0]  (%p6187_p5), %s3855_s28, 256, %s3857_s17, %s3842_s20, %s6082_s6, %s6082_s6, %s6083_s26  }
 0x3b7 PF: > { %s6895_s19 = sld [smem:[#allocation21_spill]] }
 0x3b8   : > { %s6896_s12 = sld [smem:[#allocation19_spill]] }
 0x3bd   : > { %p5761_p9 = scmp.ge.s32.totalorder %s6895_s19, 2 }
 0x3be   : > { %s3871_s14 = sand.u32 1, %s6896_s12  }
 0x3bf   : > { %p5746_p10 = pnand %p5761_p9, %p6191_p6  ;;  %s3872_s13 = scalar_lea.sflag [#allocation4], %s3871_s14 }
 0x3c1   : > { %p5747_p11 = pneg %p5746_p10 }
 0x3c3   : > { %6051 = dma.done.wait (%p5747_p11), %s3872_s13, 256  }
 0x3c4   : > { %6053 = vsyncadd (%p5747_p11), %s3872_s13, 4294967040  ;;  %s6898_s24 = sld [smem:[#allocation22_spill]]  ;;  %s6901_s21 = smov %s6060_s22 }
 0x3c5   : > { %s6899_s15 = sld [smem:[#allocation20_spill]] }
 0x3c6   : > { %s6900_s23 = sld [smem:[#allocation23_spill]] }
 0x3ca   : > { %p26_p12 = scmp.ge.s32.totalorder %s6898_s24, 5  }
 0x3cb   : > { %s6902_s22 = smov %s6899_s15 }
 0x3cc   :  { %28 = sbr.rel (!%p26_p12) target bundleno = 11 (0xb), region = 131 }
 0x3d1   :  { %3878 = vsyncpa [#allocation3], 1 }
 0x3d2   :  { %3880 = vsyncpa [#allocation3 + $0x1], 1 }
 0x3d3   :  { %3881 = vsyncpa [#allocation6], 1 }
 0x3d4   :  { %3882 = vsyncpa [#allocation9], 1 }
 0x3d5   :  { %3883 = vsyncpa [#allocation12], 1 }
 0x3d6   :  { %3884 = vsyncpa [#allocation4], 1 }
 0x3d7   :  { %3886 = vsyncpa [#allocation4 + $0x1], 1 }

</bundles_post_ra>
